<compile_context>
chip_gen: v7x
topology: tpu7x:2x2x1
jax: 0.10.0
libtpu: 0.0.40
codegen_flags: <defaults>
</compile_context>

<pallas_src>
import functools

import jax
import jax.numpy as jnp
from jax.experimental import pallas as pl
from jax.experimental.pallas import tpu as pltpu


# ----------------------------------------------------------------------------
# Fused RRDB kernel
# ----------------------------------------------------------------------------
def _make_rrdb_kernel(C, Cpad, nb, H, W):
    Hp, Wp = H + 2, W + 2
    L = Hp * Wp                      # padded, flattened spatial length (lane axis)

    # per-conv K offsets inside the packed weight slab
    k_off, off = [], 0
    for i in range(nb):
        k_off.append(off)
        off += 9 * (i + 1) * Cpad

    def kernel(x_ref, w_ref, b_ref, mask_ref, o_ref, feat_ref, patch_ref):
        # feat_ref : (nb*Cpad, L + 2*Wp + 2) padded-frame feature buffer
        #            channel blocks: [block_in | y1 | ... | y_{nb-1}]
        # patch_ref: (9*nb*Cpad, L)          im2col staging buffer
        # Zero the feature buffer: halo and slack columns must be exactly 0.
        feat_ref[...] = jnp.zeros_like(feat_ref)

        x0 = x_ref[0]                                  # (C, L), already halo-padded
        feat_ref[0:C, 0:L] = x0                        # block input = x
        mask = mask_ref[...]                           # (1, L) f32 validity mask

        def conv(bi, ci):
            """conv #ci of dense block #bi over feat[0 : (ci+1)*Cpad]."""
            cin_tot = (ci + 1) * Cpad
            K = 9 * cin_tot
            # im2col: 9 shifted windows of the padded feature frame -> (K, L)
            for kh in range(3):
                for kw in range(3):
                    t = kh * 3 + kw
                    sh = kh * Wp + kw
                    patch_ref[t * cin_tot:(t + 1) * cin_tot, :] = (
                        feat_ref[0:cin_tot, sh:sh + L])
            w = w_ref[bi, :, k_off[ci]:k_off[ci] + K]          # (Cpad, K)
            acc = jax.lax.dot_general(
                w, patch_ref[0:K, :],
                dimension_numbers=(((1,), (0,)), ((), ())),
                preferred_element_type=jnp.float32)            # (Cpad, L) f32
            acc = (acc + b_ref[bi, ci].astype(jnp.float32)) * mask
            return acc                                         # zeros at invalid q

        for bi in range(3):                    # rrdb1, rrdb2, rrdb3
            for ci in range(nb):
                y = conv(bi, ci)
                if ci < nb - 1:
                    # append y to the growing feature list (padded frame: shift Wp+1)
                    feat_ref[(ci + 1) * Cpad:(ci + 2) * Cpad, Wp + 1:Wp + 1 + L] = (
                        y.astype(feat_ref.dtype))
                else:
                    # DenseBlock residual: block_in <- block_in + 0.2 * y_last
                    cur = feat_ref[0:Cpad, Wp + 1:Wp + 1 + L]
                    feat_ref[0:Cpad, Wp + 1:Wp + 1 + L] = (
                        cur + (0.2 * y).astype(feat_ref.dtype))

        # outer RRDB residual: out = x + 0.2 * out3   (lane-dense (C, L) store)
        o_ref[0] = (x0 + 0.2 * feat_ref[0:C, 0:L]).astype(o_ref.dtype)

    return kernel


# ----------------------------------------------------------------------------
# Wrapper: packing + pallas_call (NCHW in / NCHW out, like the PyTorch module)
# ----------------------------------------------------------------------------
def _pack_rrdb_params(params, C, Cpad, nb, dtype):
    """Pack per-conv OIHW weights into one lane-aligned 2-D slab per DenseBlock.

    Packed layout per conv: (Cpad, 9 * m * Cpad) with K index
      t * (m*Cpad) + j * Cpad + c,  t = kh*3 + kw,  source j, channel c (< C).
    """
    w_blocks, b_blocks = [], []
    for db in params:
        w_rows, b_rows = [], []
        for i, (w, b) in enumerate(db):
            cout, cin = w.shape[0], w.shape[1]
            m = i + 1
            assert cin == m * C and cout == C
            wt = jnp.transpose(w, (0, 2, 3, 1)).reshape(cout, 9, m, C)
            wt = jnp.pad(wt, ((0, Cpad - cout), (0, 0), (0, 0), (0, Cpad - C)))
            w_rows.append(wt.reshape(Cpad, 9 * m * Cpad))
            b_rows.append(jnp.pad(b, (0, Cpad - cout)))
        w_blocks.append(jnp.concatenate(w_rows, axis=1))       # (Cpad, Ktot)
        b_blocks.append(jnp.stack(b_rows, axis=0))             # (nb, Cpad)
    w_all = jnp.stack(w_blocks, axis=0).astype(dtype)          # (3, Cpad, Ktot)
    b_all = jnp.stack(b_blocks, axis=0)[..., None].astype(jnp.float32)  # (3,nb,Cpad,1)
    return w_all, b_all


def rrdb_forward_nchw(x, params, num_blocks=3):
    N, C, H, W = x.shape
    nb = num_blocks
    Cpad = max(8, ((C + 7) // 8) * 8)
    Hp, Wp = H + 2, W + 2
    L = Hp * Wp
    Lbuf = L + 2 * Wp + 2            # slack so every tap window stays in-bounds

    w_all, b_all = _pack_rrdb_params(params, C, Cpad, nb, x.dtype)
    ktot = w_all.shape[-1]

    # Halo-pad the network input ONCE and flatten spatial onto the lane axis.
    # (All 9 convs' halos / concats are handled in VMEM inside the kernel.)
    xp = jnp.pad(x, ((0, 0), (0, 0), (1, 1), (1, 1))).reshape(N, C, L)

    # Validity mask over origin-aligned conv-output coordinates (built host-side
    # to keep integer div/mod out of the kernel).
    q = jnp.arange(L, dtype=jnp.int32)
    mask = (((q // Wp) < H) & ((q % Wp) < W)).astype(jnp.float32).reshape(1, L)

    kernel = _make_rrdb_kernel(C=C, Cpad=Cpad, nb=nb, H=H, W=W)

    out_flat = pl.pallas_call(
        kernel,
        out_shape=jax.ShapeDtypeStruct((N, C, L), x.dtype),
        grid=(N,),
        in_specs=[
            pl.BlockSpec((1, C, L), lambda n: (n, 0, 0)),            # x (padded-flat)
            pl.BlockSpec((3, Cpad, ktot), lambda n: (0, 0, 0)),      # packed weights
            pl.BlockSpec((3, nb, Cpad, 1), lambda n: (0, 0, 0, 0)),  # packed biases
            pl.BlockSpec((1, L), lambda n: (0, 0)),                  # validity mask
        ],
        out_specs=pl.BlockSpec((1, C, L), lambda n: (n, 0, 0)),
        scratch_shapes=[
            pltpu.VMEM((nb * Cpad, Lbuf), x.dtype),        # padded feature frame
            pltpu.VMEM((9 * nb * Cpad, L), x.dtype),       # im2col staging
        ],
        compiler_params=pltpu.CompilerParams(
            dimension_semantics=("parallel",)),
    )(xp, w_all, b_all, mask)

    # drop the halo (cheap XLA slice on a small tensor)
    return out_flat.reshape(N, C, Hp, Wp)[:, :, 1:H + 1, 1:W + 1]


# ----------------------------------------------------------------------------
# Deterministic parameter init (mirrors the PyTorch __init__, is_upsample=False)
# ----------------------------------------------------------------------------
def init_rrdb_params(key, in_channels, num_blocks=3):
    C = in_channels
    params = []
    for _dense in range(3):                      # rrdb1, rrdb2, rrdb3
        convs = []
        for i in range(num_blocks):
            cin = C * (i + 1)
            cout = C                             # out_channels == in_channels here
            key, kw_, kb_ = jax.random.split(key, 3)
            w = 0.05 * jax.random.normal(kw_, (cout, cin, 3, 3), jnp.float32)  # OIHW
            b = 0.05 * jax.random.normal(kb_, (cout,), jnp.float32)
            convs.append((w, b))
        params.append(convs)
    return params


# ----------------------------------------------------------------------------
# Pure-JAX reference (lax conv) for a correctness check
# ----------------------------------------------------------------------------
def _conv3x3_ref(x, w, b):
    y = jax.lax.conv_general_dilated(
        x, w, window_strides=(1, 1), padding="SAME",
        dimension_numbers=("NCHW", "OIHW", "NCHW"),
        precision=jax.lax.Precision.HIGHEST)
    return y + b[None, :, None, None]


def _rrdb_ref(x, params):
    out = x
    for db in params:
        prev = out
        cur = out
        for (w, b) in db:
            cur = _conv3x3_ref(prev, w, b)
            prev = jnp.concatenate([prev, cur], axis=1)
        out = out + 0.2 * cur
    return x + 0.2 * out


if __name__ == "__main__":
    key = jax.random.PRNGKey(0)
    k_x, k_p = jax.random.split(key)

    N, C, H, W = 2, 4, 16, 16
    x = jax.random.normal(k_x, (N, C, H, W), jnp.float32)    # NCHW, like PyTorch
    params = init_rrdb_params(k_p, in_channels=C, num_blocks=3)

    fwd = jax.jit(functools.partial(rrdb_forward_nchw, num_blocks=3))
    out = jax.block_until_ready(fwd(x, params))

    ref = jax.block_until_ready(_rrdb_ref(x, params))
    assert out.shape == (N, C, H, W)
    assert jnp.allclose(out, ref, atol=2e-3, rtol=2e-3), "mismatch vs reference"

    print("KERNEL_OK")
</pallas_src>

<mosaic_0001>
module attributes {stable_mosaic.version = 11 : i64} {
  func.func @kernel(%arg0: i32, %arg1: memref<1x4x324xf32, #tpu.memory_space<vmem>>, %arg2: memref<3x8x432xf32, #tpu.memory_space<vmem>>, %arg3: memref<3x3x8x1xf32, #tpu.memory_space<vmem>>, %arg4: memref<1x324xf32, #tpu.memory_space<vmem>>, %arg5: memref<1x4x324xf32, #tpu.memory_space<vmem>>, %arg6: memref<24x362xf32, #tpu.memory_space<vmem>>, %arg7: memref<216x324xf32, #tpu.memory_space<vmem>>) attributes {dimension_semantics = [#tpu.dimension_semantics<parallel>], iteration_bounds = array<i64: 2>, scalar_prefetch = 0 : i64, scratch_operands = 2 : i64, tpu.core_type = #tpu.core_type<tc>, window_params = [{transform_indices = @transform_0, window_bounds = array<i64: 1, 4, 324>}, {pipeline_mode = #tpu.pipeline_mode<synchronous>, transform_indices = @transform_1, window_bounds = array<i64: 3, 8, 432>}, {pipeline_mode = #tpu.pipeline_mode<synchronous>, transform_indices = @transform_2, window_bounds = array<i64: 3, 3, 8, 1>}, {pipeline_mode = #tpu.pipeline_mode<synchronous>, transform_indices = @transform_3, window_bounds = array<i64: 1, 324>}, {transform_indices = @transform_4, window_bounds = array<i64: 1, 4, 324>}]} {
    %cst = arith.constant 0.000000e+00 : f32
    %0 = vector.broadcast %cst : f32 to vector<24x362xf32>
    %c0 = arith.constant 0 : index
    %c0_0 = arith.constant 0 : index
    %1 = vector.load %arg6[%c0, %c0_0] : memref<24x362xf32, #tpu.memory_space<vmem>>, vector<24x362xf32>
    tpu.vector_store %arg6[%c0, %c0_0], %0 {strides = array<i32>} : memref<24x362xf32, #tpu.memory_space<vmem>>, vector<24x362xf32>,
    %c0_1 = arith.constant 0 : index
    %c0_2 = arith.constant 0 : index
    %c0_3 = arith.constant 0 : index
    %2 = vector.load %arg1[%c0_1, %c0_2, %c0_3] : memref<1x4x324xf32, #tpu.memory_space<vmem>>, vector<1x4x324xf32>
    %3 = vector.shape_cast %2 : vector<1x4x324xf32> to vector<4x324xf32>
    %c0_4 = arith.constant 0 : index
    %c0_5 = arith.constant 0 : index
    %4 = vector.load %arg6[%c0_4, %c0_5] : memref<24x362xf32, #tpu.memory_space<vmem>>, vector<4x324xf32>
    tpu.vector_store %arg6[%c0_4, %c0_5], %3 {strides = array<i32>} : memref<24x362xf32, #tpu.memory_space<vmem>>, vector<4x324xf32>,
    %c0_6 = arith.constant 0 : index
    %c0_7 = arith.constant 0 : index
    %5 = vector.load %arg4[%c0_6, %c0_7] : memref<1x324xf32, #tpu.memory_space<vmem>>, vector<1x324xf32>
    %c0_8 = arith.constant 0 : index
    %c0_9 = arith.constant 0 : index
    %6 = vector.load %arg6[%c0_8, %c0_9] : memref<24x362xf32, #tpu.memory_space<vmem>>, vector<8x324xf32>
    %c0_10 = arith.constant 0 : index
    %c0_11 = arith.constant 0 : index
    %7 = vector.load %arg7[%c0_10, %c0_11] : memref<216x324xf32, #tpu.memory_space<vmem>>, vector<8x324xf32>
    tpu.vector_store %arg7[%c0_10, %c0_11], %6 {strides = array<i32>} : memref<216x324xf32, #tpu.memory_space<vmem>>, vector<8x324xf32>,
    %c0_12 = arith.constant 0 : index
    %c1 = arith.constant 1 : index
    %8 = vector.load %arg6[%c0_12, %c1] : memref<24x362xf32, #tpu.memory_space<vmem>>, vector<8x324xf32>
    %c8 = arith.constant 8 : index
    %c0_13 = arith.constant 0 : index
    %9 = vector.load %arg7[%c8, %c0_13] : memref<216x324xf32, #tpu.memory_space<vmem>>, vector<8x324xf32>
    tpu.vector_store %arg7[%c8, %c0_13], %8 {strides = array<i32>} : memref<216x324xf32, #tpu.memory_space<vmem>>, vector<8x324xf32>,
    %c0_14 = arith.constant 0 : index
    %c2 = arith.constant 2 : index
    %10 = vector.load %arg6[%c0_14, %c2] : memref<24x362xf32, #tpu.memory_space<vmem>>, vector<8x324xf32>
    %c16 = arith.constant 16 : index
    %c0_15 = arith.constant 0 : index
    %11 = vector.load %arg7[%c16, %c0_15] : memref<216x324xf32, #tpu.memory_space<vmem>>, vector<8x324xf32>
    tpu.vector_store %arg7[%c16, %c0_15], %10 {strides = array<i32>} : memref<216x324xf32, #tpu.memory_space<vmem>>, vector<8x324xf32>,
    %c0_16 = arith.constant 0 : index
    %c18 = arith.constant 18 : index
    %12 = vector.load %arg6[%c0_16, %c18] : memref<24x362xf32, #tpu.memory_space<vmem>>, vector<8x324xf32>
    %c24 = arith.constant 24 : index
    %c0_17 = arith.constant 0 : index
    %13 = vector.load %arg7[%c24, %c0_17] : memref<216x324xf32, #tpu.memory_space<vmem>>, vector<8x324xf32>
    tpu.vector_store %arg7[%c24, %c0_17], %12 {strides = array<i32>} : memref<216x324xf32, #tpu.memory_space<vmem>>, vector<8x324xf32>,
    %c0_18 = arith.constant 0 : index
    %c19 = arith.constant 19 : index
    %14 = vector.load %arg6[%c0_18, %c19] : memref<24x362xf32, #tpu.memory_space<vmem>>, vector<8x324xf32>
    %c32 = arith.constant 32 : index
    %c0_19 = arith.constant 0 : index
    %15 = vector.load %arg7[%c32, %c0_19] : memref<216x324xf32, #tpu.memory_space<vmem>>, vector<8x324xf32>
    tpu.vector_store %arg7[%c32, %c0_19], %14 {strides = array<i32>} : memref<216x324xf32, #tpu.memory_space<vmem>>, vector<8x324xf32>,
    %c0_20 = arith.constant 0 : index
    %c20 = arith.constant 20 : index
    %16 = vector.load %arg6[%c0_20, %c20] : memref<24x362xf32, #tpu.memory_space<vmem>>, vector<8x324xf32>
    %c40 = arith.constant 40 : index
    %c0_21 = arith.constant 0 : index
    %17 = vector.load %arg7[%c40, %c0_21] : memref<216x324xf32, #tpu.memory_space<vmem>>, vector<8x324xf32>
    tpu.vector_store %arg7[%c40, %c0_21], %16 {strides = array<i32>} : memref<216x324xf32, #tpu.memory_space<vmem>>, vector<8x324xf32>,
    %c0_22 = arith.constant 0 : index
    %c36 = arith.constant 36 : index
    %18 = vector.load %arg6[%c0_22, %c36] : memref<24x362xf32, #tpu.memory_space<vmem>>, vector<8x324xf32>
    %c48 = arith.constant 48 : index
    %c0_23 = arith.constant 0 : index
    %19 = vector.load %arg7[%c48, %c0_23] : memref<216x324xf32, #tpu.memory_space<vmem>>, vector<8x324xf32>
    tpu.vector_store %arg7[%c48, %c0_23], %18 {strides = array<i32>} : memref<216x324xf32, #tpu.memory_space<vmem>>, vector<8x324xf32>,
    %c0_24 = arith.constant 0 : index
    %c37 = arith.constant 37 : index
    %20 = vector.load %arg6[%c0_24, %c37] : memref<24x362xf32, #tpu.memory_space<vmem>>, vector<8x324xf32>
    %c56 = arith.constant 56 : index
    %c0_25 = arith.constant 0 : index
    %21 = vector.load %arg7[%c56, %c0_25] : memref<216x324xf32, #tpu.memory_space<vmem>>, vector<8x324xf32>
    tpu.vector_store %arg7[%c56, %c0_25], %20 {strides = array<i32>} : memref<216x324xf32, #tpu.memory_space<vmem>>, vector<8x324xf32>,
    %c0_26 = arith.constant 0 : index
    %c38 = arith.constant 38 : index
    %22 = vector.load %arg6[%c0_26, %c38] : memref<24x362xf32, #tpu.memory_space<vmem>>, vector<8x324xf32>
    %c64 = arith.constant 64 : index
    %c0_27 = arith.constant 0 : index
    %23 = vector.load %arg7[%c64, %c0_27] : memref<216x324xf32, #tpu.memory_space<vmem>>, vector<8x324xf32>
    tpu.vector_store %arg7[%c64, %c0_27], %22 {strides = array<i32>} : memref<216x324xf32, #tpu.memory_space<vmem>>, vector<8x324xf32>,
    %c0_28 = arith.constant 0 : index
    %c0_29 = arith.constant 0 : index
    %c0_30 = arith.constant 0 : index
    %24 = vector.load %arg2[%c0_28, %c0_29, %c0_30] : memref<3x8x432xf32, #tpu.memory_space<vmem>>, vector<1x8x72xf32>
    %25 = vector.shape_cast %24 : vector<1x8x72xf32> to vector<8x72xf32>
    %c0_31 = arith.constant 0 : index
    %c0_32 = arith.constant 0 : index
    %26 = vector.load %arg7[%c0_31, %c0_32] : memref<216x324xf32, #tpu.memory_space<vmem>>, vector<72x324xf32>
    %cst_33 = arith.constant dense<0.000000e+00> : vector<8x324xf32>
    %27 = tpu.matmul %25, %26, %cst_33 {dimension_numbers = #tpu.dot_dimension_numbers<[1], [0], [0], [1], [0, 0, 1, 1], [], []>} : vector<8x72xf32>, vector<72x324xf32>, vector<8x324xf32> -> vector<8x324xf32>
    %c0_34 = arith.constant 0 : index
    %c0_35 = arith.constant 0 : index
    %c0_36 = arith.constant 0 : index
    %c0_37 = arith.constant 0 : index
    %28 = vector.load %arg3[%c0_34, %c0_35, %c0_36, %c0_37] : memref<3x3x8x1xf32, #tpu.memory_space<vmem>>, vector<1x1x8x1xf32>
    %29 = vector.shape_cast %28 : vector<1x1x8x1xf32> to vector<8x1xf32>
    %30 = vector.broadcast %29 : vector<8x1xf32> to vector<8x324xf32>
    %31 = arith.addf %27, %30 : vector<8x324xf32>
    %32 = vector.broadcast %5 : vector<1x324xf32> to vector<8x324xf32>
    %33 = arith.mulf %31, %32 : vector<8x324xf32>
    %c8_38 = arith.constant 8 : index
    %c19_39 = arith.constant 19 : index
    %34 = vector.load %arg6[%c8_38, %c19_39] : memref<24x362xf32, #tpu.memory_space<vmem>>, vector<8x324xf32>
    tpu.vector_store %arg6[%c8_38, %c19_39], %33 {strides = array<i32>} : memref<24x362xf32, #tpu.memory_space<vmem>>, vector<8x324xf32>,
    %c0_40 = arith.constant 0 : index
    %c0_41 = arith.constant 0 : index
    %35 = vector.load %arg6[%c0_40, %c0_41] : memref<24x362xf32, #tpu.memory_space<vmem>>, vector<16x324xf32>
    %c0_42 = arith.constant 0 : index
    %c0_43 = arith.constant 0 : index
    %36 = vector.load %arg7[%c0_42, %c0_43] : memref<216x324xf32, #tpu.memory_space<vmem>>, vector<16x324xf32>
    tpu.vector_store %arg7[%c0_42, %c0_43], %35 {strides = array<i32>} : memref<216x324xf32, #tpu.memory_space<vmem>>, vector<16x324xf32>,
    %c0_44 = arith.constant 0 : index
    %c1_45 = arith.constant 1 : index
    %37 = vector.load %arg6[%c0_44, %c1_45] : memref<24x362xf32, #tpu.memory_space<vmem>>, vector<16x324xf32>
    %c16_46 = arith.constant 16 : index
    %c0_47 = arith.constant 0 : index
    %38 = vector.load %arg7[%c16_46, %c0_47] : memref<216x324xf32, #tpu.memory_space<vmem>>, vector<16x324xf32>
    tpu.vector_store %arg7[%c16_46, %c0_47], %37 {strides = array<i32>} : memref<216x324xf32, #tpu.memory_space<vmem>>, vector<16x324xf32>,
    %c0_48 = arith.constant 0 : index
    %c2_49 = arith.constant 2 : index
    %39 = vector.load %arg6[%c0_48, %c2_49] : memref<24x362xf32, #tpu.memory_space<vmem>>, vector<16x324xf32>
    %c32_50 = arith.constant 32 : index
    %c0_51 = arith.constant 0 : index
    %40 = vector.load %arg7[%c32_50, %c0_51] : memref<216x324xf32, #tpu.memory_space<vmem>>, vector<16x324xf32>
    tpu.vector_store %arg7[%c32_50, %c0_51], %39 {strides = array<i32>} : memref<216x324xf32, #tpu.memory_space<vmem>>, vector<16x324xf32>,
    %c0_52 = arith.constant 0 : index
    %c18_53 = arith.constant 18 : index
    %41 = vector.load %arg6[%c0_52, %c18_53] : memref<24x362xf32, #tpu.memory_space<vmem>>, vector<16x324xf32>
    %c48_54 = arith.constant 48 : index
    %c0_55 = arith.constant 0 : index
    %42 = vector.load %arg7[%c48_54, %c0_55] : memref<216x324xf32, #tpu.memory_space<vmem>>, vector<16x324xf32>
    tpu.vector_store %arg7[%c48_54, %c0_55], %41 {strides = array<i32>} : memref<216x324xf32, #tpu.memory_space<vmem>>, vector<16x324xf32>,
    %c0_56 = arith.constant 0 : index
    %c19_57 = arith.constant 19 : index
    %43 = vector.load %arg6[%c0_56, %c19_57] : memref<24x362xf32, #tpu.memory_space<vmem>>, vector<16x324xf32>
    %c64_58 = arith.constant 64 : index
    %c0_59 = arith.constant 0 : index
    %44 = vector.load %arg7[%c64_58, %c0_59] : memref<216x324xf32, #tpu.memory_space<vmem>>, vector<16x324xf32>
    tpu.vector_store %arg7[%c64_58, %c0_59], %43 {strides = array<i32>} : memref<216x324xf32, #tpu.memory_space<vmem>>, vector<16x324xf32>,
    %c0_60 = arith.constant 0 : index
    %c20_61 = arith.constant 20 : index
    %45 = vector.load %arg6[%c0_60, %c20_61] : memref<24x362xf32, #tpu.memory_space<vmem>>, vector<16x324xf32>
    %c80 = arith.constant 80 : index
    %c0_62 = arith.constant 0 : index
    %46 = vector.load %arg7[%c80, %c0_62] : memref<216x324xf32, #tpu.memory_space<vmem>>, vector<16x324xf32>
    tpu.vector_store %arg7[%c80, %c0_62], %45 {strides = array<i32>} : memref<216x324xf32, #tpu.memory_space<vmem>>, vector<16x324xf32>,
    %c0_63 = arith.constant 0 : index
    %c36_64 = arith.constant 36 : index
    %47 = vector.load %arg6[%c0_63, %c36_64] : memref<24x362xf32, #tpu.memory_space<vmem>>, vector<16x324xf32>
    %c96 = arith.constant 96 : index
    %c0_65 = arith.constant 0 : index
    %48 = vector.load %arg7[%c96, %c0_65] : memref<216x324xf32, #tpu.memory_space<vmem>>, vector<16x324xf32>
    tpu.vector_store %arg7[%c96, %c0_65], %47 {strides = array<i32>} : memref<216x324xf32, #tpu.memory_space<vmem>>, vector<16x324xf32>,
    %c0_66 = arith.constant 0 : index
    %c37_67 = arith.constant 37 : index
    %49 = vector.load %arg6[%c0_66, %c37_67] : memref<24x362xf32, #tpu.memory_space<vmem>>, vector<16x324xf32>
    %c112 = arith.constant 112 : index
    %c0_68 = arith.constant 0 : index
    %50 = vector.load %arg7[%c112, %c0_68] : memref<216x324xf32, #tpu.memory_space<vmem>>, vector<16x324xf32>
    tpu.vector_store %arg7[%c112, %c0_68], %49 {strides = array<i32>} : memref<216x324xf32, #tpu.memory_space<vmem>>, vector<16x324xf32>,
    %c0_69 = arith.constant 0 : index
    %c38_70 = arith.constant 38 : index
    %51 = vector.load %arg6[%c0_69, %c38_70] : memref<24x362xf32, #tpu.memory_space<vmem>>, vector<16x324xf32>
    %c128 = arith.constant 128 : index
    %c0_71 = arith.constant 0 : index
    %52 = vector.load %arg7[%c128, %c0_71] : memref<216x324xf32, #tpu.memory_space<vmem>>, vector<16x324xf32>
    tpu.vector_store %arg7[%c128, %c0_71], %51 {strides = array<i32>} : memref<216x324xf32, #tpu.memory_space<vmem>>, vector<16x324xf32>,
    %c0_72 = arith.constant 0 : index
    %c0_73 = arith.constant 0 : index
    %c72 = arith.constant 72 : index
    %53 = vector.load %arg2[%c0_72, %c0_73, %c72] : memref<3x8x432xf32, #tpu.memory_space<vmem>>, vector<1x8x144xf32>
    %54 = vector.shape_cast %53 : vector<1x8x144xf32> to vector<8x144xf32>
    %c0_74 = arith.constant 0 : index
    %c0_75 = arith.constant 0 : index
    %55 = vector.load %arg7[%c0_74, %c0_75] : memref<216x324xf32, #tpu.memory_space<vmem>>, vector<144x324xf32>
    %cst_76 = arith.constant dense<0.000000e+00> : vector<8x324xf32>
    %56 = tpu.matmul %54, %55, %cst_76 {dimension_numbers = #tpu.dot_dimension_numbers<[1], [0], [0], [1], [0, 0, 1, 1], [], []>} : vector<8x144xf32>, vector<144x324xf32>, vector<8x324xf32> -> vector<8x324xf32>
    %c0_77 = arith.constant 0 : index
    %c1_78 = arith.constant 1 : index
    %c0_79 = arith.constant 0 : index
    %c0_80 = arith.constant 0 : index
    %57 = vector.load %arg3[%c0_77, %c1_78, %c0_79, %c0_80] : memref<3x3x8x1xf32, #tpu.memory_space<vmem>>, vector<1x1x8x1xf32>
    %58 = vector.shape_cast %57 : vector<1x1x8x1xf32> to vector<8x1xf32>
    %59 = vector.broadcast %58 : vector<8x1xf32> to vector<8x324xf32>
    %60 = arith.addf %56, %59 : vector<8x324xf32>
    %61 = vector.broadcast %5 : vector<1x324xf32> to vector<8x324xf32>
    %62 = arith.mulf %60, %61 : vector<8x324xf32>
    %c16_81 = arith.constant 16 : index
    %c19_82 = arith.constant 19 : index
    %63 = vector.load %arg6[%c16_81, %c19_82] : memref<24x362xf32, #tpu.memory_space<vmem>>, vector<8x324xf32>
    tpu.vector_store %arg6[%c16_81, %c19_82], %62 {strides = array<i32>} : memref<24x362xf32, #tpu.memory_space<vmem>>, vector<8x324xf32>,
    %c0_83 = arith.constant 0 : index
    %c0_84 = arith.constant 0 : index
    %64 = vector.load %arg6[%c0_83, %c0_84] : memref<24x362xf32, #tpu.memory_space<vmem>>, vector<24x324xf32>
    %c0_85 = arith.constant 0 : index
    %c0_86 = arith.constant 0 : index
    %65 = vector.load %arg7[%c0_85, %c0_86] : memref<216x324xf32, #tpu.memory_space<vmem>>, vector<24x324xf32>
    tpu.vector_store %arg7[%c0_85, %c0_86], %64 {strides = array<i32>} : memref<216x324xf32, #tpu.memory_space<vmem>>, vector<24x324xf32>,
    %c0_87 = arith.constant 0 : index
    %c1_88 = arith.constant 1 : index
    %66 = vector.load %arg6[%c0_87, %c1_88] : memref<24x362xf32, #tpu.memory_space<vmem>>, vector<24x324xf32>
    %c24_89 = arith.constant 24 : index
    %c0_90 = arith.constant 0 : index
    %67 = vector.load %arg7[%c24_89, %c0_90] : memref<216x324xf32, #tpu.memory_space<vmem>>, vector<24x324xf32>
    tpu.vector_store %arg7[%c24_89, %c0_90], %66 {strides = array<i32>} : memref<216x324xf32, #tpu.memory_space<vmem>>, vector<24x324xf32>,
    %c0_91 = arith.constant 0 : index
    %c2_92 = arith.constant 2 : index
    %68 = vector.load %arg6[%c0_91, %c2_92] : memref<24x362xf32, #tpu.memory_space<vmem>>, vector<24x324xf32>
    %c48_93 = arith.constant 48 : index
    %c0_94 = arith.constant 0 : index
    %69 = vector.load %arg7[%c48_93, %c0_94] : memref<216x324xf32, #tpu.memory_space<vmem>>, vector<24x324xf32>
    tpu.vector_store %arg7[%c48_93, %c0_94], %68 {strides = array<i32>} : memref<216x324xf32, #tpu.memory_space<vmem>>, vector<24x324xf32>,
    %c0_95 = arith.constant 0 : index
    %c18_96 = arith.constant 18 : index
    %70 = vector.load %arg6[%c0_95, %c18_96] : memref<24x362xf32, #tpu.memory_space<vmem>>, vector<24x324xf32>
    %c72_97 = arith.constant 72 : index
    %c0_98 = arith.constant 0 : index
    %71 = vector.load %arg7[%c72_97, %c0_98] : memref<216x324xf32, #tpu.memory_space<vmem>>, vector<24x324xf32>
    tpu.vector_store %arg7[%c72_97, %c0_98], %70 {strides = array<i32>} : memref<216x324xf32, #tpu.memory_space<vmem>>, vector<24x324xf32>,
    %c0_99 = arith.constant 0 : index
    %c19_100 = arith.constant 19 : index
    %72 = vector.load %arg6[%c0_99, %c19_100] : memref<24x362xf32, #tpu.memory_space<vmem>>, vector<24x324xf32>
    %c96_101 = arith.constant 96 : index
    %c0_102 = arith.constant 0 : index
    %73 = vector.load %arg7[%c96_101, %c0_102] : memref<216x324xf32, #tpu.memory_space<vmem>>, vector<24x324xf32>
    tpu.vector_store %arg7[%c96_101, %c0_102], %72 {strides = array<i32>} : memref<216x324xf32, #tpu.memory_space<vmem>>, vector<24x324xf32>,
    %c0_103 = arith.constant 0 : index
    %c20_104 = arith.constant 20 : index
    %74 = vector.load %arg6[%c0_103, %c20_104] : memref<24x362xf32, #tpu.memory_space<vmem>>, vector<24x324xf32>
    %c120 = arith.constant 120 : index
    %c0_105 = arith.constant 0 : index
    %75 = vector.load %arg7[%c120, %c0_105] : memref<216x324xf32, #tpu.memory_space<vmem>>, vector<24x324xf32>
    tpu.vector_store %arg7[%c120, %c0_105], %74 {strides = array<i32>} : memref<216x324xf32, #tpu.memory_space<vmem>>, vector<24x324xf32>,
    %c0_106 = arith.constant 0 : index
    %c36_107 = arith.constant 36 : index
    %76 = vector.load %arg6[%c0_106, %c36_107] : memref<24x362xf32, #tpu.memory_space<vmem>>, vector<24x324xf32>
    %c144 = arith.constant 144 : index
    %c0_108 = arith.constant 0 : index
    %77 = vector.load %arg7[%c144, %c0_108] : memref<216x324xf32, #tpu.memory_space<vmem>>, vector<24x324xf32>
    tpu.vector_store %arg7[%c144, %c0_108], %76 {strides = array<i32>} : memref<216x324xf32, #tpu.memory_space<vmem>>, vector<24x324xf32>,
    %c0_109 = arith.constant 0 : index
    %c37_110 = arith.constant 37 : index
    %78 = vector.load %arg6[%c0_109, %c37_110] : memref<24x362xf32, #tpu.memory_space<vmem>>, vector<24x324xf32>
    %c168 = arith.constant 168 : index
    %c0_111 = arith.constant 0 : index
    %79 = vector.load %arg7[%c168, %c0_111] : memref<216x324xf32, #tpu.memory_space<vmem>>, vector<24x324xf32>
    tpu.vector_store %arg7[%c168, %c0_111], %78 {strides = array<i32>} : memref<216x324xf32, #tpu.memory_space<vmem>>, vector<24x324xf32>,
    %c0_112 = arith.constant 0 : index
    %c38_113 = arith.constant 38 : index
    %80 = vector.load %arg6[%c0_112, %c38_113] : memref<24x362xf32, #tpu.memory_space<vmem>>, vector<24x324xf32>
    %c192 = arith.constant 192 : index
    %c0_114 = arith.constant 0 : index
    %81 = vector.load %arg7[%c192, %c0_114] : memref<216x324xf32, #tpu.memory_space<vmem>>, vector<24x324xf32>
    tpu.vector_store %arg7[%c192, %c0_114], %80 {strides = array<i32>} : memref<216x324xf32, #tpu.memory_space<vmem>>, vector<24x324xf32>,
    %c0_115 = arith.constant 0 : index
    %c0_116 = arith.constant 0 : index
    %c216 = arith.constant 216 : index
    %82 = vector.load %arg2[%c0_115, %c0_116, %c216] : memref<3x8x432xf32, #tpu.memory_space<vmem>>, vector<1x8x216xf32>
    %83 = vector.shape_cast %82 : vector<1x8x216xf32> to vector<8x216xf32>
    %c0_117 = arith.constant 0 : index
    %c0_118 = arith.constant 0 : index
    %84 = vector.load %arg7[%c0_117, %c0_118] : memref<216x324xf32, #tpu.memory_space<vmem>>, vector<216x324xf32>
    %cst_119 = arith.constant dense<0.000000e+00> : vector<8x324xf32>
    %85 = tpu.matmul %83, %84, %cst_119 {dimension_numbers = #tpu.dot_dimension_numbers<[1], [0], [0], [1], [0, 0, 1, 1], [], []>} : vector<8x216xf32>, vector<216x324xf32>, vector<8x324xf32> -> vector<8x324xf32>
    %c0_120 = arith.constant 0 : index
    %c2_121 = arith.constant 2 : index
    %c0_122 = arith.constant 0 : index
    %c0_123 = arith.constant 0 : index
    %86 = vector.load %arg3[%c0_120, %c2_121, %c0_122, %c0_123] : memref<3x3x8x1xf32, #tpu.memory_space<vmem>>, vector<1x1x8x1xf32>
    %87 = vector.shape_cast %86 : vector<1x1x8x1xf32> to vector<8x1xf32>
    %88 = vector.broadcast %87 : vector<8x1xf32> to vector<8x324xf32>
    %89 = arith.addf %85, %88 : vector<8x324xf32>
    %90 = vector.broadcast %5 : vector<1x324xf32> to vector<8x324xf32>
    %91 = arith.mulf %89, %90 : vector<8x324xf32>
    %c0_124 = arith.constant 0 : index
    %c19_125 = arith.constant 19 : index
    %92 = vector.load %arg6[%c0_124, %c19_125] : memref<24x362xf32, #tpu.memory_space<vmem>>, vector<8x324xf32>
    %cst_126 = arith.constant 2.000000e-01 : f32
    %93 = vector.broadcast %cst_126 : f32 to vector<8x324xf32>
    %94 = arith.mulf %93, %91 : vector<8x324xf32>
    %95 = arith.addf %92, %94 : vector<8x324xf32>
    %c0_127 = arith.constant 0 : index
    %c19_128 = arith.constant 19 : index
    %96 = vector.load %arg6[%c0_127, %c19_128] : memref<24x362xf32, #tpu.memory_space<vmem>>, vector<8x324xf32>
    tpu.vector_store %arg6[%c0_127, %c19_128], %95 {strides = array<i32>} : memref<24x362xf32, #tpu.memory_space<vmem>>, vector<8x324xf32>,
    %c0_129 = arith.constant 0 : index
    %c0_130 = arith.constant 0 : index
    %97 = vector.load %arg6[%c0_129, %c0_130] : memref<24x362xf32, #tpu.memory_space<vmem>>, vector<8x324xf32>
    %c0_131 = arith.constant 0 : index
    %c0_132 = arith.constant 0 : index
    %98 = vector.load %arg7[%c0_131, %c0_132] : memref<216x324xf32, #tpu.memory_space<vmem>>, vector<8x324xf32>
    tpu.vector_store %arg7[%c0_131, %c0_132], %97 {strides = array<i32>} : memref<216x324xf32, #tpu.memory_space<vmem>>, vector<8x324xf32>,
    %c0_133 = arith.constant 0 : index
    %c1_134 = arith.constant 1 : index
    %99 = vector.load %arg6[%c0_133, %c1_134] : memref<24x362xf32, #tpu.memory_space<vmem>>, vector<8x324xf32>
    %c8_135 = arith.constant 8 : index
    %c0_136 = arith.constant 0 : index
    %100 = vector.load %arg7[%c8_135, %c0_136] : memref<216x324xf32, #tpu.memory_space<vmem>>, vector<8x324xf32>
    tpu.vector_store %arg7[%c8_135, %c0_136], %99 {strides = array<i32>} : memref<216x324xf32, #tpu.memory_space<vmem>>, vector<8x324xf32>,
    %c0_137 = arith.constant 0 : index
    %c2_138 = arith.constant 2 : index
    %101 = vector.load %arg6[%c0_137, %c2_138] : memref<24x362xf32, #tpu.memory_space<vmem>>, vector<8x324xf32>
    %c16_139 = arith.constant 16 : index
    %c0_140 = arith.constant 0 : index
    %102 = vector.load %arg7[%c16_139, %c0_140] : memref<216x324xf32, #tpu.memory_space<vmem>>, vector<8x324xf32>
    tpu.vector_store %arg7[%c16_139, %c0_140], %101 {strides = array<i32>} : memref<216x324xf32, #tpu.memory_space<vmem>>, vector<8x324xf32>,
    %c0_141 = arith.constant 0 : index
    %c18_142 = arith.constant 18 : index
    %103 = vector.load %arg6[%c0_141, %c18_142] : memref<24x362xf32, #tpu.memory_space<vmem>>, vector<8x324xf32>
    %c24_143 = arith.constant 24 : index
    %c0_144 = arith.constant 0 : index
    %104 = vector.load %arg7[%c24_143, %c0_144] : memref<216x324xf32, #tpu.memory_space<vmem>>, vector<8x324xf32>
    tpu.vector_store %arg7[%c24_143, %c0_144], %103 {strides = array<i32>} : memref<216x324xf32, #tpu.memory_space<vmem>>, vector<8x324xf32>,
    %c0_145 = arith.constant 0 : index
    %c19_146 = arith.constant 19 : index
    %105 = vector.load %arg6[%c0_145, %c19_146] : memref<24x362xf32, #tpu.memory_space<vmem>>, vector<8x324xf32>
    %c32_147 = arith.constant 32 : index
    %c0_148 = arith.constant 0 : index
    %106 = vector.load %arg7[%c32_147, %c0_148] : memref<216x324xf32, #tpu.memory_space<vmem>>, vector<8x324xf32>
    tpu.vector_store %arg7[%c32_147, %c0_148], %105 {strides = array<i32>} : memref<216x324xf32, #tpu.memory_space<vmem>>, vector<8x324xf32>,
    %c0_149 = arith.constant 0 : index
    %c20_150 = arith.constant 20 : index
    %107 = vector.load %arg6[%c0_149, %c20_150] : memref<24x362xf32, #tpu.memory_space<vmem>>, vector<8x324xf32>
    %c40_151 = arith.constant 40 : index
    %c0_152 = arith.constant 0 : index
    %108 = vector.load %arg7[%c40_151, %c0_152] : memref<216x324xf32, #tpu.memory_space<vmem>>, vector<8x324xf32>
    tpu.vector_store %arg7[%c40_151, %c0_152], %107 {strides = array<i32>} : memref<216x324xf32, #tpu.memory_space<vmem>>, vector<8x324xf32>,
    %c0_153 = arith.constant 0 : index
    %c36_154 = arith.constant 36 : index
    %109 = vector.load %arg6[%c0_153, %c36_154] : memref<24x362xf32, #tpu.memory_space<vmem>>, vector<8x324xf32>
    %c48_155 = arith.constant 48 : index
    %c0_156 = arith.constant 0 : index
    %110 = vector.load %arg7[%c48_155, %c0_156] : memref<216x324xf32, #tpu.memory_space<vmem>>, vector<8x324xf32>
    tpu.vector_store %arg7[%c48_155, %c0_156], %109 {strides = array<i32>} : memref<216x324xf32, #tpu.memory_space<vmem>>, vector<8x324xf32>,
    %c0_157 = arith.constant 0 : index
    %c37_158 = arith.constant 37 : index
    %111 = vector.load %arg6[%c0_157, %c37_158] : memref<24x362xf32, #tpu.memory_space<vmem>>, vector<8x324xf32>
    %c56_159 = arith.constant 56 : index
    %c0_160 = arith.constant 0 : index
    %112 = vector.load %arg7[%c56_159, %c0_160] : memref<216x324xf32, #tpu.memory_space<vmem>>, vector<8x324xf32>
    tpu.vector_store %arg7[%c56_159, %c0_160], %111 {strides = array<i32>} : memref<216x324xf32, #tpu.memory_space<vmem>>, vector<8x324xf32>,
    %c0_161 = arith.constant 0 : index
    %c38_162 = arith.constant 38 : index
    %113 = vector.load %arg6[%c0_161, %c38_162] : memref<24x362xf32, #tpu.memory_space<vmem>>, vector<8x324xf32>
    %c64_163 = arith.constant 64 : index
    %c0_164 = arith.constant 0 : index
    %114 = vector.load %arg7[%c64_163, %c0_164] : memref<216x324xf32, #tpu.memory_space<vmem>>, vector<8x324xf32>
    tpu.vector_store %arg7[%c64_163, %c0_164], %113 {strides = array<i32>} : memref<216x324xf32, #tpu.memory_space<vmem>>, vector<8x324xf32>,
    %c1_165 = arith.constant 1 : index
    %c0_166 = arith.constant 0 : index
    %c0_167 = arith.constant 0 : index
    %115 = vector.load %arg2[%c1_165, %c0_166, %c0_167] : memref<3x8x432xf32, #tpu.memory_space<vmem>>, vector<1x8x72xf32>
    %116 = vector.shape_cast %115 : vector<1x8x72xf32> to vector<8x72xf32>
    %c0_168 = arith.constant 0 : index
    %c0_169 = arith.constant 0 : index
    %117 = vector.load %arg7[%c0_168, %c0_169] : memref<216x324xf32, #tpu.memory_space<vmem>>, vector<72x324xf32>
    %cst_170 = arith.constant dense<0.000000e+00> : vector<8x324xf32>
    %118 = tpu.matmul %116, %117, %cst_170 {dimension_numbers = #tpu.dot_dimension_numbers<[1], [0], [0], [1], [0, 0, 1, 1], [], []>} : vector<8x72xf32>, vector<72x324xf32>, vector<8x324xf32> -> vector<8x324xf32>
    %c1_171 = arith.constant 1 : index
    %c0_172 = arith.constant 0 : index
    %c0_173 = arith.constant 0 : index
    %c0_174 = arith.constant 0 : index
    %119 = vector.load %arg3[%c1_171, %c0_172, %c0_173, %c0_174] : memref<3x3x8x1xf32, #tpu.memory_space<vmem>>, vector<1x1x8x1xf32>
    %120 = vector.shape_cast %119 : vector<1x1x8x1xf32> to vector<8x1xf32>
    %121 = vector.broadcast %120 : vector<8x1xf32> to vector<8x324xf32>
    %122 = arith.addf %118, %121 : vector<8x324xf32>
    %123 = vector.broadcast %5 : vector<1x324xf32> to vector<8x324xf32>
    %124 = arith.mulf %122, %123 : vector<8x324xf32>
    %c8_175 = arith.constant 8 : index
    %c19_176 = arith.constant 19 : index
    %125 = vector.load %arg6[%c8_175, %c19_176] : memref<24x362xf32, #tpu.memory_space<vmem>>, vector<8x324xf32>
    tpu.vector_store %arg6[%c8_175, %c19_176], %124 {strides = array<i32>} : memref<24x362xf32, #tpu.memory_space<vmem>>, vector<8x324xf32>,
    %c0_177 = arith.constant 0 : index
    %c0_178 = arith.constant 0 : index
    %126 = vector.load %arg6[%c0_177, %c0_178] : memref<24x362xf32, #tpu.memory_space<vmem>>, vector<16x324xf32>
    %c0_179 = arith.constant 0 : index
    %c0_180 = arith.constant 0 : index
    %127 = vector.load %arg7[%c0_179, %c0_180] : memref<216x324xf32, #tpu.memory_space<vmem>>, vector<16x324xf32>
    tpu.vector_store %arg7[%c0_179, %c0_180], %126 {strides = array<i32>} : memref<216x324xf32, #tpu.memory_space<vmem>>, vector<16x324xf32>,
    %c0_181 = arith.constant 0 : index
    %c1_182 = arith.constant 1 : index
    %128 = vector.load %arg6[%c0_181, %c1_182] : memref<24x362xf32, #tpu.memory_space<vmem>>, vector<16x324xf32>
    %c16_183 = arith.constant 16 : index
    %c0_184 = arith.constant 0 : index
    %129 = vector.load %arg7[%c16_183, %c0_184] : memref<216x324xf32, #tpu.memory_space<vmem>>, vector<16x324xf32>
    tpu.vector_store %arg7[%c16_183, %c0_184], %128 {strides = array<i32>} : memref<216x324xf32, #tpu.memory_space<vmem>>, vector<16x324xf32>,
    %c0_185 = arith.constant 0 : index
    %c2_186 = arith.constant 2 : index
    %130 = vector.load %arg6[%c0_185, %c2_186] : memref<24x362xf32, #tpu.memory_space<vmem>>, vector<16x324xf32>
    %c32_187 = arith.constant 32 : index
    %c0_188 = arith.constant 0 : index
    %131 = vector.load %arg7[%c32_187, %c0_188] : memref<216x324xf32, #tpu.memory_space<vmem>>, vector<16x324xf32>
    tpu.vector_store %arg7[%c32_187, %c0_188], %130 {strides = array<i32>} : memref<216x324xf32, #tpu.memory_space<vmem>>, vector<16x324xf32>,
    %c0_189 = arith.constant 0 : index
    %c18_190 = arith.constant 18 : index
    %132 = vector.load %arg6[%c0_189, %c18_190] : memref<24x362xf32, #tpu.memory_space<vmem>>, vector<16x324xf32>
    %c48_191 = arith.constant 48 : index
    %c0_192 = arith.constant 0 : index
    %133 = vector.load %arg7[%c48_191, %c0_192] : memref<216x324xf32, #tpu.memory_space<vmem>>, vector<16x324xf32>
    tpu.vector_store %arg7[%c48_191, %c0_192], %132 {strides = array<i32>} : memref<216x324xf32, #tpu.memory_space<vmem>>, vector<16x324xf32>,
    %c0_193 = arith.constant 0 : index
    %c19_194 = arith.constant 19 : index
    %134 = vector.load %arg6[%c0_193, %c19_194] : memref<24x362xf32, #tpu.memory_space<vmem>>, vector<16x324xf32>
    %c64_195 = arith.constant 64 : index
    %c0_196 = arith.constant 0 : index
    %135 = vector.load %arg7[%c64_195, %c0_196] : memref<216x324xf32, #tpu.memory_space<vmem>>, vector<16x324xf32>
    tpu.vector_store %arg7[%c64_195, %c0_196], %134 {strides = array<i32>} : memref<216x324xf32, #tpu.memory_space<vmem>>, vector<16x324xf32>,
    %c0_197 = arith.constant 0 : index
    %c20_198 = arith.constant 20 : index
    %136 = vector.load %arg6[%c0_197, %c20_198] : memref<24x362xf32, #tpu.memory_space<vmem>>, vector<16x324xf32>
    %c80_199 = arith.constant 80 : index
    %c0_200 = arith.constant 0 : index
    %137 = vector.load %arg7[%c80_199, %c0_200] : memref<216x324xf32, #tpu.memory_space<vmem>>, vector<16x324xf32>
    tpu.vector_store %arg7[%c80_199, %c0_200], %136 {strides = array<i32>} : memref<216x324xf32, #tpu.memory_space<vmem>>, vector<16x324xf32>,
    %c0_201 = arith.constant 0 : index
    %c36_202 = arith.constant 36 : index
    %138 = vector.load %arg6[%c0_201, %c36_202] : memref<24x362xf32, #tpu.memory_space<vmem>>, vector<16x324xf32>
    %c96_203 = arith.constant 96 : index
    %c0_204 = arith.constant 0 : index
    %139 = vector.load %arg7[%c96_203, %c0_204] : memref<216x324xf32, #tpu.memory_space<vmem>>, vector<16x324xf32>
    tpu.vector_store %arg7[%c96_203, %c0_204], %138 {strides = array<i32>} : memref<216x324xf32, #tpu.memory_space<vmem>>, vector<16x324xf32>,
    %c0_205 = arith.constant 0 : index
    %c37_206 = arith.constant 37 : index
    %140 = vector.load %arg6[%c0_205, %c37_206] : memref<24x362xf32, #tpu.memory_space<vmem>>, vector<16x324xf32>
    %c112_207 = arith.constant 112 : index
    %c0_208 = arith.constant 0 : index
    %141 = vector.load %arg7[%c112_207, %c0_208] : memref<216x324xf32, #tpu.memory_space<vmem>>, vector<16x324xf32>
    tpu.vector_store %arg7[%c112_207, %c0_208], %140 {strides = array<i32>} : memref<216x324xf32, #tpu.memory_space<vmem>>, vector<16x324xf32>,
    %c0_209 = arith.constant 0 : index
    %c38_210 = arith.constant 38 : index
    %142 = vector.load %arg6[%c0_209, %c38_210] : memref<24x362xf32, #tpu.memory_space<vmem>>, vector<16x324xf32>
    %c128_211 = arith.constant 128 : index
    %c0_212 = arith.constant 0 : index
    %143 = vector.load %arg7[%c128_211, %c0_212] : memref<216x324xf32, #tpu.memory_space<vmem>>, vector<16x324xf32>
    tpu.vector_store %arg7[%c128_211, %c0_212], %142 {strides = array<i32>} : memref<216x324xf32, #tpu.memory_space<vmem>>, vector<16x324xf32>,
    %c1_213 = arith.constant 1 : index
    %c0_214 = arith.constant 0 : index
    %c72_215 = arith.constant 72 : index
    %144 = vector.load %arg2[%c1_213, %c0_214, %c72_215] : memref<3x8x432xf32, #tpu.memory_space<vmem>>, vector<1x8x144xf32>
    %145 = vector.shape_cast %144 : vector<1x8x144xf32> to vector<8x144xf32>
    %c0_216 = arith.constant 0 : index
    %c0_217 = arith.constant 0 : index
    %146 = vector.load %arg7[%c0_216, %c0_217] : memref<216x324xf32, #tpu.memory_space<vmem>>, vector<144x324xf32>
    %cst_218 = arith.constant dense<0.000000e+00> : vector<8x324xf32>
    %147 = tpu.matmul %145, %146, %cst_218 {dimension_numbers = #tpu.dot_dimension_numbers<[1], [0], [0], [1], [0, 0, 1, 1], [], []>} : vector<8x144xf32>, vector<144x324xf32>, vector<8x324xf32> -> vector<8x324xf32>
    %c1_219 = arith.constant 1 : index
    %c1_220 = arith.constant 1 : index
    %c0_221 = arith.constant 0 : index
    %c0_222 = arith.constant 0 : index
    %148 = vector.load %arg3[%c1_219, %c1_220, %c0_221, %c0_222] : memref<3x3x8x1xf32, #tpu.memory_space<vmem>>, vector<1x1x8x1xf32>
    %149 = vector.shape_cast %148 : vector<1x1x8x1xf32> to vector<8x1xf32>
    %150 = vector.broadcast %149 : vector<8x1xf32> to vector<8x324xf32>
    %151 = arith.addf %147, %150 : vector<8x324xf32>
    %152 = vector.broadcast %5 : vector<1x324xf32> to vector<8x324xf32>
    %153 = arith.mulf %151, %152 : vector<8x324xf32>
    %c16_223 = arith.constant 16 : index
    %c19_224 = arith.constant 19 : index
    %154 = vector.load %arg6[%c16_223, %c19_224] : memref<24x362xf32, #tpu.memory_space<vmem>>, vector<8x324xf32>
    tpu.vector_store %arg6[%c16_223, %c19_224], %153 {strides = array<i32>} : memref<24x362xf32, #tpu.memory_space<vmem>>, vector<8x324xf32>,
    %c0_225 = arith.constant 0 : index
    %c0_226 = arith.constant 0 : index
    %155 = vector.load %arg6[%c0_225, %c0_226] : memref<24x362xf32, #tpu.memory_space<vmem>>, vector<24x324xf32>
    %c0_227 = arith.constant 0 : index
    %c0_228 = arith.constant 0 : index
    %156 = vector.load %arg7[%c0_227, %c0_228] : memref<216x324xf32, #tpu.memory_space<vmem>>, vector<24x324xf32>
    tpu.vector_store %arg7[%c0_227, %c0_228], %155 {strides = array<i32>} : memref<216x324xf32, #tpu.memory_space<vmem>>, vector<24x324xf32>,
    %c0_229 = arith.constant 0 : index
    %c1_230 = arith.constant 1 : index
    %157 = vector.load %arg6[%c0_229, %c1_230] : memref<24x362xf32, #tpu.memory_space<vmem>>, vector<24x324xf32>
    %c24_231 = arith.constant 24 : index
    %c0_232 = arith.constant 0 : index
    %158 = vector.load %arg7[%c24_231, %c0_232] : memref<216x324xf32, #tpu.memory_space<vmem>>, vector<24x324xf32>
    tpu.vector_store %arg7[%c24_231, %c0_232], %157 {strides = array<i32>} : memref<216x324xf32, #tpu.memory_space<vmem>>, vector<24x324xf32>,
    %c0_233 = arith.constant 0 : index
    %c2_234 = arith.constant 2 : index
    %159 = vector.load %arg6[%c0_233, %c2_234] : memref<24x362xf32, #tpu.memory_space<vmem>>, vector<24x324xf32>
    %c48_235 = arith.constant 48 : index
    %c0_236 = arith.constant 0 : index
    %160 = vector.load %arg7[%c48_235, %c0_236] : memref<216x324xf32, #tpu.memory_space<vmem>>, vector<24x324xf32>
    tpu.vector_store %arg7[%c48_235, %c0_236], %159 {strides = array<i32>} : memref<216x324xf32, #tpu.memory_space<vmem>>, vector<24x324xf32>,
    %c0_237 = arith.constant 0 : index
    %c18_238 = arith.constant 18 : index
    %161 = vector.load %arg6[%c0_237, %c18_238] : memref<24x362xf32, #tpu.memory_space<vmem>>, vector<24x324xf32>
    %c72_239 = arith.constant 72 : index
    %c0_240 = arith.constant 0 : index
    %162 = vector.load %arg7[%c72_239, %c0_240] : memref<216x324xf32, #tpu.memory_space<vmem>>, vector<24x324xf32>
    tpu.vector_store %arg7[%c72_239, %c0_240], %161 {strides = array<i32>} : memref<216x324xf32, #tpu.memory_space<vmem>>, vector<24x324xf32>,
    %c0_241 = arith.constant 0 : index
    %c19_242 = arith.constant 19 : index
    %163 = vector.load %arg6[%c0_241, %c19_242] : memref<24x362xf32, #tpu.memory_space<vmem>>, vector<24x324xf32>
    %c96_243 = arith.constant 96 : index
    %c0_244 = arith.constant 0 : index
    %164 = vector.load %arg7[%c96_243, %c0_244] : memref<216x324xf32, #tpu.memory_space<vmem>>, vector<24x324xf32>
    tpu.vector_store %arg7[%c96_243, %c0_244], %163 {strides = array<i32>} : memref<216x324xf32, #tpu.memory_space<vmem>>, vector<24x324xf32>,
    %c0_245 = arith.constant 0 : index
    %c20_246 = arith.constant 20 : index
    %165 = vector.load %arg6[%c0_245, %c20_246] : memref<24x362xf32, #tpu.memory_space<vmem>>, vector<24x324xf32>
    %c120_247 = arith.constant 120 : index
    %c0_248 = arith.constant 0 : index
    %166 = vector.load %arg7[%c120_247, %c0_248] : memref<216x324xf32, #tpu.memory_space<vmem>>, vector<24x324xf32>
    tpu.vector_store %arg7[%c120_247, %c0_248], %165 {strides = array<i32>} : memref<216x324xf32, #tpu.memory_space<vmem>>, vector<24x324xf32>,
    %c0_249 = arith.constant 0 : index
    %c36_250 = arith.constant 36 : index
    %167 = vector.load %arg6[%c0_249, %c36_250] : memref<24x362xf32, #tpu.memory_space<vmem>>, vector<24x324xf32>
    %c144_251 = arith.constant 144 : index
    %c0_252 = arith.constant 0 : index
    %168 = vector.load %arg7[%c144_251, %c0_252] : memref<216x324xf32, #tpu.memory_space<vmem>>, vector<24x324xf32>
    tpu.vector_store %arg7[%c144_251, %c0_252], %167 {strides = array<i32>} : memref<216x324xf32, #tpu.memory_space<vmem>>, vector<24x324xf32>,
    %c0_253 = arith.constant 0 : index
    %c37_254 = arith.constant 37 : index
    %169 = vector.load %arg6[%c0_253, %c37_254] : memref<24x362xf32, #tpu.memory_space<vmem>>, vector<24x324xf32>
    %c168_255 = arith.constant 168 : index
    %c0_256 = arith.constant 0 : index
    %170 = vector.load %arg7[%c168_255, %c0_256] : memref<216x324xf32, #tpu.memory_space<vmem>>, vector<24x324xf32>
    tpu.vector_store %arg7[%c168_255, %c0_256], %169 {strides = array<i32>} : memref<216x324xf32, #tpu.memory_space<vmem>>, vector<24x324xf32>,
    %c0_257 = arith.constant 0 : index
    %c38_258 = arith.constant 38 : index
    %171 = vector.load %arg6[%c0_257, %c38_258] : memref<24x362xf32, #tpu.memory_space<vmem>>, vector<24x324xf32>
    %c192_259 = arith.constant 192 : index
    %c0_260 = arith.constant 0 : index
    %172 = vector.load %arg7[%c192_259, %c0_260] : memref<216x324xf32, #tpu.memory_space<vmem>>, vector<24x324xf32>
    tpu.vector_store %arg7[%c192_259, %c0_260], %171 {strides = array<i32>} : memref<216x324xf32, #tpu.memory_space<vmem>>, vector<24x324xf32>,
    %c1_261 = arith.constant 1 : index
    %c0_262 = arith.constant 0 : index
    %c216_263 = arith.constant 216 : index
    %173 = vector.load %arg2[%c1_261, %c0_262, %c216_263] : memref<3x8x432xf32, #tpu.memory_space<vmem>>, vector<1x8x216xf32>
    %174 = vector.shape_cast %173 : vector<1x8x216xf32> to vector<8x216xf32>
    %c0_264 = arith.constant 0 : index
    %c0_265 = arith.constant 0 : index
    %175 = vector.load %arg7[%c0_264, %c0_265] : memref<216x324xf32, #tpu.memory_space<vmem>>, vector<216x324xf32>
    %cst_266 = arith.constant dense<0.000000e+00> : vector<8x324xf32>
    %176 = tpu.matmul %174, %175, %cst_266 {dimension_numbers = #tpu.dot_dimension_numbers<[1], [0], [0], [1], [0, 0, 1, 1], [], []>} : vector<8x216xf32>, vector<216x324xf32>, vector<8x324xf32> -> vector<8x324xf32>
    %c1_267 = arith.constant 1 : index
    %c2_268 = arith.constant 2 : index
    %c0_269 = arith.constant 0 : index
    %c0_270 = arith.constant 0 : index
    %177 = vector.load %arg3[%c1_267, %c2_268, %c0_269, %c0_270] : memref<3x3x8x1xf32, #tpu.memory_space<vmem>>, vector<1x1x8x1xf32>
    %178 = vector.shape_cast %177 : vector<1x1x8x1xf32> to vector<8x1xf32>
    %179 = vector.broadcast %178 : vector<8x1xf32> to vector<8x324xf32>
    %180 = arith.addf %176, %179 : vector<8x324xf32>
    %181 = vector.broadcast %5 : vector<1x324xf32> to vector<8x324xf32>
    %182 = arith.mulf %180, %181 : vector<8x324xf32>
    %c0_271 = arith.constant 0 : index
    %c19_272 = arith.constant 19 : index
    %183 = vector.load %arg6[%c0_271, %c19_272] : memref<24x362xf32, #tpu.memory_space<vmem>>, vector<8x324xf32>
    %cst_273 = arith.constant 2.000000e-01 : f32
    %184 = vector.broadcast %cst_273 : f32 to vector<8x324xf32>
    %185 = arith.mulf %184, %182 : vector<8x324xf32>
    %186 = arith.addf %183, %185 : vector<8x324xf32>
    %c0_274 = arith.constant 0 : index
    %c19_275 = arith.constant 19 : index
    %187 = vector.load %arg6[%c0_274, %c19_275] : memref<24x362xf32, #tpu.memory_space<vmem>>, vector<8x324xf32>
    tpu.vector_store %arg6[%c0_274, %c19_275], %186 {strides = array<i32>} : memref<24x362xf32, #tpu.memory_space<vmem>>, vector<8x324xf32>,
    %c0_276 = arith.constant 0 : index
    %c0_277 = arith.constant 0 : index
    %188 = vector.load %arg6[%c0_276, %c0_277] : memref<24x362xf32, #tpu.memory_space<vmem>>, vector<8x324xf32>
    %c0_278 = arith.constant 0 : index
    %c0_279 = arith.constant 0 : index
    %189 = vector.load %arg7[%c0_278, %c0_279] : memref<216x324xf32, #tpu.memory_space<vmem>>, vector<8x324xf32>
    tpu.vector_store %arg7[%c0_278, %c0_279], %188 {strides = array<i32>} : memref<216x324xf32, #tpu.memory_space<vmem>>, vector<8x324xf32>,
    %c0_280 = arith.constant 0 : index
    %c1_281 = arith.constant 1 : index
    %190 = vector.load %arg6[%c0_280, %c1_281] : memref<24x362xf32, #tpu.memory_space<vmem>>, vector<8x324xf32>
    %c8_282 = arith.constant 8 : index
    %c0_283 = arith.constant 0 : index
    %191 = vector.load %arg7[%c8_282, %c0_283] : memref<216x324xf32, #tpu.memory_space<vmem>>, vector<8x324xf32>
    tpu.vector_store %arg7[%c8_282, %c0_283], %190 {strides = array<i32>} : memref<216x324xf32, #tpu.memory_space<vmem>>, vector<8x324xf32>,
    %c0_284 = arith.constant 0 : index
    %c2_285 = arith.constant 2 : index
    %192 = vector.load %arg6[%c0_284, %c2_285] : memref<24x362xf32, #tpu.memory_space<vmem>>, vector<8x324xf32>
    %c16_286 = arith.constant 16 : index
    %c0_287 = arith.constant 0 : index
    %193 = vector.load %arg7[%c16_286, %c0_287] : memref<216x324xf32, #tpu.memory_space<vmem>>, vector<8x324xf32>
    tpu.vector_store %arg7[%c16_286, %c0_287], %192 {strides = array<i32>} : memref<216x324xf32, #tpu.memory_space<vmem>>, vector<8x324xf32>,
    %c0_288 = arith.constant 0 : index
    %c18_289 = arith.constant 18 : index
    %194 = vector.load %arg6[%c0_288, %c18_289] : memref<24x362xf32, #tpu.memory_space<vmem>>, vector<8x324xf32>
    %c24_290 = arith.constant 24 : index
    %c0_291 = arith.constant 0 : index
    %195 = vector.load %arg7[%c24_290, %c0_291] : memref<216x324xf32, #tpu.memory_space<vmem>>, vector<8x324xf32>
    tpu.vector_store %arg7[%c24_290, %c0_291], %194 {strides = array<i32>} : memref<216x324xf32, #tpu.memory_space<vmem>>, vector<8x324xf32>,
    %c0_292 = arith.constant 0 : index
    %c19_293 = arith.constant 19 : index
    %196 = vector.load %arg6[%c0_292, %c19_293] : memref<24x362xf32, #tpu.memory_space<vmem>>, vector<8x324xf32>
    %c32_294 = arith.constant 32 : index
    %c0_295 = arith.constant 0 : index
    %197 = vector.load %arg7[%c32_294, %c0_295] : memref<216x324xf32, #tpu.memory_space<vmem>>, vector<8x324xf32>
    tpu.vector_store %arg7[%c32_294, %c0_295], %196 {strides = array<i32>} : memref<216x324xf32, #tpu.memory_space<vmem>>, vector<8x324xf32>,
    %c0_296 = arith.constant 0 : index
    %c20_297 = arith.constant 20 : index
    %198 = vector.load %arg6[%c0_296, %c20_297] : memref<24x362xf32, #tpu.memory_space<vmem>>, vector<8x324xf32>
    %c40_298 = arith.constant 40 : index
    %c0_299 = arith.constant 0 : index
    %199 = vector.load %arg7[%c40_298, %c0_299] : memref<216x324xf32, #tpu.memory_space<vmem>>, vector<8x324xf32>
    tpu.vector_store %arg7[%c40_298, %c0_299], %198 {strides = array<i32>} : memref<216x324xf32, #tpu.memory_space<vmem>>, vector<8x324xf32>,
    %c0_300 = arith.constant 0 : index
    %c36_301 = arith.constant 36 : index
    %200 = vector.load %arg6[%c0_300, %c36_301] : memref<24x362xf32, #tpu.memory_space<vmem>>, vector<8x324xf32>
    %c48_302 = arith.constant 48 : index
    %c0_303 = arith.constant 0 : index
    %201 = vector.load %arg7[%c48_302, %c0_303] : memref<216x324xf32, #tpu.memory_space<vmem>>, vector<8x324xf32>
    tpu.vector_store %arg7[%c48_302, %c0_303], %200 {strides = array<i32>} : memref<216x324xf32, #tpu.memory_space<vmem>>, vector<8x324xf32>,
    %c0_304 = arith.constant 0 : index
    %c37_305 = arith.constant 37 : index
    %202 = vector.load %arg6[%c0_304, %c37_305] : memref<24x362xf32, #tpu.memory_space<vmem>>, vector<8x324xf32>
    %c56_306 = arith.constant 56 : index
    %c0_307 = arith.constant 0 : index
    %203 = vector.load %arg7[%c56_306, %c0_307] : memref<216x324xf32, #tpu.memory_space<vmem>>, vector<8x324xf32>
    tpu.vector_store %arg7[%c56_306, %c0_307], %202 {strides = array<i32>} : memref<216x324xf32, #tpu.memory_space<vmem>>, vector<8x324xf32>,
    %c0_308 = arith.constant 0 : index
    %c38_309 = arith.constant 38 : index
    %204 = vector.load %arg6[%c0_308, %c38_309] : memref<24x362xf32, #tpu.memory_space<vmem>>, vector<8x324xf32>
    %c64_310 = arith.constant 64 : index
    %c0_311 = arith.constant 0 : index
    %205 = vector.load %arg7[%c64_310, %c0_311] : memref<216x324xf32, #tpu.memory_space<vmem>>, vector<8x324xf32>
    tpu.vector_store %arg7[%c64_310, %c0_311], %204 {strides = array<i32>} : memref<216x324xf32, #tpu.memory_space<vmem>>, vector<8x324xf32>,
    %c2_312 = arith.constant 2 : index
    %c0_313 = arith.constant 0 : index
    %c0_314 = arith.constant 0 : index
    %206 = vector.load %arg2[%c2_312, %c0_313, %c0_314] : memref<3x8x432xf32, #tpu.memory_space<vmem>>, vector<1x8x72xf32>
    %207 = vector.shape_cast %206 : vector<1x8x72xf32> to vector<8x72xf32>
    %c0_315 = arith.constant 0 : index
    %c0_316 = arith.constant 0 : index
    %208 = vector.load %arg7[%c0_315, %c0_316] : memref<216x324xf32, #tpu.memory_space<vmem>>, vector<72x324xf32>
    %cst_317 = arith.constant dense<0.000000e+00> : vector<8x324xf32>
    %209 = tpu.matmul %207, %208, %cst_317 {dimension_numbers = #tpu.dot_dimension_numbers<[1], [0], [0], [1], [0, 0, 1, 1], [], []>} : vector<8x72xf32>, vector<72x324xf32>, vector<8x324xf32> -> vector<8x324xf32>
    %c2_318 = arith.constant 2 : index
    %c0_319 = arith.constant 0 : index
    %c0_320 = arith.constant 0 : index
    %c0_321 = arith.constant 0 : index
    %210 = vector.load %arg3[%c2_318, %c0_319, %c0_320, %c0_321] : memref<3x3x8x1xf32, #tpu.memory_space<vmem>>, vector<1x1x8x1xf32>
    %211 = vector.shape_cast %210 : vector<1x1x8x1xf32> to vector<8x1xf32>
    %212 = vector.broadcast %211 : vector<8x1xf32> to vector<8x324xf32>
    %213 = arith.addf %209, %212 : vector<8x324xf32>
    %214 = vector.broadcast %5 : vector<1x324xf32> to vector<8x324xf32>
    %215 = arith.mulf %213, %214 : vector<8x324xf32>
    %c8_322 = arith.constant 8 : index
    %c19_323 = arith.constant 19 : index
    %216 = vector.load %arg6[%c8_322, %c19_323] : memref<24x362xf32, #tpu.memory_space<vmem>>, vector<8x324xf32>
    tpu.vector_store %arg6[%c8_322, %c19_323], %215 {strides = array<i32>} : memref<24x362xf32, #tpu.memory_space<vmem>>, vector<8x324xf32>,
    %c0_324 = arith.constant 0 : index
    %c0_325 = arith.constant 0 : index
    %217 = vector.load %arg6[%c0_324, %c0_325] : memref<24x362xf32, #tpu.memory_space<vmem>>, vector<16x324xf32>
    %c0_326 = arith.constant 0 : index
    %c0_327 = arith.constant 0 : index
    %218 = vector.load %arg7[%c0_326, %c0_327] : memref<216x324xf32, #tpu.memory_space<vmem>>, vector<16x324xf32>
    tpu.vector_store %arg7[%c0_326, %c0_327], %217 {strides = array<i32>} : memref<216x324xf32, #tpu.memory_space<vmem>>, vector<16x324xf32>,
    %c0_328 = arith.constant 0 : index
    %c1_329 = arith.constant 1 : index
    %219 = vector.load %arg6[%c0_328, %c1_329] : memref<24x362xf32, #tpu.memory_space<vmem>>, vector<16x324xf32>
    %c16_330 = arith.constant 16 : index
    %c0_331 = arith.constant 0 : index
    %220 = vector.load %arg7[%c16_330, %c0_331] : memref<216x324xf32, #tpu.memory_space<vmem>>, vector<16x324xf32>
    tpu.vector_store %arg7[%c16_330, %c0_331], %219 {strides = array<i32>} : memref<216x324xf32, #tpu.memory_space<vmem>>, vector<16x324xf32>,
    %c0_332 = arith.constant 0 : index
    %c2_333 = arith.constant 2 : index
    %221 = vector.load %arg6[%c0_332, %c2_333] : memref<24x362xf32, #tpu.memory_space<vmem>>, vector<16x324xf32>
    %c32_334 = arith.constant 32 : index
    %c0_335 = arith.constant 0 : index
    %222 = vector.load %arg7[%c32_334, %c0_335] : memref<216x324xf32, #tpu.memory_space<vmem>>, vector<16x324xf32>
    tpu.vector_store %arg7[%c32_334, %c0_335], %221 {strides = array<i32>} : memref<216x324xf32, #tpu.memory_space<vmem>>, vector<16x324xf32>,
    %c0_336 = arith.constant 0 : index
    %c18_337 = arith.constant 18 : index
    %223 = vector.load %arg6[%c0_336, %c18_337] : memref<24x362xf32, #tpu.memory_space<vmem>>, vector<16x324xf32>
    %c48_338 = arith.constant 48 : index
    %c0_339 = arith.constant 0 : index
    %224 = vector.load %arg7[%c48_338, %c0_339] : memref<216x324xf32, #tpu.memory_space<vmem>>, vector<16x324xf32>
    tpu.vector_store %arg7[%c48_338, %c0_339], %223 {strides = array<i32>} : memref<216x324xf32, #tpu.memory_space<vmem>>, vector<16x324xf32>,
    %c0_340 = arith.constant 0 : index
    %c19_341 = arith.constant 19 : index
    %225 = vector.load %arg6[%c0_340, %c19_341] : memref<24x362xf32, #tpu.memory_space<vmem>>, vector<16x324xf32>
    %c64_342 = arith.constant 64 : index
    %c0_343 = arith.constant 0 : index
    %226 = vector.load %arg7[%c64_342, %c0_343] : memref<216x324xf32, #tpu.memory_space<vmem>>, vector<16x324xf32>
    tpu.vector_store %arg7[%c64_342, %c0_343], %225 {strides = array<i32>} : memref<216x324xf32, #tpu.memory_space<vmem>>, vector<16x324xf32>,
    %c0_344 = arith.constant 0 : index
    %c20_345 = arith.constant 20 : index
    %227 = vector.load %arg6[%c0_344, %c20_345] : memref<24x362xf32, #tpu.memory_space<vmem>>, vector<16x324xf32>
    %c80_346 = arith.constant 80 : index
    %c0_347 = arith.constant 0 : index
    %228 = vector.load %arg7[%c80_346, %c0_347] : memref<216x324xf32, #tpu.memory_space<vmem>>, vector<16x324xf32>
    tpu.vector_store %arg7[%c80_346, %c0_347], %227 {strides = array<i32>} : memref<216x324xf32, #tpu.memory_space<vmem>>, vector<16x324xf32>,
    %c0_348 = arith.constant 0 : index
    %c36_349 = arith.constant 36 : index
    %229 = vector.load %arg6[%c0_348, %c36_349] : memref<24x362xf32, #tpu.memory_space<vmem>>, vector<16x324xf32>
    %c96_350 = arith.constant 96 : index
    %c0_351 = arith.constant 0 : index
    %230 = vector.load %arg7[%c96_350, %c0_351] : memref<216x324xf32, #tpu.memory_space<vmem>>, vector<16x324xf32>
    tpu.vector_store %arg7[%c96_350, %c0_351], %229 {strides = array<i32>} : memref<216x324xf32, #tpu.memory_space<vmem>>, vector<16x324xf32>,
    %c0_352 = arith.constant 0 : index
    %c37_353 = arith.constant 37 : index
    %231 = vector.load %arg6[%c0_352, %c37_353] : memref<24x362xf32, #tpu.memory_space<vmem>>, vector<16x324xf32>
    %c112_354 = arith.constant 112 : index
    %c0_355 = arith.constant 0 : index
    %232 = vector.load %arg7[%c112_354, %c0_355] : memref<216x324xf32, #tpu.memory_space<vmem>>, vector<16x324xf32>
    tpu.vector_store %arg7[%c112_354, %c0_355], %231 {strides = array<i32>} : memref<216x324xf32, #tpu.memory_space<vmem>>, vector<16x324xf32>,
    %c0_356 = arith.constant 0 : index
    %c38_357 = arith.constant 38 : index
    %233 = vector.load %arg6[%c0_356, %c38_357] : memref<24x362xf32, #tpu.memory_space<vmem>>, vector<16x324xf32>
    %c128_358 = arith.constant 128 : index
    %c0_359 = arith.constant 0 : index
    %234 = vector.load %arg7[%c128_358, %c0_359] : memref<216x324xf32, #tpu.memory_space<vmem>>, vector<16x324xf32>
    tpu.vector_store %arg7[%c128_358, %c0_359], %233 {strides = array<i32>} : memref<216x324xf32, #tpu.memory_space<vmem>>, vector<16x324xf32>,
    %c2_360 = arith.constant 2 : index
    %c0_361 = arith.constant 0 : index
    %c72_362 = arith.constant 72 : index
    %235 = vector.load %arg2[%c2_360, %c0_361, %c72_362] : memref<3x8x432xf32, #tpu.memory_space<vmem>>, vector<1x8x144xf32>
    %236 = vector.shape_cast %235 : vector<1x8x144xf32> to vector<8x144xf32>
    %c0_363 = arith.constant 0 : index
    %c0_364 = arith.constant 0 : index
    %237 = vector.load %arg7[%c0_363, %c0_364] : memref<216x324xf32, #tpu.memory_space<vmem>>, vector<144x324xf32>
    %cst_365 = arith.constant dense<0.000000e+00> : vector<8x324xf32>
    %238 = tpu.matmul %236, %237, %cst_365 {dimension_numbers = #tpu.dot_dimension_numbers<[1], [0], [0], [1], [0, 0, 1, 1], [], []>} : vector<8x144xf32>, vector<144x324xf32>, vector<8x324xf32> -> vector<8x324xf32>
    %c2_366 = arith.constant 2 : index
    %c1_367 = arith.constant 1 : index
    %c0_368 = arith.constant 0 : index
    %c0_369 = arith.constant 0 : index
    %239 = vector.load %arg3[%c2_366, %c1_367, %c0_368, %c0_369] : memref<3x3x8x1xf32, #tpu.memory_space<vmem>>, vector<1x1x8x1xf32>
    %240 = vector.shape_cast %239 : vector<1x1x8x1xf32> to vector<8x1xf32>
    %241 = vector.broadcast %240 : vector<8x1xf32> to vector<8x324xf32>
    %242 = arith.addf %238, %241 : vector<8x324xf32>
    %243 = vector.broadcast %5 : vector<1x324xf32> to vector<8x324xf32>
    %244 = arith.mulf %242, %243 : vector<8x324xf32>
    %c16_370 = arith.constant 16 : index
    %c19_371 = arith.constant 19 : index
    %245 = vector.load %arg6[%c16_370, %c19_371] : memref<24x362xf32, #tpu.memory_space<vmem>>, vector<8x324xf32>
    tpu.vector_store %arg6[%c16_370, %c19_371], %244 {strides = array<i32>} : memref<24x362xf32, #tpu.memory_space<vmem>>, vector<8x324xf32>,
    %c0_372 = arith.constant 0 : index
    %c0_373 = arith.constant 0 : index
    %246 = vector.load %arg6[%c0_372, %c0_373] : memref<24x362xf32, #tpu.memory_space<vmem>>, vector<24x324xf32>
    %c0_374 = arith.constant 0 : index
    %c0_375 = arith.constant 0 : index
    %247 = vector.load %arg7[%c0_374, %c0_375] : memref<216x324xf32, #tpu.memory_space<vmem>>, vector<24x324xf32>
    tpu.vector_store %arg7[%c0_374, %c0_375], %246 {strides = array<i32>} : memref<216x324xf32, #tpu.memory_space<vmem>>, vector<24x324xf32>,
    %c0_376 = arith.constant 0 : index
    %c1_377 = arith.constant 1 : index
    %248 = vector.load %arg6[%c0_376, %c1_377] : memref<24x362xf32, #tpu.memory_space<vmem>>, vector<24x324xf32>
    %c24_378 = arith.constant 24 : index
    %c0_379 = arith.constant 0 : index
    %249 = vector.load %arg7[%c24_378, %c0_379] : memref<216x324xf32, #tpu.memory_space<vmem>>, vector<24x324xf32>
    tpu.vector_store %arg7[%c24_378, %c0_379], %248 {strides = array<i32>} : memref<216x324xf32, #tpu.memory_space<vmem>>, vector<24x324xf32>,
    %c0_380 = arith.constant 0 : index
    %c2_381 = arith.constant 2 : index
    %250 = vector.load %arg6[%c0_380, %c2_381] : memref<24x362xf32, #tpu.memory_space<vmem>>, vector<24x324xf32>
    %c48_382 = arith.constant 48 : index
    %c0_383 = arith.constant 0 : index
    %251 = vector.load %arg7[%c48_382, %c0_383] : memref<216x324xf32, #tpu.memory_space<vmem>>, vector<24x324xf32>
    tpu.vector_store %arg7[%c48_382, %c0_383], %250 {strides = array<i32>} : memref<216x324xf32, #tpu.memory_space<vmem>>, vector<24x324xf32>,
    %c0_384 = arith.constant 0 : index
    %c18_385 = arith.constant 18 : index
    %252 = vector.load %arg6[%c0_384, %c18_385] : memref<24x362xf32, #tpu.memory_space<vmem>>, vector<24x324xf32>
    %c72_386 = arith.constant 72 : index
    %c0_387 = arith.constant 0 : index
    %253 = vector.load %arg7[%c72_386, %c0_387] : memref<216x324xf32, #tpu.memory_space<vmem>>, vector<24x324xf32>
    tpu.vector_store %arg7[%c72_386, %c0_387], %252 {strides = array<i32>} : memref<216x324xf32, #tpu.memory_space<vmem>>, vector<24x324xf32>,
    %c0_388 = arith.constant 0 : index
    %c19_389 = arith.constant 19 : index
    %254 = vector.load %arg6[%c0_388, %c19_389] : memref<24x362xf32, #tpu.memory_space<vmem>>, vector<24x324xf32>
    %c96_390 = arith.constant 96 : index
    %c0_391 = arith.constant 0 : index
    %255 = vector.load %arg7[%c96_390, %c0_391] : memref<216x324xf32, #tpu.memory_space<vmem>>, vector<24x324xf32>
    tpu.vector_store %arg7[%c96_390, %c0_391], %254 {strides = array<i32>} : memref<216x324xf32, #tpu.memory_space<vmem>>, vector<24x324xf32>,
    %c0_392 = arith.constant 0 : index
    %c20_393 = arith.constant 20 : index
    %256 = vector.load %arg6[%c0_392, %c20_393] : memref<24x362xf32, #tpu.memory_space<vmem>>, vector<24x324xf32>
    %c120_394 = arith.constant 120 : index
    %c0_395 = arith.constant 0 : index
    %257 = vector.load %arg7[%c120_394, %c0_395] : memref<216x324xf32, #tpu.memory_space<vmem>>, vector<24x324xf32>
    tpu.vector_store %arg7[%c120_394, %c0_395], %256 {strides = array<i32>} : memref<216x324xf32, #tpu.memory_space<vmem>>, vector<24x324xf32>,
    %c0_396 = arith.constant 0 : index
    %c36_397 = arith.constant 36 : index
    %258 = vector.load %arg6[%c0_396, %c36_397] : memref<24x362xf32, #tpu.memory_space<vmem>>, vector<24x324xf32>
    %c144_398 = arith.constant 144 : index
    %c0_399 = arith.constant 0 : index
    %259 = vector.load %arg7[%c144_398, %c0_399] : memref<216x324xf32, #tpu.memory_space<vmem>>, vector<24x324xf32>
    tpu.vector_store %arg7[%c144_398, %c0_399], %258 {strides = array<i32>} : memref<216x324xf32, #tpu.memory_space<vmem>>, vector<24x324xf32>,
    %c0_400 = arith.constant 0 : index
    %c37_401 = arith.constant 37 : index
    %260 = vector.load %arg6[%c0_400, %c37_401] : memref<24x362xf32, #tpu.memory_space<vmem>>, vector<24x324xf32>
    %c168_402 = arith.constant 168 : index
    %c0_403 = arith.constant 0 : index
    %261 = vector.load %arg7[%c168_402, %c0_403] : memref<216x324xf32, #tpu.memory_space<vmem>>, vector<24x324xf32>
    tpu.vector_store %arg7[%c168_402, %c0_403], %260 {strides = array<i32>} : memref<216x324xf32, #tpu.memory_space<vmem>>, vector<24x324xf32>,
    %c0_404 = arith.constant 0 : index
    %c38_405 = arith.constant 38 : index
    %262 = vector.load %arg6[%c0_404, %c38_405] : memref<24x362xf32, #tpu.memory_space<vmem>>, vector<24x324xf32>
    %c192_406 = arith.constant 192 : index
    %c0_407 = arith.constant 0 : index
    %263 = vector.load %arg7[%c192_406, %c0_407] : memref<216x324xf32, #tpu.memory_space<vmem>>, vector<24x324xf32>
    tpu.vector_store %arg7[%c192_406, %c0_407], %262 {strides = array<i32>} : memref<216x324xf32, #tpu.memory_space<vmem>>, vector<24x324xf32>,
    %c2_408 = arith.constant 2 : index
    %c0_409 = arith.constant 0 : index
    %c216_410 = arith.constant 216 : index
    %264 = vector.load %arg2[%c2_408, %c0_409, %c216_410] : memref<3x8x432xf32, #tpu.memory_space<vmem>>, vector<1x8x216xf32>
    %265 = vector.shape_cast %264 : vector<1x8x216xf32> to vector<8x216xf32>
    %c0_411 = arith.constant 0 : index
    %c0_412 = arith.constant 0 : index
    %266 = vector.load %arg7[%c0_411, %c0_412] : memref<216x324xf32, #tpu.memory_space<vmem>>, vector<216x324xf32>
    %cst_413 = arith.constant dense<0.000000e+00> : vector<8x324xf32>
    %267 = tpu.matmul %265, %266, %cst_413 {dimension_numbers = #tpu.dot_dimension_numbers<[1], [0], [0], [1], [0, 0, 1, 1], [], []>} : vector<8x216xf32>, vector<216x324xf32>, vector<8x324xf32> -> vector<8x324xf32>
    %c2_414 = arith.constant 2 : index
    %c2_415 = arith.constant 2 : index
    %c0_416 = arith.constant 0 : index
    %c0_417 = arith.constant 0 : index
    %268 = vector.load %arg3[%c2_414, %c2_415, %c0_416, %c0_417] : memref<3x3x8x1xf32, #tpu.memory_space<vmem>>, vector<1x1x8x1xf32>
    %269 = vector.shape_cast %268 : vector<1x1x8x1xf32> to vector<8x1xf32>
    %270 = vector.broadcast %269 : vector<8x1xf32> to vector<8x324xf32>
    %271 = arith.addf %267, %270 : vector<8x324xf32>
    %272 = vector.broadcast %5 : vector<1x324xf32> to vector<8x324xf32>
    %273 = arith.mulf %271, %272 : vector<8x324xf32>
    %c0_418 = arith.constant 0 : index
    %c19_419 = arith.constant 19 : index
    %274 = vector.load %arg6[%c0_418, %c19_419] : memref<24x362xf32, #tpu.memory_space<vmem>>, vector<8x324xf32>
    %cst_420 = arith.constant 2.000000e-01 : f32
    %275 = vector.broadcast %cst_420 : f32 to vector<8x324xf32>
    %276 = arith.mulf %275, %273 : vector<8x324xf32>
    %277 = arith.addf %274, %276 : vector<8x324xf32>
    %c0_421 = arith.constant 0 : index
    %c19_422 = arith.constant 19 : index
    %278 = vector.load %arg6[%c0_421, %c19_422] : memref<24x362xf32, #tpu.memory_space<vmem>>, vector<8x324xf32>
    tpu.vector_store %arg6[%c0_421, %c19_422], %277 {strides = array<i32>} : memref<24x362xf32, #tpu.memory_space<vmem>>, vector<8x324xf32>,
    %c0_423 = arith.constant 0 : index
    %c0_424 = arith.constant 0 : index
    %279 = vector.load %arg6[%c0_423, %c0_424] : memref<24x362xf32, #tpu.memory_space<vmem>>, vector<4x324xf32>
    %cst_425 = arith.constant 2.000000e-01 : f32
    %280 = vector.broadcast %cst_425 : f32 to vector<4x324xf32>
    %281 = arith.mulf %280, %279 : vector<4x324xf32>
    %282 = arith.addf %3, %281 : vector<4x324xf32>
    %c0_426 = arith.constant 0 : index
    %c0_427 = arith.constant 0 : index
    %c0_428 = arith.constant 0 : index
    %283 = vector.load %arg5[%c0_426, %c0_427, %c0_428] : memref<1x4x324xf32, #tpu.memory_space<vmem>>, vector<1x4x324xf32>
    %284 = vector.shape_cast %283 : vector<1x4x324xf32> to vector<4x324xf32>
    %285 = vector.shape_cast %282 : vector<4x324xf32> to vector<1x4x324xf32>
    tpu.vector_store %arg5[%c0_426, %c0_427, %c0_428], %285 {strides = array<i32>} : memref<1x4x324xf32, #tpu.memory_space<vmem>>, vector<1x4x324xf32>,
    return
  }
  func.func @transform_0(%arg0: i32) -> (i32, i32, i32) {
    %c0_i32 = arith.constant 0 : i32
    %c0_i32_0 = arith.constant 0 : i32
    %c0_i32_1 = arith.constant 0 : i32
    return %arg0, %c0_i32, %c0_i32_0 : i32, i32, i32
  }
  func.func @transform_1(%arg0: i32) -> (i32, i32, i32) {
    %c0_i32 = arith.constant 0 : i32
    %c0_i32_0 = arith.constant 0 : i32
    %c0_i32_1 = arith.constant 0 : i32
    %c0_i32_2 = arith.constant 0 : i32
    return %c0_i32, %c0_i32_0, %c0_i32_1 : i32, i32, i32
  }
  func.func @transform_2(%arg0: i32) -> (i32, i32, i32, i32) {
    %c0_i32 = arith.constant 0 : i32
    %c0_i32_0 = arith.constant 0 : i32
    %c0_i32_1 = arith.constant 0 : i32
    %c0_i32_2 = arith.constant 0 : i32
    %c0_i32_3 = arith.constant 0 : i32
    return %c0_i32, %c0_i32_0, %c0_i32_1, %c0_i32_2 : i32, i32, i32, i32
  }
  func.func @transform_3(%arg0: i32) -> (i32, i32) {
    %c0_i32 = arith.constant 0 : i32
    %c0_i32_0 = arith.constant 0 : i32
    %c0_i32_1 = arith.constant 0 : i32
    return %c0_i32, %c0_i32_0 : i32, i32
  }
  func.func @transform_4(%arg0: i32) -> (i32, i32, i32) {
    %c0_i32 = arith.constant 0 : i32
    %c0_i32_0 = arith.constant 0 : i32
    %c0_i32_1 = arith.constant 0 : i32
    return %arg0, %c0_i32, %c0_i32_0 : i32, i32, i32
  }
}

</mosaic_0001>

<bundles_post_ra>
// kernel: rrdb_forward_nchw.1
= control target key start
LH: loop header
LB: loop body
LE: loop exit
PB: predicated region body
PF: predicated region fallthrough
CT: control target
= control target key end

     0   :  { %s6194_s15 = smov 0   ;;  %s8804_s0 = inlined_call_operand.vmem [shape: f32[2,4,324], index: 0, kind: input, shape index: {}]   ;;  %s8805_s1 = inlined_call_operand.vmem [shape: f32[3,8,432], index: 1, kind: input, shape index: {}]   ;;  %s8806_s2 = inlined_call_operand.vmem [shape: f32[3,3,8,1], index: 2, kind: input, shape index: {}]   ;;  %s8807_s3 = inlined_call_operand.vmem [shape: f32[1,324], index: 3, kind: input, shape index: {}]   ;;  %s8808_s4 = inlined_call_operand.vmem [shape: f32[2,4,324], index: 4, kind: output, shape index: {}]  }
   0x1 LB: > { %s5433_s16 = sadd.s32 4294967295, %s6152_s15   ;;  %p5437_p0 = scmp.ge.s32.totalorder %s6152_s15, 1  ;;  %s6152_s15 = sphi %s6194_s15, %s14_s15  }
   0x2   : > { %p162_p1 = scmp.lt.s32.totalorder %s6152_s15, 3 }
   0x4   : > { %p163_p2 = pnand %p5437_p0, %p162_p1 }
   0x5   : > { %p188_p3 = scmp.lt.s32.totalorder (!%p163_p2), %s5433_s16, 1  ;;  %vm200_vm0 = vcmask (!%p163_p2), 867328   ;;  %v6154_v0 = vmov (!%p163_p2), 0.0   ;;  %vm8809_vm1 = vcmask (!%p163_p2), 551936   ;;  %v6155_v4 = vmov (!%p163_p2), 0.0|0.0   ;;  %s6156_s21 = smov (!%p163_p2), 127  }
   0x6   : > { %166 = sbr.rel (%p163_p2) target bundleno = 4722 (0x1272), region = 36  ;;  %201 = vst.msk [vmem:[#allocation2 + $0x10] sm:$0xff] (!%p163_p2), %vm200_vm0, %v6154_v0  ;;  %198 = vst [vmem:[#allocation2] sm:$0xff] (!%p163_p2), %v6154_v0  ;;  %495 = vmatprep.mubr.f32.mxu0 (!%p163_p2), %v6154_v0  ;;  %5589 = vmatprep.subr.bf16.mxu1 (!%p163_p2), %v6155_v4  ;;  %vm223_vm2 = vcmask (!%p163_p2), 556032   ;;  %s6157_s22 = smov (!%p163_p2), 126   ;;  %vm8813_vm3 = vmmov (!%p163_p2), 0  }
   0x7   : > { %199 = vst [vmem:[#allocation2 + $0x8] sm:$0xff] (!%p163_p2), %v6154_v0  ;;  %202 = vst [vmem:[#allocation2 + $0x18] sm:$0xff] (!%p163_p2), %v6154_v0  ;;  %s6158_s23 = smov (!%p163_p2), 110   ;;  %s6159_s24 = smov (!%p163_p2), 109   ;;  %5528 = vmatprep.mubr.msk.f32.mxu1 (!%p163_p2), %vm8813_vm3, %v6154_v0  ;;  %v6165_v9 = vmov (!%p163_p2), 0   ;;  %v421_v10 = vld [vmem:[%s8806_s2] sm:$0xff] (!%p163_p2) }
   0x8   : > { %204 = vst.msk [vmem:[#allocation2 + $0x28] sm:$0xff] (!%p163_p2), %vm200_vm0, %v6154_v0  ;;  %205 = vst [vmem:[#allocation2 + $0x30] sm:$0xff] (!%p163_p2), %v6154_v0  ;;  %s6160_s25 = smov (!%p163_p2), 108   ;;  %s6161_s26 = smov (!%p163_p2), 92   ;;  %6143 = vset.pattern.permute.xlu0 (!%p163_p2), %v6165_v9  ;;  %6144 = vset.pattern.permute.xlu1 (!%p163_p2), %v6165_v9  ;;  %vm279_vm4 = vcmask (!%p163_p2), 900096   ;;  %vm237_vm5 = vcmask (!%p163_p2), 1039360  }
   0x9   : > { %207 = vst.msk [vmem:[#allocation2 + $0x40] sm:$0xff] (!%p163_p2), %vm200_vm0, %v6154_v0  ;;  %s6162_s27 = smov (!%p163_p2), 91   ;;  %s6164_s28 = smov (!%p163_p2), 90   ;;  %vm258_vm6 = vcmask (!%p163_p2), 1031168   ;;  %vm300_vm7 = vcmask (!%p163_p2), 891904   ;;  %vm321_vm8 = vcmask (!%p163_p2), 883712  }
   0xa   : > { %vm342_vm9 = vcmask (!%p163_p2), 752640   ;;  %vm363_vm10 = vcmask (!%p163_p2), 744448   ;;  %vm384_vm11 = vcmask (!%p163_p2), 736256   ;;  %vm8812_vm12 = vcmask (!%p163_p2), 588800   ;;  %s6166_s9 = smov (!%p163_p2), 19   ;;  %s6167_s10 = smov (!%p163_p2), 56  }
   0xb   : > { %vm606_vm13 = vcmask (!%p163_p2), 1047704   ;;  %vm600_vm14 = vcmask (!%p163_p2), 154624   ;;  %vm609_vm15 = vcmask (!%p163_p2), 711680   ;;  %vm8811_vm0 = vcmask (!%p163_p2), 130048   ;;  %s6168_s30 = smov (!%p163_p2), 40  }
   0xd   : > { %s8830_s16 = smov (!%p188_p3, %s5433_s16), 1 }
   0xe   : > { %s6119_s17 = smul.u32 12, %s8830_s16 }
  0x10   : > { %s192_s20 = scalar_lea.vmem %s8804_s0, %s6119_s17 }
  0x11   : > { %v6218_v1 = vld [vmem:[%s192_s20 + $0x8] sm:$0xf]  ;;  %v6220_v2 = vld [vmem:[%s192_s20] sm:$0xff] }
  0x12   : > { %216 = vst.msk [vmem:[#allocation2 + $0x10] sm:$0xf] %vm8809_vm1, %v6218_v1  ;;  %213 = vst [vmem:[#allocation2] sm:$0xf] %v6220_v2  ;;  %v211_v3 = vcombine.high %v6220_v2, %v6220_v2  ;;  %vm8810_vm1 = vcmask 457728  }
  0x14   : > { %214 = vst [vmem:[#allocation2 + $0x8] sm:$0xf] %v211_v3 }
  0x19   : > { %v6228_v5 = vld [vmem:[#allocation2 + $0x10] sm:$0xff]  ;;  %v6230_v6 = vld [vmem:[#allocation2] sm:$0xff] }
  0x1a   : > { %235 = vrot.lane.b32.xlu0 %v6228_v5, %s6156_s21  ;;  %231 = vrot.lane.b32.xlu1 %v6230_v6, %s6156_s21  ;;  %224 = vst.msk [vmem:[#allocation3 + $0x10] sm:$0xff] %vm223_vm2, %v6228_v5  ;;  %1188 = vst [vmem:[#allocation3] sm:$0xff] %v6230_v6 }
  0x1b   : > { %v6243_v7 = vld [vmem:[#allocation2 + $0x8] sm:$0xff] }
  0x1e   : > { %256 = vrot.lane.b32.xlu0 %v6228_v5, %s6157_s22  ;;  %252 = vrot.lane.b32.xlu1 %v6230_v6, %s6157_s22 }
  0x21   : > { %v396_v8 = vld [vmem:[#allocation3 + $0x10] sm:$0xff] }
  0x22   : > { %277 = vrot.lane.b32.xlu0 %v6228_v5, %s6158_s23  ;;  %254 = vrot.lane.b32.xlu1 %v6243_v7, %s6157_s22  ;;  %619 = vst.msk [vmem:[#allocation3 + $0x10] sm:$0xff] %vm223_vm2, %v6228_v5 }
  0x26   : > { %273 = vrot.lane.b32.xlu0 %v6230_v6, %s6158_s23  ;;  %275 = vrot.lane.b32.xlu1 %v6243_v7, %s6158_s23 }
  0x2a   : > { %296 = vrot.lane.b32.xlu1 %v6243_v7, %s6159_s24  ;;  %233 = vrot.lane.b32.xlu0 %v6243_v7, %s6156_s21 }
  0x2e   : > { %317 = vrot.lane.b32.xlu1 %v6243_v7, %s6160_s25  ;;  %298 = vrot.lane.b32.xlu0 %v6228_v5, %s6159_s24 }
  0x32   : > { %294 = vrot.lane.b32.xlu1 %v6230_v6, %s6159_s24  ;;  %319 = vrot.lane.b32.xlu0 %v6228_v5, %s6160_s25 }
  0x36   : > { %338 = vrot.lane.b32.xlu1 %v6243_v7, %s6161_s26  ;;  %315 = vrot.lane.b32.xlu0 %v6230_v6, %s6160_s25 }
  0x3a   : > { %359 = vrot.lane.b32.xlu1 %v6243_v7, %s6162_s27  ;;  %340 = vrot.lane.b32.xlu0 %v6228_v5, %s6161_s26 }
  0x3e   : > { %336 = vrot.lane.b32.xlu1 %v6230_v6, %s6161_s26  ;;  %361 = vrot.lane.b32.xlu0 %v6228_v5, %s6162_s27 }
  0x42   : > { %380 = vrot.lane.b32.xlu1 %v6243_v7, %s6164_s28  ;;  %357 = vrot.lane.b32.xlu0 %v6230_v6, %s6162_s27 }
  0x46   : > { %378 = vrot.lane.b32.xlu1 %v6230_v6, %s6164_s28  ;;  %382 = vrot.lane.b32.xlu0 %v6228_v5, %s6164_s28 }
  0x4a   : > { %424 = vperm.xlu0 %6143, %v421_v10  }
  0x8c   : > { %v236_v11 = vpop.permute.xlu0 %235  ;;  %v232_v12 = vpop.permute.xlu1 %231 }
  0x8d   : > { %245 = vst.msk [vmem:[#allocation3 + $0x28] sm:$0xff] %vm223_vm2, %v236_v11 }
  0x90   : > { %v257_v13 = vpop.permute.xlu0 %256  ;;  %v253_v14 = vpop.permute.xlu1 %252 }
  0x91   : > { %266 = vst.msk [vmem:[#allocation3 + $0x40] sm:$0xff] %vm223_vm2, %v257_v13 }
  0x94   : > { %v278_v15 = vpop.permute.xlu0 %277  ;;  %v255_v16 = vpop.permute.xlu1 %254  ;;  %v399_v17 = vld [vmem:[#allocation3 + $0x28] sm:$0xff] }
  0x95   : > { %287 = vst.msk [vmem:[#allocation3 + $0x58] sm:$0xff] %vm223_vm2, %v278_v15  ;;  %v5590_v18 = vpack.c.bf16 %v399_v17, %v396_v8  ;;  %v260_v31 = vsel %vm258_vm6, %v255_v16, %v257_v13  ;;  %v259_v36 = vsel %vm258_vm6, %v253_v14, %v255_v16 }
  0x97   : > { %5591 = vmatpush3.bf16.msra.mxu1 %v5590_v18  ;;  %v217_v18 = vld [vmem:[%s8807_s3] sm:$0x7] }
  0x98   : > { %v274_v19 = vpop.permute.xlu0 %273  ;;  %v276_v20 = vpop.permute.xlu1 %275  ;;  %5592 = vmatprep.subr.bf16.mxu1 %v6155_v4  ;;  %v402_v23 = vld [vmem:[#allocation3 + $0x40] sm:$0xff] }
  0x99   : > { %v281_v25 = vsel %vm279_vm4, %v276_v20, %v278_v15  ;;  %v280_v32 = vsel %vm279_vm4, %v274_v19, %v276_v20  ;;  %v573_v15 = vlaneseq }
  0x9a   : > { %v5577_v35 = vpack.c.bf16 %v281_v25, %v260_v31  ;;  %v5579_v37 = vpack.c.bf16 %v280_v32, %v259_v36 }
  0x9b   : > { %v574_v16 = vshrl.u32 %v573_v15, 7 }
  0x9c   : > { %v297_v21 = vpop.permute.xlu1 %296  ;;  %v234_v22 = vpop.permute.xlu0 %233  ;;  %v405_v24 = vld [vmem:[#allocation3 + $0x58] sm:$0xff] }
  0x9d   : > { %v238_v26 = vsel %vm237_vm5, %v232_v12, %v234_v22  ;;  %v239_v27 = vsel %vm237_vm5, %v234_v22, %v236_v11  ;;  %v5593_v28 = vpack.c.bf16 %v405_v24, %v402_v23  ;;  %v6323_v12 = vld [vmem:[%s8805_s1] sm:$0xff]  ;;  %v575_v17 = vsub.s32 0, %v574_v16 }
  0x9e   : > { %v5573_v29 = vpack.c.bf16 %v239_v27, %v6243_v7  ;;  %v5575_v30 = vpack.c.bf16 %v238_v26, %v6230_v6  ;;  %v583_v23 = vsub.s32 2, %v574_v16 }
  0x9f   : > { %5594 = vmatpush3.bf16.msra.mxu1 %v5593_v28  ;;  %v6335_v20 = vrot.slane %v217_v18, %v575_v17 }
  0xa0   : > { %v318_v33 = vpop.permute.xlu1 %317  ;;  %v299_v34 = vpop.permute.xlu0 %298  ;;  %5574 = vmatprep.subr.bf16.mxu0 %v5573_v29  ;;  %5595 = vmatprep.subr.bf16.mxu1 %v6155_v4  ;;  %v6340_v29 = vrot.slane %v217_v18, %v583_v23 }
  0xa1   : > { %308 = vst.msk [vmem:[#allocation3 + $0x70] sm:$0xff] %vm223_vm2, %v299_v34  ;;  %5576 = vmatpush1.bf16.msra.mxu0 %v5575_v30  ;;  %v302_v40 = vsel %vm300_vm7, %v297_v21, %v299_v34 }
  0xa2   : > { %5578 = vmatprep.subr.bf16.mxu0 %v5577_v35  ;;  %v6347_v35 = vld [vmem:[#allocation3 + $0x10] sm:$0xff] }
  0xa3   : > { %1190 = vst.msk [vmem:[#allocation3 + $0x10] sm:$0xff] %vm223_vm2, %v6228_v5 }
  0xa4   : > { %v295_v38 = vpop.permute.xlu1 %294  ;;  %v320_v39 = vpop.permute.xlu0 %319 }
  0xa5   : > { %v323_v41 = vsel %vm321_vm8, %v318_v33, %v320_v39  ;;  %329 = vst.msk [vmem:[#allocation3 + $0x88] sm:$0xff] %vm223_vm2, %v320_v39  ;;  %5580 = vmatpush1.bf16.msra.mxu0 %v5579_v37  ;;  %v301_v45 = vsel %vm300_vm7, %v295_v38, %v297_v21  ;;  %v579_v21 = vsub.s32 1, %v574_v16 }
  0xa6   : > { %v5581_v42 = vpack.c.bf16 %v323_v41, %v302_v40 }
  0xa7   : > { %v6338_v28 = vrot.slane %v217_v18, %v579_v21 }
  0xa8   : > { %v339_v43 = vpop.permute.xlu1 %338  ;;  %v316_v44 = vpop.permute.xlu0 %315  ;;  %5582 = vmatprep.subr.bf16.mxu0 %v5581_v42  ;;  %v408_v50 = vld [vmem:[#allocation3 + $0x70] sm:$0xff] }
  0xa9   : > { %v322_v46 = vsel %vm321_vm8, %v316_v44, %v318_v33 }
  0xaa   : > { %v5583_v47 = vpack.c.bf16 %v322_v46, %v301_v45 }
  0xac   : > { %v360_v48 = vpop.permute.xlu1 %359  ;;  %v341_v49 = vpop.permute.xlu0 %340  ;;  %v411_v51 = vld [vmem:[#allocation3 + $0x88] sm:$0xff]  ;;  %5584 = vmatpush1.bf16.msra.mxu0 %v5583_v47 }
  0xad   : > { %350 = vst.msk [vmem:[#allocation3 + $0xa0] sm:$0xff] %vm223_vm2, %v341_v49  ;;  %v5596_v52 = vpack.c.bf16 %v411_v51, %v408_v50  ;;  %v344_v55 = vsel %vm342_vm9, %v339_v43, %v341_v49 }
  0xaf   : > { %5597 = vmatpush3.bf16.msra.mxu1 %v5596_v52 }
  0xb0   : > { %v337_v53 = vpop.permute.xlu1 %336  ;;  %v362_v54 = vpop.permute.xlu0 %361  ;;  %5598 = vmatprep.subr.bf16.mxu1 %v6155_v4 }
  0xb1   : > { %v365_v56 = vsel %vm363_vm10, %v360_v48, %v362_v54  ;;  %371 = vst.msk [vmem:[#allocation3 + $0xb8] sm:$0xff] %vm223_vm2, %v362_v54  ;;  %v343_v60 = vsel %vm342_vm9, %v337_v53, %v339_v43 }
  0xb2   : > { %v5585_v57 = vpack.c.bf16 %v365_v56, %v344_v55 }
  0xb4   : > { %v381_v58 = vpop.permute.xlu1 %380  ;;  %v358_v59 = vpop.permute.xlu0 %357  ;;  %5586 = vmatprep.subr.bf16.mxu0 %v5585_v57  ;;  %v414_v8 = vld [vmem:[#allocation3 + $0xa0] sm:$0xff] }
  0xb5   : > { %v364_v61 = vsel %vm363_vm10, %v358_v59, %v360_v48 }
  0xb6   : > { %v5587_v62 = vpack.c.bf16 %v364_v61, %v343_v60 }
  0xb8   : > { %v379_v63 = vpop.permute.xlu1 %378  ;;  %v383_v3 = vpop.permute.xlu0 %382  ;;  %v417_v9 = vld [vmem:[#allocation3 + $0xb8] sm:$0xff]  ;;  %5588 = vmatpush1.bf16.msra.mxu0 %v5587_v62 }
  0xb9   : > { %v386_v10 = vsel %vm384_vm11, %v381_v58, %v383_v3  ;;  %392 = vst.msk [vmem:[#allocation3 + $0xd0] sm:$0xff] %vm223_vm2, %v383_v3  ;;  %v5599_v11 = vpack.c.bf16 %v417_v9, %v414_v8  ;;  %v385_v13 = vsel %vm384_vm11, %v379_v63, %v381_v58  ;;  %v5442_v58 = vld [vmem:[%s8806_s2 + $0x8] sm:$0xff] }
  0xba   : > { %447 = vmatprep.subr.mxu0 %v386_v10  ;;  %v944_v63 = vld [vmem:[%s8805_s1 + $0x8] sm:$0xff] }
  0xbb   : > { %5600 = vmatpush3.bf16.msra.mxu1 %v5599_v11 }
  0xbc   : > { %5526 = vmatprep.subr.mxu1 %v6154_v0  ;;  %448 = vmatpush1.msra.mxu0 %v385_v13 }
  0xbd   : > { %5440 = vmatmul.mubr.msk.f32.vlgmr.msra.gmra.mrb[0].mxu0 %vm8812_vm12, %v6323_v12 }
  0xc0   : > { %v420_v14 = vld [vmem:[#allocation3 + $0xd0] sm:$0xff] }
  0xc1   : > { %5527 = vmatpush3.msra.mxu1 %v420_v14 }
  0xc2   : > { %5529 = vmatmul.mubr.msk.f32.vlgmr.msra.gmra.mrb[0].mxu1 %vm8812_vm12, %v6323_v12  ;;  %5637 = vmatprep.subr.bf16.mxu1 %v6155_v4 }
  0xc9   : > { %v425_v19 = vpop.permute.xlu0 %424 }
 0x190   : > { %v497_v22 = vpop.f32.mrb[0].mxu0 }
 0x191   : > { %v498_v24 = vadd.f32 %v497_v22, %v425_v19  ;;  %v499_v25 = vpop.f32.mrb[1].mxu0 }
 0x192   : > { %v500_v27 = vadd.f32 %v499_v25, %v425_v19 }
 0x193   : > { %v588_v26 = vmul.f32 %v6335_v20, %v498_v24 }
 0x194   : > { %v589_v33 = vmul.f32 %v6338_v28, %v500_v27 }
 0x195   : > { %v568_v30 = vpop.f32.mrb[0].mxu1  ;;  %594 = vrot.lane.b32.xlu1 %v588_v26, %s6166_s9 }
 0x196   : > { %v569_v31 = vadd.f32 %v568_v30, %v425_v19  ;;  %v5530_v32 = vpop.f32.mrb[1].mxu1 }
 0x198   : > { %v590_v34 = vmul.f32 %v6340_v29, %v569_v31 }
 0x199   : > { %596 = vrot.lane.b32.xlu1 %v589_v33, %s6166_s9 }
 0x19a   : > { %598 = vrot.lane.b32.xlu0 %v590_v34, %s6166_s9 }
 0x19d   : > { %637 = vrot.lane.b32.xlu1 %v6243_v7, %s6156_s21 }
 0x19e   : > { %639 = vrot.lane.b32.xlu0 %v6228_v5, %s6156_s21 }
 0x1a1   : > { %635 = vrot.lane.b32.xlu1 %v6230_v6, %s6156_s21 }
 0x1a2   : > { %679 = vrot.lane.b32.xlu0 %v6228_v5, %s6157_s22 }
 0x1a5   : > { %677 = vrot.lane.b32.xlu1 %v6243_v7, %s6157_s22 }
 0x1a6   : > { %719 = vrot.lane.b32.xlu0 %v6228_v5, %s6158_s23 }
 0x1a9   : > { %675 = vrot.lane.b32.xlu1 %v6230_v6, %s6157_s22 }
 0x1aa   : > { %759 = vrot.lane.b32.xlu0 %v6228_v5, %s6159_s24 }
 0x1ad   : > { %717 = vrot.lane.b32.xlu1 %v6243_v7, %s6158_s23 }
 0x1ae   : > { %799 = vrot.lane.b32.xlu0 %v6228_v5, %s6160_s25 }
 0x1b1   : > { %715 = vrot.lane.b32.xlu1 %v6230_v6, %s6158_s23 }
 0x1b2   : > { %839 = vrot.lane.b32.xlu0 %v6228_v5, %s6161_s26 }
 0x1b5   : > { %757 = vrot.lane.b32.xlu1 %v6243_v7, %s6159_s24 }
 0x1b6   : > { %879 = vrot.lane.b32.xlu0 %v6228_v5, %s6162_s27 }
 0x1b9   : > { %755 = vrot.lane.b32.xlu1 %v6230_v6, %s6159_s24 }
 0x1ba   : > { %919 = vrot.lane.b32.xlu0 %v6228_v5, %s6164_s28 }
 0x1bd   : > { %797 = vrot.lane.b32.xlu1 %v6243_v7, %s6160_s25 }
 0x1c1   : > { %795 = vrot.lane.b32.xlu1 %v6230_v6, %s6160_s25 }
 0x1c5   : > { %837 = vrot.lane.b32.xlu1 %v6243_v7, %s6161_s26 }
 0x1c9   : > { %835 = vrot.lane.b32.xlu1 %v6230_v6, %s6161_s26 }
 0x1cd   : > { %877 = vrot.lane.b32.xlu1 %v6243_v7, %s6162_s27 }
 0x1d1   : > { %875 = vrot.lane.b32.xlu1 %v6230_v6, %s6162_s27 }
 0x1d5   : > { %917 = vrot.lane.b32.xlu1 %v6243_v7, %s6164_s28 }
 0x207   : > { %v595_v36 = vpop.permute.xlu1 %594 }
 0x208   : > { %607 = vst.msk [vmem:[#allocation2 + $0x18] sm:$0xff] %vm606_vm13, %v595_v36 }
 0x20b   : > { %v597_v37 = vpop.permute.xlu1 %596 }
 0x20c   : > { %v599_v38 = vpop.permute.xlu0 %598  ;;  %v6399_v39 = vsel %vm600_vm14, %v595_v36, %v597_v37 }
 0x20d   : > { %v602_v40 = vsel %vm600_vm14, %v597_v37, %v599_v38  ;;  %608 = vst [vmem:[#allocation2 + $0x20] sm:$0xff] %v6399_v39  ;;  %643 = vrot.lane.b32.xlu1 %v6399_v39, %s6156_s21  ;;  %v6407_v41 = vpack.c.bf16 %v6399_v39, %v6243_v7 }
 0x20e   : > { %610 = vst.msk [vmem:[#allocation2 + $0x28] sm:$0xff] %vm609_vm15, %v602_v40 }
 0x20f   : > { %v6410_v42 = vld [vmem:[#allocation2 + $0x18] sm:$0xff]  ;;  %5602 = vmatprep.subr.bf16.mxu0 %v6407_v41  ;;  %v6469_v53 = vpop.permute.xlu1 %637 }
 0x210   : > { %641 = vrot.lane.b32.xlu0 %v6410_v42, %s6156_s21  ;;  %v5603_v43 = vpack.c.bf16 %v6410_v42, %v6230_v6  ;;  %v6417_v44 = vpop.permute.xlu0 %639 }
 0x211   : > { %683 = vrot.lane.b32.xlu1 %v6399_v39, %s6157_s22  ;;  %659 = vst.msk [vmem:[#allocation3 + $0x40] sm:$0xff] %vm223_vm2, %v6417_v44  ;;  %v648_v31 = vsel %vm237_vm5, %v6469_v53, %v6417_v44 }
 0x212   : > { %5604 = vmatpush1.bf16.msra.mxu0 %v5603_v43 }
 0x213   : > { %v6481_v55 = vpop.permute.xlu1 %635 }
 0x214   : > { %681 = vrot.lane.b32.xlu0 %v6410_v42, %s6157_s22  ;;  %v6425_v45 = vpop.permute.xlu0 %679  ;;  %v647_v33 = vsel %vm237_vm5, %v6481_v55, %v6469_v53 }
 0x215   : > { %723 = vrot.lane.b32.xlu1 %v6399_v39, %s6158_s23  ;;  %v6429_v46 = vld [vmem:[#allocation2 + $0x28] sm:$0xff]  ;;  %699 = vst.msk [vmem:[#allocation3 + $0x70] sm:$0xff] %vm223_vm2, %v6425_v45 }
 0x216   : > { %622 = vst.msk [vmem:[#allocation3 + $0x28] sm:$0xff] %vm223_vm2, %v6429_v46 }
 0x217   : > { %v6495_v57 = vpop.permute.xlu1 %677 }
 0x218   : > { %721 = vrot.lane.b32.xlu0 %v6410_v42, %s6158_s23  ;;  %v6437_v47 = vpop.permute.xlu0 %719  ;;  %v688_v38 = vsel %vm258_vm6, %v6495_v57, %v6425_v45 }
 0x219   : > { %763 = vrot.lane.b32.xlu1 %v6399_v39, %s6159_s24  ;;  %739 = vst.msk [vmem:[#allocation3 + $0xa0] sm:$0xff] %vm223_vm2, %v6437_v47 }
 0x21b   : > { %v6502_v59 = vpop.permute.xlu1 %675 }
 0x21c   : > { %761 = vrot.lane.b32.xlu0 %v6410_v42, %s6159_s24  ;;  %v6445_v48 = vpop.permute.xlu0 %759  ;;  %v687_v43 = vsel %vm258_vm6, %v6502_v59, %v6495_v57 }
 0x21d   : > { %v950_v49 = vld [vmem:[#allocation3 + $0x28] sm:$0xff]  ;;  %803 = vrot.lane.b32.xlu1 %v6399_v39, %s6160_s25  ;;  %779 = vst.msk [vmem:[#allocation3 + $0xd0] sm:$0xff] %vm223_vm2, %v6445_v48 }
 0x21e   : > { %v5638_v50 = vpack.c.bf16 %v950_v49, %v6347_v35  ;;  %1193 = vst.msk [vmem:[#allocation3 + $0x28] sm:$0xff] %vm223_vm2, %v6429_v46 }
 0x21f   : > { %v6512_v60 = vpop.permute.xlu1 %717 }
 0x220   : > { %5639 = vmatpush1.bf16.msra.mxu1 %v5638_v50  ;;  %801 = vrot.lane.b32.xlu0 %v6410_v42, %s6160_s25  ;;  %v6456_v51 = vpop.permute.xlu0 %799  ;;  %v728_v45 = vsel %vm279_vm4, %v6512_v60, %v6437_v47  ;;  %v959_v47 = vld [vmem:[#allocation3 + $0x70] sm:$0xff] }
 0x221   : > { %843 = vrot.lane.b32.xlu1 %v6399_v39, %s6161_s26  ;;  %819 = vst.msk [vmem:[#allocation3 + $0x100] sm:$0xff] %vm223_vm2, %v6456_v51  ;;  %5640 = vmatprep.subr.bf16.mxu1 %v6155_v4 }
 0x223   : > { %v6518_v61 = vpop.permute.xlu1 %715 }
 0x224   : > { %841 = vrot.lane.b32.xlu0 %v6410_v42, %s6161_s26  ;;  %v6465_v52 = vpop.permute.xlu0 %839  ;;  %v727_v57 = vsel %vm279_vm4, %v6518_v61, %v6512_v60 }
 0x225   : > { %883 = vrot.lane.b32.xlu1 %v6399_v39, %s6162_s27  ;;  %859 = vst.msk [vmem:[#allocation3 + $0x130] sm:$0xff] %vm223_vm2, %v6465_v52 }
 0x227   : > { %v6528_v62 = vpop.permute.xlu1 %757 }
 0x228   : > { %881 = vrot.lane.b32.xlu0 %v6410_v42, %s6162_s27  ;;  %v6475_v54 = vpop.permute.xlu0 %879 }
 0x229   : > { %923 = vrot.lane.b32.xlu1 %v6399_v39, %s6164_s28  ;;  %899 = vst.msk [vmem:[#allocation3 + $0x160] sm:$0xff] %vm223_vm2, %v6475_v54 }
 0x22b   : > { %v6537_v3 = vpop.permute.xlu1 %755 }
 0x22c   : > { %645 = vrot.lane.b32.xlu0 %v6429_v46, %s6156_s21  ;;  %v6485_v56 = vpop.permute.xlu0 %919  ;;  %v767_v61 = vsel %vm300_vm7, %v6537_v3, %v6528_v62 }
 0x22d   : > { %915 = vrot.lane.b32.xlu1 %v6230_v6, %s6164_s28  ;;  %939 = vst.msk [vmem:[#allocation3 + $0x190] sm:$0xff] %vm223_vm2, %v6485_v56 }
 0x22f   : > { %v6546_v8 = vpop.permute.xlu1 %797 }
 0x230   : > { %685 = vrot.lane.b32.xlu0 %v6429_v46, %s6157_s22 }
 0x231   : > { %1008 = vrot.lane.b32.xlu1 %v6323_v12, %s6167_s10 }
 0x233   : > { %v6550_v9 = vpop.permute.xlu1 %795 }
 0x234   : > { %725 = vrot.lane.b32.xlu0 %v6429_v46, %s6158_s23 }
 0x235   : > { %1003 = vperm.xlu1 %6144, %v5442_v58   ;;  %v953_v58 = vld [vmem:[#allocation3 + $0x40] sm:$0xff] }
 0x237   : > { %v6556_v10 = vpop.permute.xlu1 %837 }
 0x238   : > { %765 = vrot.lane.b32.xlu0 %v6429_v46, %s6159_s24 }
 0x239   : > { %1217 = vrot.lane.b32.xlu1 %v6243_v7, %s6156_s21 }
 0x23c   : > { %805 = vrot.lane.b32.xlu0 %v6429_v46, %s6160_s25 }
 0x23d   : > { %1215 = vrot.lane.b32.xlu1 %v6230_v6, %s6156_s21 }
 0x240   : > { %845 = vrot.lane.b32.xlu0 %v6429_v46, %s6161_s26 }
 0x241   : > { %1279 = vrot.lane.b32.xlu1 %v6228_v5, %s6157_s22 }
 0x244   : > { %885 = vrot.lane.b32.xlu0 %v6429_v46, %s6162_s27 }
 0x245   : > { %1281 = vrot.lane.b32.xlu1 %v6410_v42, %s6157_s22 }
 0x248   : > { %925 = vrot.lane.b32.xlu0 %v6429_v46, %s6164_s28 }
 0x249   : > { %1339 = vrot.lane.b32.xlu1 %v6228_v5, %s6158_s23 }
 0x24c   : > { %921 = vrot.lane.b32.xlu0 %v6410_v42, %s6164_s28 }
 0x24d   : > { %1335 = vrot.lane.b32.xlu1 %v6230_v6, %s6158_s23 }
 0x250   : > { %1010 = vrot.lane.b32.xlu0 %v944_v63, %s6167_s10 }
 0x251   : > { %1225 = vrot.lane.b32.xlu1 %v6429_v46, %s6156_s21 }
 0x254   : > { %1219 = vrot.lane.b32.xlu0 %v6228_v5, %s6156_s21  ;;  %v6560_v5 = vpop.permute.xlu1 %835 }
 0x255   : > { %1285 = vrot.lane.b32.xlu1 %v6429_v46, %s6157_s22 }
 0x258   : > { %1221 = vrot.lane.b32.xlu0 %v6410_v42, %s6156_s21  ;;  %v6566_v11 = vpop.permute.xlu1 %877 }
 0x25c   : > { %1277 = vrot.lane.b32.xlu0 %v6243_v7, %s6157_s22  ;;  %v6568_v12 = vpop.permute.xlu1 %875 }
 0x260   : > { %1275 = vrot.lane.b32.xlu0 %v6230_v6, %s6157_s22  ;;  %v6570_v13 = vpop.permute.xlu1 %917 }
 0x264   : > { %1337 = vrot.lane.b32.xlu0 %v6243_v7, %s6158_s23 }
 0x268   : > { %1223 = vrot.lane.b32.xlu0 %v6399_v39, %s6156_s21 }
 0x26c   : > { %1283 = vrot.lane.b32.xlu0 %v6399_v39, %s6157_s22 }
 0x27f   : > { %v644_v6 = vpop.permute.xlu1 %643 }
 0x282   : > { %v642_v14 = vpop.permute.xlu0 %641 }
 0x283   : > { %v684_v15 = vpop.permute.xlu1 %683  ;;  %v649_v26 = vsel %vm237_vm5, %v642_v14, %v644_v6 }
 0x284   : > { %v5607_v35 = vpack.c.bf16 %v649_v26, %v647_v33 }
 0x286   : > { %v682_v16 = vpop.permute.xlu0 %681 }
 0x287   : > { %v724_v17 = vpop.permute.xlu1 %723  ;;  %v689_v36 = vsel %vm258_vm6, %v682_v16, %v684_v15 }
 0x288   : > { %v5611_v50 = vpack.c.bf16 %v689_v36, %v687_v43  ;;  %v808_v36 = vsel %vm321_vm8, %v6546_v8, %v6456_v51  ;;  %v971_v51 = vld [vmem:[#allocation3 + $0xd0] sm:$0xff] }
 0x28a   : > { %v722_v7 = vpop.permute.xlu0 %721 }
 0x28b   : > { %v764_v18 = vpop.permute.xlu1 %763  ;;  %v729_v53 = vsel %vm279_vm4, %v722_v7, %v724_v17 }
 0x28e   : > { %v762_v19 = vpop.permute.xlu0 %761 }
 0x28f   : > { %v6572_v22 = vpop.permute.xlu1 %803  ;;  %v769_v16 = vsel %vm300_vm7, %v762_v19, %v764_v18 }
 0x292   : > { %v802_v21 = vpop.permute.xlu0 %801 }
 0x293   : > { %v6576_v24 = vpop.permute.xlu1 %843  ;;  %v809_v33 = vsel %vm321_vm8, %v802_v21, %v6572_v22  ;;  %v807_v21 = vsel %vm321_vm8, %v6550_v9, %v6546_v8 }
 0x296   : > { %v6574_v23 = vpop.permute.xlu0 %841 }
 0x297   : > { %v6581_v30 = vpop.permute.xlu1 %883 }
 0x29a   : > { %v6578_v25 = vpop.permute.xlu0 %881 }
 0x29b   : > { %v6600_v44 = vpop.permute.xlu1 %923 }
 0x29e   : > { %v646_v27 = vpop.permute.xlu0 %645 }
 0x29f   : > { %v650_v32 = vsel %vm237_vm5, %v644_v6, %v646_v27  ;;  %662 = vst.msk [vmem:[#allocation3 + $0x58] sm:$0xff] %vm223_vm2, %v646_v27  ;;  %v6612_v7 = vpop.permute.xlu1 %915  ;;  %v768_v27 = vsel %vm300_vm7, %v6528_v62, %v6445_v48  ;;  %v965_v48 = vld [vmem:[#allocation3 + $0xa0] sm:$0xff] }
 0x2a0   : > { %v5605_v34 = vpack.c.bf16 %v650_v32, %v648_v31  ;;  %v5619_v32 = vpack.c.bf16 %v769_v16, %v767_v61 }
 0x2a2   : > { %v686_v37 = vpop.permute.xlu0 %685  ;;  %5606 = vmatprep.subr.bf16.mxu0 %v5605_v34 }
 0x2a3   : > { %v690_v40 = vsel %vm258_vm6, %v684_v15, %v686_v37  ;;  %702 = vst.msk [vmem:[#allocation3 + $0x88] sm:$0xff] %vm223_vm2, %v686_v37  ;;  %5608 = vmatpush1.bf16.msra.mxu0 %v5607_v35  ;;  %v5615_v15 = vpack.c.bf16 %v729_v53, %v727_v57 }
 0x2a4   : > { %v5609_v49 = vpack.c.bf16 %v690_v40, %v688_v38  ;;  %v5623_v38 = vpack.c.bf16 %v809_v33, %v807_v21  ;;  %v849_v40 = vsel %vm342_vm9, %v6574_v23, %v6576_v24  ;;  %v847_v23 = vsel %vm342_vm9, %v6560_v5, %v6556_v10 }
 0x2a6   : > { %v726_v55 = vpop.permute.xlu0 %725  ;;  %v956_v63 = vld [vmem:[#allocation3 + $0x58] sm:$0xff]  ;;  %5610 = vmatprep.subr.bf16.mxu0 %v5609_v49  ;;  %v848_v49 = vsel %vm342_vm9, %v6556_v10, %v6465_v52  ;;  %v889_v52 = vsel %vm363_vm10, %v6578_v25, %v6581_v30  ;;  %v887_v25 = vsel %vm363_vm10, %v6568_v12, %v6566_v11 }
 0x2a7   : > { %v730_v6 = vsel %vm279_vm4, %v724_v17, %v726_v55  ;;  %742 = vst.msk [vmem:[#allocation3 + $0xb8] sm:$0xff] %vm223_vm2, %v726_v55  ;;  %v5641_v14 = vpack.c.bf16 %v956_v63, %v953_v58  ;;  %5612 = vmatpush1.bf16.msra.mxu0 %v5611_v50  ;;  %v5627_v55 = vpack.c.bf16 %v849_v40, %v847_v23 }
 0x2a8   : > { %v5613_v59 = vpack.c.bf16 %v730_v6, %v728_v45  ;;  %v888_v45 = vsel %vm363_vm10, %v6566_v11, %v6475_v54  ;;  %v5631_v57 = vpack.c.bf16 %v889_v52, %v887_v25  ;;  %v983_v54 = vld [vmem:[#allocation3 + $0x130] sm:$0xff]  ;;  %v6725_v52 = vld [vmem:[#allocation2 + $0x10] sm:$0xff] }
 0x2a9   : > { %5642 = vmatpush1.bf16.msra.mxu1 %v5641_v14 }
 0x2aa   : > { %v766_v26 = vpop.permute.xlu0 %765  ;;  %5643 = vmatprep.subr.bf16.mxu1 %v6155_v4  ;;  %v962_v17 = vld [vmem:[#allocation3 + $0x88] sm:$0xff]  ;;  %5614 = vmatprep.subr.bf16.mxu0 %v5613_v59 }
 0x2ab   : > { %v770_v31 = vsel %vm300_vm7, %v764_v18, %v766_v26  ;;  %782 = vst.msk [vmem:[#allocation3 + $0xe8] sm:$0xff] %vm223_vm2, %v766_v26  ;;  %v5644_v60 = vpack.c.bf16 %v962_v17, %v959_v47  ;;  %5616 = vmatpush1.bf16.msra.mxu0 %v5615_v15  ;;  %v6626_v18 = vpop.permute.xlu1 %1008  ;;  %v989_v17 = vld [vmem:[#allocation3 + $0x160] sm:$0xff] }
 0x2ac   : > { %v5617_v19 = vpack.c.bf16 %v770_v31, %v768_v27 }
 0x2ad   : > { %5645 = vmatpush1.bf16.msra.mxu1 %v5644_v60 }
 0x2ae   : > { %v806_v34 = vpop.permute.xlu0 %805  ;;  %5646 = vmatprep.subr.bf16.mxu1 %v6155_v4  ;;  %v968_v35 = vld [vmem:[#allocation3 + $0xb8] sm:$0xff]  ;;  %5618 = vmatprep.subr.bf16.mxu0 %v5617_v19 }
 0x2af   : > { %v810_v62 = vsel %vm321_vm8, %v6572_v22, %v806_v34  ;;  %822 = vst.msk [vmem:[#allocation3 + $0x118] sm:$0xff] %vm223_vm2, %v806_v34  ;;  %v5647_v3 = vpack.c.bf16 %v968_v35, %v965_v48  ;;  %5620 = vmatpush1.bf16.msra.mxu0 %v5619_v32  ;;  %v1680_v32 = vld [vmem:[#allocation3] sm:$0xff]  ;;  %v995_v34 = vld [vmem:[#allocation3 + $0x190] sm:$0xff]  ;;  %v1685_v35 = vld [vmem:[#allocation3 + $0x28] sm:$0xff] }
 0x2b0   : > { %v5621_v37 = vpack.c.bf16 %v810_v62, %v808_v36  ;;  %v5666_v62 = vpack.c.bf16 %v6410_v42, %v1680_v32  ;;  %v1562_v32 = vld [vmem:[#allocation2 + $0x28] sm:$0xff] }
 0x2b1   : > { %5648 = vmatpush1.bf16.msra.mxu1 %v5647_v3 }
 0x2b2   : > { %v846_v43 = vpop.permute.xlu0 %845  ;;  %5649 = vmatprep.subr.bf16.mxu1 %v6155_v4  ;;  %v974_v22 = vld [vmem:[#allocation3 + $0xe8] sm:$0xff]  ;;  %5622 = vmatprep.subr.bf16.mxu0 %v5621_v37 }
 0x2b3   : > { %v850_v8 = vsel %vm342_vm9, %v6576_v24, %v846_v43  ;;  %862 = vst.msk [vmem:[#allocation3 + $0x148] sm:$0xff] %vm223_vm2, %v846_v43  ;;  %v5650_v9 = vpack.c.bf16 %v974_v22, %v971_v51  ;;  %5624 = vmatpush1.bf16.msra.mxu0 %v5623_v38  ;;  %v977_v24 = vld [vmem:[#allocation3 + $0x100] sm:$0xff] }
 0x2b4   : > { %v6650_v50 = vpop.permute.xlu1 %1003  ;;  %v5625_v53 = vpack.c.bf16 %v850_v8, %v848_v49 }
 0x2b5   : > { %5651 = vmatpush1.bf16.msra.mxu1 %v5650_v9 }
 0x2b6   : > { %v886_v58 = vpop.permute.xlu0 %885  ;;  %5652 = vmatprep.subr.bf16.mxu1 %v6155_v4  ;;  %v980_v63 = vld [vmem:[#allocation3 + $0x118] sm:$0xff]  ;;  %5626 = vmatprep.subr.bf16.mxu0 %v5625_v53 }
 0x2b7   : > { %v890_v10 = vsel %vm363_vm10, %v6581_v30, %v886_v58  ;;  %902 = vst.msk [vmem:[#allocation3 + $0x178] sm:$0xff] %vm223_vm2, %v886_v58  ;;  %v5653_v5 = vpack.c.bf16 %v980_v63, %v977_v24  ;;  %5628 = vmatpush1.bf16.msra.mxu0 %v5627_v55  ;;  %v928_v30 = vsel %vm384_vm11, %v6570_v13, %v6485_v56  ;;  %v6744_v58 = vld [vmem:[#allocation2] sm:$0xff] }
 0x2b8   : > { %v6665_v6 = vpop.permute.xlu1 %1217  ;;  %v5629_v14 = vpack.c.bf16 %v890_v10, %v888_v45  ;;  %v927_v56 = vsel %vm384_vm11, %v6612_v7, %v6570_v13  ;;  %v1682_v7 = vld [vmem:[#allocation3 + $0x10] sm:$0xff] }
 0x2b9   : > { %5654 = vmatpush1.bf16.msra.mxu1 %v5653_v5  ;;  %v5717_v21 = vpack.c.bf16 %v1685_v35, %v1682_v7  ;;  %v1621_v35 = vld [vmem:[#allocation2 + $0x20] sm:$0xff] }
 0x2ba   : > { %v926_v59 = vpop.permute.xlu0 %925  ;;  %5655 = vmatprep.subr.bf16.mxu1 %v6155_v4  ;;  %v986_v15 = vld [vmem:[#allocation3 + $0x148] sm:$0xff]  ;;  %5630 = vmatprep.subr.bf16.mxu0 %v5629_v14 }
 0x2bb   : > { %v930_v16 = vsel %vm384_vm11, %v6600_v44, %v926_v59  ;;  %942 = vst.msk [vmem:[#allocation3 + $0x1a8] sm:$0xff] %vm223_vm2, %v926_v59  ;;  %v5656_v11 = vpack.c.bf16 %v986_v15, %v983_v54  ;;  %5632 = vmatpush1.bf16.msra.mxu0 %v5631_v57 }
 0x2bc   : > { %v6674_v12 = vpop.permute.xlu1 %1215  ;;  %v5633_v26 = vpack.c.bf16 %v930_v16, %v928_v30 }
 0x2bd   : > { %5657 = vmatpush1.bf16.msra.mxu1 %v5656_v11 }
 0x2be   : > { %v922_v47 = vpop.permute.xlu0 %921  ;;  %5658 = vmatprep.subr.bf16.mxu1 %v6155_v4  ;;  %v992_v27 = vld [vmem:[#allocation3 + $0x178] sm:$0xff]  ;;  %5634 = vmatprep.subr.bf16.mxu0 %v5633_v26  ;;  %v1233_v26 = vsel %vm237_vm5, %v6674_v12, %v6665_v6 }
 0x2bf   : > { %v929_v31 = vsel %vm384_vm11, %v922_v47, %v6600_v44  ;;  %v5659_v60 = vpack.c.bf16 %v992_v27, %v989_v17 }
 0x2c0   : > { %v6682_v61 = vpop.permute.xlu1 %1279  ;;  %v5635_v19 = vpack.c.bf16 %v929_v31, %v927_v56 }
 0x2c1   : > { %5660 = vmatpush1.bf16.msra.mxu1 %v5659_v60  ;;  %1310 = vst.msk [vmem:[#allocation3 + $0xa0] sm:$0xff] %vm223_vm2, %v6682_v61 }
 0x2c2   : > { %v1011_v33 = vpop.permute.xlu0 %1010  ;;  %5661 = vmatprep.subr.bf16.mxu1 %v6155_v4  ;;  %v998_v48 = vld [vmem:[#allocation3 + $0x1a8] sm:$0xff]  ;;  %5636 = vmatpush1.bf16.msra.mxu0 %v5635_v19 }
 0x2c3   : > { %v5662_v13 = vpack.c.bf16 %v998_v48, %v995_v34  ;;  %5444 = vmatprep.mubr.msk.f32.mxu1 %vm8811_vm0, %v1011_v33  ;;  %5443 = vmatprep.mubr.msk.f32.mxu0 %vm8811_vm0, %v1011_v33  ;;  %v1013_v44 = vsel %vm8810_vm1, %v6626_v18, %v1011_v33  ;;  %v1560_v33 = vld [vmem:[#allocation2 + $0x18] sm:$0xff]  ;;  %vm1777_vm1 = vcmask 326656   ;;  %vm8814_vm0 = vcmask 719872  }
 0x2c4   : > { %5665 = vmatprep.subr.bf16.mxu0 %v6407_v41  ;;  %v6692_v36 = vpop.permute.xlu1 %1281 }
 0x2c5   : > { %5663 = vmatpush1.bf16.msra.mxu1 %v5662_v13  ;;  %1083 = vmatmul.mubr.f32.vlgmr.msra.gmra.mrb[2].mxu0 %v1013_v44 }
 0x2c6   : > { %v6695_v3 = vpop.permute.xlu0 %1219  ;;  %5716 = vmatprep.subr.bf16.mxu1 %v6155_v4  ;;  %5667 = vmatpush1.bf16.msra.mxu0 %v5666_v62 }
 0x2c7   : > { %1250 = vst.msk [vmem:[#allocation3 + $0x58] sm:$0xff] %vm223_vm2, %v6695_v3  ;;  %v1234_v59 = vsel %vm237_vm5, %v6665_v6, %v6695_v3 }
 0x2c8   : > { %1154 = vmatmul.mubr.f32.vlgmr.msra.gmra.mrb[2].mxu1 %v1013_v44  ;;  %v6700_v18 = vpop.permute.xlu1 %1339 }
 0x2c9   : > { %5718 = vmatpush1.bf16.msra.mxu1 %v5717_v21  ;;  %1370 = vst.msk [vmem:[#allocation3 + $0xe8] sm:$0xff] %vm223_vm2, %v6700_v18 }
 0x2ca   : > { %5719 = vmatprep.subr.bf16.mxu1 %v6155_v4 }
 0x2cc   : > { %v6705_v41 = vpop.permute.xlu1 %1335 }
 0x2ce   : > { %v1691_v31 = vld [vmem:[#allocation3 + $0x58] sm:$0xff] }
 0x2d0   : > { %v6707_v37 = vpop.permute.xlu1 %1225 }
 0x2d1   : > { %1253 = vst.msk [vmem:[#allocation3 + $0x70] sm:$0xff] %vm223_vm2, %v6707_v37 }
 0x2d4   : > { %v6711_v38 = vpop.permute.xlu1 %1285 }
 0x2d5   : > { %1313 = vst.msk [vmem:[#allocation3 + $0xb8] sm:$0xff] %vm223_vm2, %v6711_v38 }
 0x398   : > { %v1084_v40 = vpop.f32.mrb[2].mxu0 }
 0x399   : > { %v1086_v43 = vpop.f32.mrb[3].mxu0  ;;  %v1085_v53 = vadd.f32 %v1084_v40, %v6650_v50  ;;  %v1678_v40 = vld [vmem:[%s8805_s1 + $0x10] sm:$0xff] }
 0x39a   : > { %v1087_v51 = vadd.f32 %v1086_v43, %v6650_v50  ;;  %v1679_v43 = vld [vmem:[%s8805_s1 + $0x18] sm:$0xff] }
 0x39b   : > { %v1155_v22 = vpop.f32.mrb[2].mxu1  ;;  %v1159_v55 = vmul.f32 %v1085_v53, %v6335_v20 }
 0x39c   : > { %v1156_v49 = vadd.f32 %v1155_v22, %v6650_v50  ;;  %v1157_v8 = vpop.f32.mrb[3].mxu1  ;;  %v1160_v9 = vmul.f32 %v1087_v51, %v6338_v28  ;;  %v6736_v50 = vld [vmem:[#allocation2 + $0x8] sm:$0xff] }
 0x39d   : > { %v1677_v22 = vld [vmem:[%s8805_s1 + $0x8] sm:$0xff] }
 0x39e   : > { %v1161_v23 = vmul.f32 %v1156_v49, %v6340_v29  ;;  %1167 = vrot.lane.b32.xlu1 %v1160_v9, %s6166_s9  ;;  %v5445_v49 = vld [vmem:[%s8806_s2 + $0x10] sm:$0xff] }
 0x3a0   : > { %1169 = vrot.lane.b32.xlu0 %v1161_v23, %s6166_s9 }
 0x3a2   : > { %1345 = vrot.lane.b32.xlu1 %v6429_v46, %s6158_s23 }
 0x3a4   : > { %1165 = vrot.lane.b32.xlu0 %v1159_v55, %s6166_s9 }
 0x3a6   : > { %1399 = vrot.lane.b32.xlu1 %v6725_v52, %s6159_s24 }
 0x3a8   : > { %1343 = vrot.lane.b32.xlu0 %v6399_v39, %s6158_s23 }
 0x3aa   : > { %1405 = vrot.lane.b32.xlu1 %v6429_v46, %s6159_s24 }
 0x3ac   : > { %1341 = vrot.lane.b32.xlu0 %v6410_v42, %s6158_s23 }
 0x3ae   : > { %1401 = vrot.lane.b32.xlu1 %v6410_v42, %s6159_s24 }
 0x3b0   : > { %1397 = vrot.lane.b32.xlu0 %v6736_v50, %s6159_s24 }
 0x3b2   : > { %1459 = vrot.lane.b32.xlu1 %v6725_v52, %s6160_s25 }
 0x3b4   : > { %1403 = vrot.lane.b32.xlu0 %v6399_v39, %s6159_s24 }
 0x3b6   : > { %1455 = vrot.lane.b32.xlu1 %v6744_v58, %s6160_s25 }
 0x3b8   : > { %1395 = vrot.lane.b32.xlu0 %v6744_v58, %s6159_s24 }
 0x3ba   : > { %1465 = vrot.lane.b32.xlu1 %v6429_v46, %s6160_s25 }
 0x3bc   : > { %1457 = vrot.lane.b32.xlu0 %v6736_v50, %s6160_s25 }
 0x3be   : > { %1519 = vrot.lane.b32.xlu1 %v6725_v52, %s6161_s26 }
 0x3c0   : > { %1463 = vrot.lane.b32.xlu0 %v6399_v39, %s6160_s25 }
 0x3c2   : > { %1525 = vrot.lane.b32.xlu1 %v6429_v46, %s6161_s26 }
 0x3c4   : > { %1461 = vrot.lane.b32.xlu0 %v6410_v42, %s6160_s25 }
 0x3c6   : > { %1521 = vrot.lane.b32.xlu1 %v6410_v42, %s6161_s26  ;;  %v6780_v42 = vpop.permute.xlu0 %1221 }
 0x3c8   : > { %1517 = vrot.lane.b32.xlu0 %v6736_v50, %s6161_s26 }
 0x3ca   : > { %1579 = vrot.lane.b32.xlu1 %v6725_v52, %s6162_s27  ;;  %v6782_v46 = vpop.permute.xlu0 %1277 }
 0x3cc   : > { %1523 = vrot.lane.b32.xlu0 %v6399_v39, %s6161_s26 }
 0x3ce   : > { %1575 = vrot.lane.b32.xlu1 %v6744_v58, %s6162_s27  ;;  %v6784_v24 = vpop.permute.xlu0 %1275 }
 0x3d0   : > { %1515 = vrot.lane.b32.xlu0 %v6744_v58, %s6161_s26 }
 0x3d2   : > { %v6786_v63 = vpop.permute.xlu0 %1337 }
 0x3d4   : > { %1577 = vrot.lane.b32.xlu0 %v6736_v50, %s6162_s27 }
 0x3d6   : > { %v6788_v45 = vpop.permute.xlu0 %1223 }
 0x3d8   : > { %1583 = vrot.lane.b32.xlu0 %v6399_v39, %s6162_s27 }
 0x3da   : > { %v6790_v10 = vpop.permute.xlu0 %1283 }
 0x410   : > { %v1168_v5 = vpop.permute.xlu1 %1167 }
 0x412   : > { %v1170_v25 = vpop.permute.xlu0 %1169 }
 0x413   : > { %v1172_v14 = vsel %vm600_vm14, %v1168_v5, %v1170_v25 }
 0x414   : > { %1178 = vst.msk [vmem:[#allocation2 + $0x40] sm:$0xff] %vm609_vm15, %v1172_v14  ;;  %v6794_v57 = vpop.permute.xlu1 %1345 }
 0x415   : > { %1373 = vst.msk [vmem:[#allocation3 + $0x100] sm:$0xff] %vm223_vm2, %v6794_v57 }
 0x416   : > { %v1166_v39 = vpop.permute.xlu0 %1165 }
 0x417   : > { %1176 = vst.msk [vmem:[#allocation2 + $0x30] sm:$0xff] %vm606_vm13, %v1166_v39  ;;  %v6803_v54 = vsel %vm600_vm14, %v1166_v39, %v1168_v5 }
 0x418   : > { %v6805_v15 = vpop.permute.xlu1 %1399  ;;  %v5668_v30 = vpack.c.bf16 %v1234_v59, %v6803_v54 }
 0x419   : > { %1430 = vst.msk [vmem:[#allocation3 + $0x130] sm:$0xff] %vm223_vm2, %v6805_v15 }
 0x41a   : > { %5669 = vmatprep.subr.bf16.mxu0 %v5668_v30  ;;  %v6871_v7 = vpop.permute.xlu0 %1343 }
 0x41b   : > { %v1187_v16 = vld [vmem:[#allocation2 + $0x40] sm:$0xff] }
 0x41c   : > { %1196 = vst.msk [vmem:[#allocation3 + $0x40] sm:$0xff] %vm223_vm2, %v1187_v16  ;;  %v6811_v11 = vpop.permute.xlu1 %1405 }
 0x41d   : > { %1433 = vst.msk [vmem:[#allocation3 + $0x148] sm:$0xff] %vm223_vm2, %v6811_v11 }
 0x41e   : > { %v1185_v47 = vld [vmem:[#allocation2 + $0x30] sm:$0xff]  ;;  %v6876_v62 = vpop.permute.xlu0 %1341 }
 0x41f   : > { %1287 = vrot.lane.b32.xlu0 %v1185_v47, %s6157_s22  ;;  %1227 = vrot.lane.b32.xlu1 %v1185_v47, %s6156_s21  ;;  %v5670_v17 = vpack.c.bf16 %v1233_v26, %v1185_v47 }
 0x420   : > { %v6820_v27 = vpop.permute.xlu1 %1401 }
 0x421   : > { %5671 = vmatpush1.bf16.msra.mxu0 %v5670_v17  ;;  %v1294_v17 = vsel %vm258_vm6, %v6782_v46, %v6682_v61 }
 0x422   : > { %v6884_v3 = vpop.permute.xlu0 %1397 }
 0x423   : > { %1407 = vrot.lane.b32.xlu0 %v1185_v47, %s6159_s24  ;;  %1347 = vrot.lane.b32.xlu1 %v1185_v47, %s6158_s23  ;;  %v1688_v56 = vld [vmem:[#allocation3 + $0x40] sm:$0xff] }
 0x424   : > { %v5720_v60 = vpack.c.bf16 %v1691_v31, %v1688_v56  ;;  %v6824_v19 = vpop.permute.xlu1 %1459  ;;  %v1235_v56 = vsel %vm237_vm5, %v6780_v42, %v6788_v45  ;;  %v1293_v42 = vsel %vm258_vm6, %v6784_v24, %v6782_v46  ;;  %v1353_v46 = vsel %vm279_vm4, %v6705_v41, %v6786_v63 }
 0x425   : > { %1490 = vst.msk [vmem:[#allocation3 + $0x178] sm:$0xff] %vm223_vm2, %v6824_v19 }
 0x426   : > { %5721 = vmatpush1.bf16.msra.mxu1 %v5720_v60  ;;  %v6889_v21 = vpop.permute.xlu0 %1403 }
 0x427   : > { %1527 = vrot.lane.b32.xlu0 %v1185_v47, %s6161_s26  ;;  %1467 = vrot.lane.b32.xlu1 %v1185_v47, %s6160_s25 }
 0x428   : > { %v6830_v6 = vpop.permute.xlu1 %1455  ;;  %5722 = vmatprep.subr.bf16.mxu1 %v6155_v4 }
 0x42a   : > { %v6902_v51 = vpop.permute.xlu0 %1395 }
 0x42b   : > { %1231 = vrot.lane.b32.xlu1 %v1187_v16, %s6156_s21  ;;  %1229 = vrot.lane.b32.xlu0 %v6803_v54, %s6156_s21 }
 0x42c   : > { %v6836_v12 = vpop.permute.xlu1 %1465 }
 0x42d   : > { %1493 = vst.msk [vmem:[#allocation3 + $0x190] sm:$0xff] %vm223_vm2, %v6836_v12 }
 0x42e   : > { %v6912_v8 = vpop.permute.xlu0 %1457 }
 0x42f   : > { %1585 = vrot.lane.b32.xlu1 %v1562_v32, %s6162_s27  ;;  %1581 = vrot.lane.b32.xlu0 %v1560_v33, %s6162_s27 }
 0x430   : > { %v6842_v34 = vpop.permute.xlu1 %1519 }
 0x431   : > { %1550 = vst.msk [vmem:[#allocation3 + $0x1c0] sm:$0xff] %vm223_vm2, %v6842_v34 }
 0x432   : > { %v6915_v9 = vpop.permute.xlu0 %1463 }
 0x433   : > { %1291 = vrot.lane.b32.xlu1 %v1187_v16, %s6157_s22  ;;  %1289 = vrot.lane.b32.xlu0 %v6803_v54, %s6157_s22 }
 0x434   : > { %v6849_v48 = vpop.permute.xlu1 %1525 }
 0x435   : > { %1553 = vst.msk [vmem:[#allocation3 + $0x1d8] sm:$0xff] %vm223_vm2, %v6849_v48 }
 0x436   : > { %v6917_v23 = vpop.permute.xlu0 %1461 }
 0x437   : > { %1351 = vrot.lane.b32.xlu1 %v1187_v16, %s6158_s23  ;;  %1349 = vrot.lane.b32.xlu0 %v6803_v54, %s6158_s23 }
 0x438   : > { %v6856_v13 = vpop.permute.xlu1 %1521 }
 0x43a   : > { %v6919_v53 = vpop.permute.xlu0 %1517 }
 0x43b   : > { %1587 = vrot.lane.b32.xlu1 %v1185_v47, %s6162_s27  ;;  %1637 = vrot.lane.b32.xlu0 %v6736_v50, %s6164_s28 }
 0x43c   : > { %v6861_v44 = vpop.permute.xlu1 %1579 }
 0x43d   : > { %1610 = vst.msk [vmem:[#allocation3 + $0x208] sm:$0xff] %vm223_vm2, %v6861_v44 }
 0x43e   : > { %v6921_v55 = vpop.permute.xlu0 %1523 }
 0x43f   : > { %1411 = vrot.lane.b32.xlu1 %v1187_v16, %s6159_s24  ;;  %1409 = vrot.lane.b32.xlu0 %v6803_v54, %s6159_s24 }
 0x440   : > { %v6927_v14 = vpop.permute.xlu1 %1575 }
 0x442   : > { %v6923_v5 = vpop.permute.xlu0 %1515 }
 0x443   : > { %1471 = vrot.lane.b32.xlu1 %v1187_v16, %s6160_s25  ;;  %1469 = vrot.lane.b32.xlu0 %v6803_v54, %s6160_s25 }
 0x446   : > { %v6925_v25 = vpop.permute.xlu0 %1577 }
 0x447   : > { %1639 = vrot.lane.b32.xlu1 %v6725_v52, %s6164_s28  ;;  %1643 = vrot.lane.b32.xlu0 %v1621_v35, %s6164_s28 }
 0x44a   : > { %v6929_v39 = vpop.permute.xlu0 %1583 }
 0x44b   : > { %1531 = vrot.lane.b32.xlu1 %v1187_v16, %s6161_s26  ;;  %1529 = vrot.lane.b32.xlu0 %v6803_v54, %s6161_s26 }
 0x44f   : > { %1591 = vrot.lane.b32.xlu1 %v1187_v16, %s6162_s27  ;;  %1589 = vrot.lane.b32.xlu0 %v6803_v54, %s6162_s27 }
 0x453   : > { %1645 = vrot.lane.b32.xlu1 %v1562_v32, %s6164_s28  ;;  %1635 = vrot.lane.b32.xlu0 %v6744_v58, %s6164_s28  ;;  %v1236_v32 = vsel %vm237_vm5, %v6788_v45, %v6707_v37  ;;  %v1295_v37 = vsel %vm258_vm6, %v6692_v36, %v6790_v10 }
 0x457   : > { %1641 = vrot.lane.b32.xlu1 %v1560_v33, %s6164_s28  ;;  %1649 = vrot.lane.b32.xlu0 %v6803_v54, %s6164_s28  ;;  %v1296_v33 = vsel %vm258_vm6, %v6790_v10, %v6711_v38  ;;  %v1354_v10 = vsel %vm279_vm4, %v6786_v63, %v6700_v18  ;;  %v1355_v18 = vsel %vm279_vm4, %v6876_v62, %v6871_v7 }
 0x458   : > { %v5676_v38 = vpack.c.bf16 %v1296_v33, %v1294_v17  ;;  %v1703_v33 = vld [vmem:[#allocation3 + $0xb8] sm:$0xff] }
 0x45b   : > { %1651 = vrot.lane.b32.xlu1 %v1187_v16, %s6164_s28  ;;  %1647 = vrot.lane.b32.xlu0 %v1185_v47, %s6164_s28 }
 0x45f   : > { %1773 = vrot.lane.b32.xlu1 %v1678_v40, %s6168_s30  ;;  %1775 = vrot.lane.b32.xlu0 %v1679_v43, %s6168_s30 }
 0x463   : > { %1771 = vrot.lane.b32.xlu1 %v1677_v22, %s6168_s30  ;;  %1765 = vperm.xlu0 %6143, %v5445_v49   ;;  %v5678_v49 = vpack.c.bf16 %v1295_v37, %v1293_v42  ;;  %v1416_v42 = vsel %vm300_vm7, %v6889_v21, %v6811_v11 }
 0x491   : > { %v1288_v59 = vpop.permute.xlu0 %1287  ;;  %v1228_v54 = vpop.permute.xlu1 %1227 }
 0x495   : > { %v6931_v30 = vpop.permute.xlu0 %1407  ;;  %v1348_v16 = vpop.permute.xlu1 %1347 }
 0x499   : > { %v6933_v26 = vpop.permute.xlu0 %1527  ;;  %v6935_v47 = vpop.permute.xlu1 %1467 }
 0x49d   : > { %v1230_v31 = vpop.permute.xlu0 %1229  ;;  %v1232_v60 = vpop.permute.xlu1 %1231 }
 0x49e   : > { %v1237_v35 = vsel %vm237_vm5, %v1228_v54, %v1230_v31  ;;  %v1238_v40 = vsel %vm237_vm5, %v1230_v31, %v1232_v60  ;;  %1256 = vst.msk [vmem:[#allocation3 + $0x88] sm:$0xff] %vm223_vm2, %v1232_v60 }
 0x49f   : > { %v5672_v61 = vpack.c.bf16 %v1238_v40, %v1236_v32  ;;  %v5674_v43 = vpack.c.bf16 %v1237_v35, %v1235_v56  ;;  %v1694_v56 = vld [vmem:[#allocation3 + $0x70] sm:$0xff]  ;;  %v1700_v32 = vld [vmem:[#allocation3 + $0xa0] sm:$0xff]  ;;  %v1356_v40 = vsel %vm279_vm4, %v6871_v7, %v6794_v57 }
 0x4a1   : > { %v6958_v45 = vpop.permute.xlu0 %1581  ;;  %v6960_v22 = vpop.permute.xlu1 %1585  ;;  %5673 = vmatprep.subr.bf16.mxu0 %v5672_v61  ;;  %v5726_v61 = vpack.c.bf16 %v1703_v33, %v1700_v32  ;;  %v1718_v32 = vld [vmem:[#allocation3 + $0x130] sm:$0xff] }
 0x4a2   : > { %1613 = vst.msk [vmem:[#allocation3 + $0x220] sm:$0xff] %vm223_vm2, %v6960_v22  ;;  %5675 = vmatpush1.bf16.msra.mxu0 %v5674_v43  ;;  %v1414_v43 = vsel %vm300_vm7, %v6884_v3, %v6805_v15 }
 0x4a3   : > { %5677 = vmatprep.subr.bf16.mxu0 %v5676_v38  ;;  %v1413_v38 = vsel %vm300_vm7, %v6902_v51, %v6884_v3  ;;  %v1474_v3 = vsel %vm321_vm8, %v6912_v8, %v6824_v19  ;;  %v1721_v19 = vld [vmem:[#allocation3 + $0x148] sm:$0xff] }
 0x4a5   : > { %v1290_v24 = vpop.permute.xlu0 %1289  ;;  %v1292_v54 = vpop.permute.xlu1 %1291  ;;  %v1697_v36 = vld [vmem:[#allocation3 + $0x88] sm:$0xff] }
 0x4a6   : > { %v1297_v17 = vsel %vm258_vm6, %v1288_v59, %v1290_v24  ;;  %v1298_v31 = vsel %vm258_vm6, %v1290_v24, %v1292_v54  ;;  %1316 = vst.msk [vmem:[#allocation3 + $0xd0] sm:$0xff] %vm223_vm2, %v1292_v54  ;;  %v5723_v60 = vpack.c.bf16 %v1697_v36, %v1694_v56  ;;  %5679 = vmatpush1.bf16.msra.mxu0 %v5678_v49 }
 0x4a7   : > { %v5680_v35 = vpack.c.bf16 %v1354_v10, %v1298_v31  ;;  %v5682_v41 = vpack.c.bf16 %v1353_v46, %v1297_v17  ;;  %v5688_v46 = vpack.c.bf16 %v1416_v42, %v1414_v43  ;;  %v1415_v54 = vsel %vm300_vm7, %v6820_v27, %v6889_v21  ;;  %v1712_v10 = vld [vmem:[#allocation3 + $0x100] sm:$0xff]  ;;  %v1727_v42 = vld [vmem:[#allocation3 + $0x178] sm:$0xff] }
 0x4a8   : > { %5724 = vmatpush1.bf16.msra.mxu1 %v5723_v60  ;;  %v5690_v56 = vpack.c.bf16 %v1415_v54, %v1413_v38  ;;  %v1473_v31 = vsel %vm321_vm8, %v6830_v6, %v6912_v8  ;;  %v1475_v6 = vsel %vm321_vm8, %v6917_v23, %v6915_v9  ;;  %v1730_v38 = vld [vmem:[#allocation3 + $0x190] sm:$0xff] }
 0x4a9   : > { %v1350_v63 = vpop.permute.xlu0 %1349  ;;  %v1352_v59 = vpop.permute.xlu1 %1351  ;;  %5725 = vmatprep.subr.bf16.mxu1 %v6155_v4  ;;  %5681 = vmatprep.subr.bf16.mxu0 %v5680_v35 }
 0x4aa   : > { %v1357_v57 = vsel %vm279_vm4, %v1348_v16, %v1350_v63  ;;  %v1358_v37 = vsel %vm279_vm4, %v1350_v63, %v1352_v59  ;;  %1376 = vst.msk [vmem:[#allocation3 + $0x118] sm:$0xff] %vm223_vm2, %v1352_v59  ;;  %5683 = vmatpush1.bf16.msra.mxu0 %v5682_v41  ;;  %v1709_v16 = vld [vmem:[#allocation3 + $0xe8] sm:$0xff]  ;;  %v1476_v41 = vsel %vm321_vm8, %v6915_v9, %v6836_v12 }
 0x4ab   : > { %v5684_v7 = vpack.c.bf16 %v1358_v37, %v1356_v40  ;;  %v5686_v62 = vpack.c.bf16 %v1357_v57, %v1355_v18  ;;  %v5735_v40 = vpack.c.bf16 %v1721_v19, %v1718_v32  ;;  %v1534_v18 = vsel %vm342_vm9, %v6919_v53, %v6842_v34 }
 0x4ac   : > { %5727 = vmatpush1.bf16.msra.mxu1 %v5726_v61  ;;  %v1536_v63 = vsel %vm342_vm9, %v6921_v55, %v6849_v48  ;;  %v1533_v61 = vsel %vm342_vm9, %v6923_v5, %v6919_v53  ;;  %v1535_v37 = vsel %vm342_vm9, %v6856_v13, %v6921_v55  ;;  %v1594_v5 = vsel %vm363_vm10, %v6925_v25, %v6861_v44  ;;  %v1739_v44 = vld [vmem:[#allocation3 + $0x1d8] sm:$0xff] }
 0x4ad   : > { %v6992_v49 = vpop.permute.xlu0 %1637  ;;  %v6994_v15 = vpop.permute.xlu1 %1587  ;;  %5728 = vmatprep.subr.bf16.mxu1 %v6155_v4  ;;  %v1706_v11 = vld [vmem:[#allocation3 + $0xd0] sm:$0xff]  ;;  %5685 = vmatprep.subr.bf16.mxu0 %v5684_v7  ;;  %v5702_v53 = vpack.c.bf16 %v1535_v37, %v1533_v61 }
 0x4ae   : > { %v5729_v24 = vpack.c.bf16 %v1709_v16, %v1706_v11  ;;  %5687 = vmatpush1.bf16.msra.mxu0 %v5686_v62  ;;  %v1593_v16 = vsel %vm363_vm10, %v6927_v14, %v6925_v25  ;;  %v1595_v25 = vsel %vm363_vm10, %v6958_v45, %v6929_v39  ;;  %v1596_v14 = vsel %vm363_vm10, %v6929_v39, %v6960_v22 }
 0x4af   : > { %5689 = vmatprep.subr.bf16.mxu0 %v5688_v46 }
 0x4b0   : > { %5730 = vmatpush1.bf16.msra.mxu1 %v5729_v24  ;;  %v1736_v24 = vld [vmem:[#allocation3 + $0x1c0] sm:$0xff] }
 0x4b1   : > { %v1410_v51 = vpop.permute.xlu0 %1409  ;;  %v1412_v36 = vpop.permute.xlu1 %1411  ;;  %5731 = vmatprep.subr.bf16.mxu1 %v6155_v4  ;;  %v1715_v17 = vld [vmem:[#allocation3 + $0x118] sm:$0xff] }
 0x4b2   : > { %v1417_v27 = vsel %vm300_vm7, %v6931_v30, %v1410_v51  ;;  %v1418_v21 = vsel %vm300_vm7, %v1410_v51, %v1412_v36  ;;  %1436 = vst.msk [vmem:[#allocation3 + $0x160] sm:$0xff] %vm223_vm2, %v1412_v36  ;;  %v5732_v60 = vpack.c.bf16 %v1715_v17, %v1712_v10  ;;  %5691 = vmatpush1.bf16.msra.mxu0 %v5690_v56 }
 0x4b3   : > { %v5692_v33 = vpack.c.bf16 %v1474_v3, %v1418_v21  ;;  %v5694_v35 = vpack.c.bf16 %v1473_v31, %v1417_v27  ;;  %v5744_v36 = vpack.c.bf16 %v1739_v44, %v1736_v24 }
 0x4b4   : > { %5733 = vmatpush1.bf16.msra.mxu1 %v5732_v60  ;;  %v1745_v60 = vld [vmem:[#allocation3 + $0x208] sm:$0xff] }
 0x4b5   : > { %v1470_v8 = vpop.permute.xlu0 %1469  ;;  %v1472_v30 = vpop.permute.xlu1 %1471  ;;  %5734 = vmatprep.subr.bf16.mxu1 %v6155_v4  ;;  %5693 = vmatprep.subr.bf16.mxu0 %v5692_v33 }
 0x4b6   : > { %v1477_v12 = vsel %vm321_vm8, %v6935_v47, %v1470_v8  ;;  %v1478_v59 = vsel %vm321_vm8, %v1470_v8, %v1472_v30  ;;  %1496 = vst.msk [vmem:[#allocation3 + $0x1a8] sm:$0xff] %vm223_vm2, %v1472_v30  ;;  %5695 = vmatpush1.bf16.msra.mxu0 %v5694_v35  ;;  %v5700_v47 = vpack.c.bf16 %v1536_v63, %v1534_v18  ;;  %v1748_v35 = vld [vmem:[#allocation3 + $0x220] sm:$0xff] }
 0x4b7   : > { %v5696_v9 = vpack.c.bf16 %v1478_v59, %v1476_v41  ;;  %v5698_v23 = vpack.c.bf16 %v1477_v12, %v1475_v6 }
 0x4b8   : > { %5736 = vmatpush1.bf16.msra.mxu1 %v5735_v40 }
 0x4b9   : > { %v7031_v34 = vpop.permute.xlu0 %1643  ;;  %v1640_v43 = vpop.permute.xlu1 %1639  ;;  %5737 = vmatprep.subr.bf16.mxu1 %v6155_v4  ;;  %v1724_v48 = vld [vmem:[#allocation3 + $0x160] sm:$0xff]  ;;  %5697 = vmatprep.subr.bf16.mxu0 %v5696_v9 }
 0x4ba   : > { %1670 = vst.msk [vmem:[#allocation3 + $0x250] sm:$0xff] %vm223_vm2, %v1640_v43  ;;  %v5738_v57 = vpack.c.bf16 %v1727_v42, %v1724_v48  ;;  %5699 = vmatpush1.bf16.msra.mxu0 %v5698_v23  ;;  %v1654_v39 = vsel %vm384_vm11, %v6992_v49, %v1640_v43 }
 0x4bb   : > { %5701 = vmatprep.subr.bf16.mxu0 %v5700_v47 }
 0x4bc   : > { %5739 = vmatpush1.bf16.msra.mxu1 %v5738_v57 }
 0x4bd   : > { %v1530_v7 = vpop.permute.xlu0 %1529  ;;  %v1532_v62 = vpop.permute.xlu1 %1531  ;;  %5740 = vmatprep.subr.bf16.mxu1 %v6155_v4  ;;  %v1733_v11 = vld [vmem:[#allocation3 + $0x1a8] sm:$0xff] }
 0x4be   : > { %v1537_v13 = vsel %vm342_vm9, %v6933_v26, %v1530_v7  ;;  %v1538_v55 = vsel %vm342_vm9, %v1530_v7, %v1532_v62  ;;  %1556 = vst.msk [vmem:[#allocation3 + $0x1f0] sm:$0xff] %vm223_vm2, %v1532_v62  ;;  %v5741_v46 = vpack.c.bf16 %v1733_v11, %v1730_v38  ;;  %5703 = vmatpush1.bf16.msra.mxu0 %v5702_v53 }
 0x4bf   : > { %v5704_v54 = vpack.c.bf16 %v1594_v5, %v1538_v55  ;;  %v5706_v56 = vpack.c.bf16 %v1593_v16, %v1537_v13 }
 0x4c0   : > { %5742 = vmatpush1.bf16.msra.mxu1 %v5741_v46 }
 0x4c1   : > { %v1590_v3 = vpop.permute.xlu0 %1589  ;;  %v1592_v51 = vpop.permute.xlu1 %1591  ;;  %5743 = vmatprep.subr.bf16.mxu1 %v6155_v4  ;;  %5705 = vmatprep.subr.bf16.mxu0 %v5704_v54  ;;  %v1754_v12 = vld [vmem:[#allocation3 + $0x250] sm:$0xff] }
 0x4c2   : > { %v1597_v26 = vsel %vm363_vm10, %v6994_v15, %v1590_v3  ;;  %v1598_v10 = vsel %vm363_vm10, %v1590_v3, %v1592_v51  ;;  %1616 = vst.msk [vmem:[#allocation3 + $0x238] sm:$0xff] %vm223_vm2, %v1592_v51  ;;  %5707 = vmatpush1.bf16.msra.mxu0 %v5706_v56 }
 0x4c3   : > { %v5708_v17 = vpack.c.bf16 %v1598_v10, %v1596_v14  ;;  %v5710_v31 = vpack.c.bf16 %v1597_v26, %v1595_v25 }
 0x4c4   : > { %5745 = vmatpush1.bf16.msra.mxu1 %v5744_v36 }
 0x4c5   : > { %v1636_v27 = vpop.permute.xlu0 %1635  ;;  %v1646_v21 = vpop.permute.xlu1 %1645  ;;  %5746 = vmatprep.subr.bf16.mxu1 %v6155_v4  ;;  %v1742_v45 = vld [vmem:[#allocation3 + $0x1f0] sm:$0xff]  ;;  %5709 = vmatprep.subr.bf16.mxu0 %v5708_v17 }
 0x4c6   : > { %v1656_v22 = vsel %vm384_vm11, %v7031_v34, %v1646_v21  ;;  %1673 = vst.msk [vmem:[#allocation3 + $0x268] sm:$0xff] %vm223_vm2, %v1646_v21  ;;  %v5747_v15 = vpack.c.bf16 %v1745_v60, %v1742_v45  ;;  %5711 = vmatpush1.bf16.msra.mxu0 %v5710_v31  ;;  %v1653_v6 = vsel %vm384_vm11, %v1636_v27, %v6992_v49  ;;  %v5449_v17 = vld [vmem:[%s8806_s2 + $0x18] sm:$0xff] }
 0x4c7   : > { %v5712_v32 = vpack.c.bf16 %v1656_v22, %v1654_v39 }
 0x4c8   : > { %5748 = vmatpush1.bf16.msra.mxu1 %v5747_v15 }
 0x4c9   : > { %v1650_v19 = vpop.permute.xlu0 %1649  ;;  %v1642_v33 = vpop.permute.xlu1 %1641  ;;  %5749 = vmatprep.subr.bf16.mxu1 %v6155_v4  ;;  %v1751_v41 = vld [vmem:[#allocation3 + $0x238] sm:$0xff]  ;;  %5713 = vmatprep.subr.bf16.mxu0 %v5712_v32 }
 0x4ca   : > { %v1655_v8 = vsel %vm384_vm11, %v1642_v33, %v7031_v34  ;;  %v5750_v30 = vpack.c.bf16 %v1751_v41, %v1748_v35 }
 0x4cb   : > { %v5714_v40 = vpack.c.bf16 %v1655_v8, %v1653_v6 }
 0x4cc   : > { %5751 = vmatpush1.bf16.msra.mxu1 %v5750_v30 }
 0x4cd   : > { %v1648_v18 = vpop.permute.xlu0 %1647  ;;  %v1652_v63 = vpop.permute.xlu1 %1651  ;;  %5752 = vmatprep.subr.bf16.mxu1 %v6155_v4  ;;  %v1757_v59 = vld [vmem:[#allocation3 + $0x268] sm:$0xff]  ;;  %5715 = vmatpush1.bf16.msra.mxu0 %v5714_v40 }
 0x4ce   : > { %v1658_v9 = vsel %vm384_vm11, %v1650_v19, %v1652_v63  ;;  %1676 = vst.msk [vmem:[#allocation3 + $0x280] sm:$0xff] %vm223_vm2, %v1652_v63  ;;  %v5753_v23 = vpack.c.bf16 %v1757_v59, %v1754_v12  ;;  %v1657_v49 = vsel %vm384_vm11, %v1648_v18, %v1650_v19 }
 0x4cf   : > { %1836 = vmatprep.subr.mxu0 %v1658_v9 }
 0x4d0   : > { %5754 = vmatpush1.bf16.msra.mxu1 %v5753_v23 }
 0x4d1   : > { %v1774_v61 = vpop.permute.xlu1 %1773  ;;  %v1776_v34 = vpop.permute.xlu0 %1775  ;;  %1907 = vmatprep.subr.mxu1 %v6154_v0  ;;  %1837 = vmatpush1.msra.mxu0 %v1657_v49 }
 0x4d2   : > { %v1779_v43 = vsel %vm1777_vm1, %v1774_v61, %v1776_v34 }
 0x4d3   : > { %5446 = vmatprep.mubr.msk.f32.mxu0 %vm8814_vm0, %v1779_v43  ;;  %5447 = vmatprep.mubr.msk.f32.mxu1 %vm8814_vm0, %v1779_v43  ;;  %vm8817_vm0 = vcmask 457728  }
 0x4d5   : > { %v1772_v48 = vpop.permute.xlu1 %1771  ;;  %v1760_v42 = vld [vmem:[#allocation3 + $0x280] sm:$0xff] }
 0x4d6   : > { %v1778_v47 = vsel %vm1777_vm1, %v1772_v48, %v1774_v61  ;;  %1908 = vmatpush1.msra.mxu1 %v1760_v42 }
 0x4d7   : > { %1920 = vmatmul.mubr.f32.vlgmr.msra.gmra.mrb[4].mxu1 %v1778_v47  ;;  %1849 = vmatmul.mubr.f32.vlgmr.msra.gmra.mrb[4].mxu0 %v1778_v47 }
 0x4d8   : > { %5771 = vmatprep.subr.bf16.mxu1 %v6155_v4  ;;  %5549 = vmatprep.mubr.msk.f32.mxu1 %vm8813_vm3, %v6154_v0 }
 0x4d9   : > { %2223 = vmatprep.mubr.f32.mxu0 %v6154_v0 }
 0x4e2   : > { %v1766_v57 = vpop.permute.xlu0 %1765 }
 0x5aa   : > { %v1921_v37 = vpop.f32.mrb[4].mxu1  ;;  %v1850_v53 = vpop.f32.mrb[4].mxu0 }
 0x5ab   : > { %v1922_v5 = vadd.f32 %v1921_v37, %v1766_v57  ;;  %v1923_v7 = vpop.f32.mrb[5].mxu1  ;;  %v1851_v62 = vadd.f32 %v1850_v53, %v1766_v57  ;;  %v1852_v38 = vpop.f32.mrb[5].mxu0 }
 0x5ac   : > { %v1853_v11 = vadd.f32 %v1852_v38, %v1766_v57 }
 0x5ad   : > { %v1925_v16 = vmul.f32 %v1851_v62, %v6335_v20  ;;  %v1927_v55 = vmul.f32 %v1922_v5, %v6340_v29 }
 0x5ae   : > { %v1926_v13 = vmul.f32 %v1853_v11, %v6338_v28 }
 0x5af   : > { %v1931_v46 = vmul.f32 0.2, %v1925_v16  ;;  %v1933_v44 = vmul.f32 0.2, %v1927_v55 }
 0x5b0   : > { %v1932_v24 = vmul.f32 0.2, %v1926_v13 }
 0x5b1   : > { %1937 = vrot.lane.b32.xlu1 %v1931_v46, %s6166_s9 }
 0x5b2   : > { %1939 = vrot.lane.b32.xlu0 %v1932_v24, %s6166_s9 }
 0x5b5   : > { %1941 = vrot.lane.b32.xlu1 %v1933_v44, %s6166_s9 }
 0x623   : > { %v1938_v54 = vpop.permute.xlu1 %1937 }
 0x624   : > { %v1948_v56 = vadd.f32 %v1938_v54, %v6744_v58  ;;  %v1940_v3 = vpop.permute.xlu0 %1939 }
 0x625   : > { %v1943_v51 = vsel %vm600_vm14, %v1938_v54, %v1940_v3 }
 0x626   : > { %1951 = vst.msk [vmem:[#allocation2] sm:$0xff] %vm606_vm13, %v1948_v56  ;;  %v7094_v36 = vadd.f32 %v1943_v51, %v6736_v50 }
 0x627   : > { %v1942_v25 = vpop.permute.xlu1 %1941 }
 0x628   : > { %1952 = vst [vmem:[#allocation2 + $0x8] sm:$0xff] %v7094_v36  ;;  %v1944_v14 = vsel %vm600_vm14, %v1940_v3, %v1942_v25 }
 0x629   : > { %v1950_v26 = vadd.f32 %v1944_v14, %v6725_v52 }
 0x62b   : > { %1953 = vst.msk [vmem:[#allocation2 + $0x10] sm:$0xff] %vm609_vm15, %v1950_v26 }
 0x62d   : > { %v7100_v10 = vld [vmem:[#allocation2] sm:$0xff] }
 0x62e   : > { %1986 = vrot.lane.b32.xlu1 %v7100_v10, %s6157_s22  ;;  %1966 = vrot.lane.b32.xlu0 %v7100_v10, %s6156_s21 }
 0x632   : > { %2026 = vrot.lane.b32.xlu1 %v7100_v10, %s6159_s24  ;;  %2006 = vrot.lane.b32.xlu0 %v7100_v10, %s6158_s23  ;;  %v7110_v50 = vld [vmem:[#allocation2 + $0x10] sm:$0xff] }
 0x633   : > { %1959 = vst.msk [vmem:[#allocation3 + $0x10] sm:$0xff] %vm223_vm2, %v7110_v50 }
 0x636   : > { %2066 = vrot.lane.b32.xlu1 %v7100_v10, %s6161_s26  ;;  %2046 = vrot.lane.b32.xlu0 %v7100_v10, %s6160_s25 }
 0x63a   : > { %1968 = vrot.lane.b32.xlu0 %v7094_v36, %s6156_s21  ;;  %1970 = vrot.lane.b32.xlu1 %v7110_v50, %s6156_s21  ;;  %v2124_v52 = vld [vmem:[#allocation3 + $0x10] sm:$0xff] }
 0x63b   : > { %2328 = vst.msk [vmem:[#allocation3 + $0x10] sm:$0xff] %vm223_vm2, %v7110_v50 }
 0x63e   : > { %1990 = vrot.lane.b32.xlu0 %v7110_v50, %s6157_s22  ;;  %1988 = vrot.lane.b32.xlu1 %v7094_v36, %s6157_s22 }
 0x642   : > { %2010 = vrot.lane.b32.xlu0 %v7110_v50, %s6158_s23  ;;  %2008 = vrot.lane.b32.xlu1 %v7094_v36, %s6158_s23  ;;  %v7132_v58 = vld [vmem:[#allocation3 + $0x10] sm:$0xff] }
 0x643   : > { %2897 = vst.msk [vmem:[#allocation3 + $0x10] sm:$0xff] %vm223_vm2, %v7110_v50 }
 0x646   : > { %2030 = vrot.lane.b32.xlu0 %v7110_v50, %s6159_s24  ;;  %2028 = vrot.lane.b32.xlu1 %v7094_v36, %s6159_s24 }
 0x64a   : > { %2050 = vrot.lane.b32.xlu0 %v7110_v50, %s6160_s25  ;;  %2048 = vrot.lane.b32.xlu1 %v7094_v36, %s6160_s25 }
 0x64e   : > { %2070 = vrot.lane.b32.xlu0 %v7110_v50, %s6161_s26  ;;  %2068 = vrot.lane.b32.xlu1 %v7094_v36, %s6161_s26 }
 0x652   : > { %2090 = vrot.lane.b32.xlu0 %v7110_v50, %s6162_s27  ;;  %2088 = vrot.lane.b32.xlu1 %v7094_v36, %s6162_s27 }
 0x656   : > { %2086 = vrot.lane.b32.xlu0 %v7100_v10, %s6162_s27  ;;  %2108 = vrot.lane.b32.xlu1 %v7094_v36, %s6164_s28 }
 0x65a   : > { %2110 = vrot.lane.b32.xlu0 %v7110_v50, %s6164_s28  ;;  %2106 = vrot.lane.b32.xlu1 %v7100_v10, %s6164_s28 }
 0x65e   : > { %2153 = vperm.xlu0 %6143, %v5449_v17  }
 0x6a0   : > { %v1967_v31 = vpop.permute.xlu0 %1966  ;;  %v1987_v27 = vpop.permute.xlu1 %1986 }
 0x6a4   : > { %v2007_v21 = vpop.permute.xlu0 %2006  ;;  %v2027_v45 = vpop.permute.xlu1 %2026 }
 0x6a8   : > { %v2047_v60 = vpop.permute.xlu0 %2046  ;;  %v7163_v39 = vpop.permute.xlu1 %2066 }
 0x6ac   : > { %v1969_v22 = vpop.permute.xlu0 %1968  ;;  %v1971_v15 = vpop.permute.xlu1 %1970 }
 0x6ad   : > { %v1972_v32 = vsel %vm237_vm5, %v1967_v31, %v1969_v22  ;;  %v1973_v19 = vsel %vm237_vm5, %v1969_v22, %v1971_v15  ;;  %1979 = vst.msk [vmem:[#allocation3 + $0x28] sm:$0xff] %vm223_vm2, %v1971_v15  ;;  %v7197_v22 = vld [vmem:[%s8805_s1 + $0x20] sm:$0xff] }
 0x6ae   : > { %v5755_v33 = vpack.c.bf16 %v1973_v19, %v7094_v36  ;;  %v5757_v35 = vpack.c.bf16 %v1972_v32, %v7100_v10 }
 0x6b0   : > { %v1991_v41 = vpop.permute.xlu0 %1990  ;;  %v1989_v6 = vpop.permute.xlu1 %1988  ;;  %5756 = vmatprep.subr.bf16.mxu0 %v5755_v33 }
 0x6b1   : > { %1999 = vst.msk [vmem:[#allocation3 + $0x40] sm:$0xff] %vm223_vm2, %v1991_v41  ;;  %5758 = vmatpush1.bf16.msra.mxu0 %v5757_v35  ;;  %v1992_v8 = vsel %vm258_vm6, %v1987_v27, %v1989_v6  ;;  %v1993_v63 = vsel %vm258_vm6, %v1989_v6, %v1991_v41 }
 0x6b4   : > { %v2011_v30 = vpop.permute.xlu0 %2010  ;;  %v2009_v40 = vpop.permute.xlu1 %2008  ;;  %v2127_v18 = vld [vmem:[#allocation3 + $0x28] sm:$0xff] }
 0x6b5   : > { %2019 = vst.msk [vmem:[#allocation3 + $0x58] sm:$0xff] %vm223_vm2, %v2011_v30  ;;  %v2012_v12 = vsel %vm279_vm4, %v2007_v21, %v2009_v40  ;;  %v2013_v59 = vsel %vm279_vm4, %v2009_v40, %v2011_v30  ;;  %v5772_v9 = vpack.c.bf16 %v2127_v18, %v2124_v52 }
 0x6b6   : > { %v5759_v23 = vpack.c.bf16 %v2013_v59, %v1993_v63  ;;  %v5761_v49 = vpack.c.bf16 %v2012_v12, %v1992_v8 }
 0x6b7   : > { %5773 = vmatpush3.bf16.msra.mxu1 %v5772_v9 }
 0x6b8   : > { %v2031_v61 = vpop.permute.xlu0 %2030  ;;  %v2029_v34 = vpop.permute.xlu1 %2028  ;;  %5774 = vmatprep.subr.bf16.mxu1 %v6155_v4  ;;  %5760 = vmatprep.subr.bf16.mxu0 %v5759_v23  ;;  %v2130_v47 = vld [vmem:[#allocation3 + $0x40] sm:$0xff] }
 0x6b9   : > { %2039 = vst.msk [vmem:[#allocation3 + $0x70] sm:$0xff] %vm223_vm2, %v2031_v61  ;;  %5762 = vmatpush1.bf16.msra.mxu0 %v5761_v49  ;;  %v2032_v43 = vsel %vm300_vm7, %v2027_v45, %v2029_v34  ;;  %v2033_v37 = vsel %vm300_vm7, %v2029_v34, %v2031_v61 }
 0x6bc   : > { %v2051_v48 = vpop.permute.xlu0 %2050  ;;  %v2049_v42 = vpop.permute.xlu1 %2048  ;;  %v2133_v57 = vld [vmem:[#allocation3 + $0x58] sm:$0xff] }
 0x6bd   : > { %2059 = vst.msk [vmem:[#allocation3 + $0x88] sm:$0xff] %vm223_vm2, %v2051_v48  ;;  %v2052_v53 = vsel %vm321_vm8, %v2047_v60, %v2049_v42  ;;  %v2053_v5 = vsel %vm321_vm8, %v2049_v42, %v2051_v48  ;;  %v5775_v7 = vpack.c.bf16 %v2133_v57, %v2130_v47 }
 0x6be   : > { %v5763_v62 = vpack.c.bf16 %v2053_v5, %v2033_v37  ;;  %v5765_v38 = vpack.c.bf16 %v2052_v53, %v2032_v43 }
 0x6bf   : > { %5776 = vmatpush3.bf16.msra.mxu1 %v5775_v7 }
 0x6c0   : > { %v2071_v11 = vpop.permute.xlu0 %2070  ;;  %v2069_v16 = vpop.permute.xlu1 %2068  ;;  %5777 = vmatprep.subr.bf16.mxu1 %v6155_v4  ;;  %5764 = vmatprep.subr.bf16.mxu0 %v5763_v62  ;;  %v2136_v46 = vld [vmem:[#allocation3 + $0x70] sm:$0xff] }
 0x6c1   : > { %2079 = vst.msk [vmem:[#allocation3 + $0xa0] sm:$0xff] %vm223_vm2, %v2071_v11  ;;  %5766 = vmatpush1.bf16.msra.mxu0 %v5765_v38  ;;  %v2073_v44 = vsel %vm342_vm9, %v2069_v16, %v2071_v11  ;;  %v2072_v14 = vsel %vm342_vm9, %v7163_v39, %v2069_v16 }
 0x6c4   : > { %v2091_v13 = vpop.permute.xlu0 %2090  ;;  %v2089_v55 = vpop.permute.xlu1 %2088  ;;  %v2139_v24 = vld [vmem:[#allocation3 + $0x88] sm:$0xff] }
 0x6c5   : > { %2099 = vst.msk [vmem:[#allocation3 + $0xb8] sm:$0xff] %vm223_vm2, %v2091_v13  ;;  %v2093_v54 = vsel %vm363_vm10, %v2089_v55, %v2091_v13  ;;  %v5778_v56 = vpack.c.bf16 %v2139_v24, %v2136_v46  ;;  %v5454_v13 = vld [vmem:[%s8806_s2 + $0x20] sm:$0xff] }
 0x6c6   : > { %v5767_v3 = vpack.c.bf16 %v2093_v54, %v2073_v44 }
 0x6c7   : > { %5779 = vmatpush3.bf16.msra.mxu1 %v5778_v56 }
 0x6c8   : > { %v2087_v51 = vpop.permute.xlu0 %2086  ;;  %v2109_v25 = vpop.permute.xlu1 %2108  ;;  %5780 = vmatprep.subr.bf16.mxu1 %v6155_v4  ;;  %5768 = vmatprep.subr.bf16.mxu0 %v5767_v3  ;;  %v2142_v27 = vld [vmem:[#allocation3 + $0xa0] sm:$0xff] }
 0x6c9   : > { %v2092_v26 = vsel %vm363_vm10, %v2087_v51, %v2089_v55  ;;  %v7403_v3 = vld [vmem:[%s8805_s1 + $0x28] sm:$0xff] }
 0x6ca   : > { %v5769_v52 = vpack.c.bf16 %v2092_v26, %v2072_v14 }
 0x6cc   : > { %v2111_v17 = vpop.permute.xlu0 %2110  ;;  %v2107_v31 = vpop.permute.xlu1 %2106  ;;  %v2145_v21 = vld [vmem:[#allocation3 + $0xb8] sm:$0xff]  ;;  %5770 = vmatpush1.bf16.msra.mxu0 %v5769_v52 }
 0x6cd   : > { %v2113_v45 = vsel %vm384_vm11, %v2109_v25, %v2111_v17  ;;  %2119 = vst.msk [vmem:[#allocation3 + $0xd0] sm:$0xff] %vm223_vm2, %v2111_v17  ;;  %v5781_v60 = vpack.c.bf16 %v2145_v21, %v2142_v27  ;;  %v2112_v39 = vsel %vm384_vm11, %v2107_v31, %v2109_v25 }
 0x6ce   : > { %2175 = vmatprep.subr.mxu0 %v2113_v45 }
 0x6cf   : > { %5782 = vmatpush3.bf16.msra.mxu1 %v5781_v60 }
 0x6d0   : > { %5547 = vmatprep.subr.mxu1 %v6154_v0  ;;  %2176 = vmatpush1.msra.mxu0 %v2112_v39 }
 0x6d1   : > { %5450 = vmatmul.mubr.msk.f32.vlgmr.msra.gmra.mrb[6].mxu0 %vm8812_vm12, %v7197_v22 }
 0x6d4   : > { %v2148_v15 = vld [vmem:[#allocation3 + $0xd0] sm:$0xff] }
 0x6d5   : > { %5548 = vmatpush3.msra.mxu1 %v2148_v15 }
 0x6d6   : > { %5550 = vmatmul.mubr.msk.f32.vlgmr.msra.gmra.mrb[6].mxu1 %vm8812_vm12, %v7197_v22  ;;  %5819 = vmatprep.subr.bf16.mxu1 %v6155_v4  ;;  %vm8815_vm12 = vcmask 130048  }
 0x6d7   : > { %vm8816_vm3 = vmmov %vm8815_vm12 }
 0x6dd   : > { %v2154_v19 = vpop.permute.xlu0 %2153 }
 0x7a4   : > { %v2225_v32 = vpop.f32.mrb[6].mxu0 }
 0x7a5   : > { %v2227_v33 = vpop.f32.mrb[7].mxu0  ;;  %v2226_v18 = vadd.f32 %v2225_v32, %v2154_v19 }
 0x7a6   : > { %v2228_v35 = vadd.f32 %v2227_v33, %v2154_v19 }
 0x7a7   : > { %v2300_v63 = vmul.f32 %v2226_v18, %v6335_v20 }
 0x7a8   : > { %v2301_v41 = vmul.f32 %v2228_v35, %v6338_v28 }
 0x7a9   : > { %v2296_v6 = vpop.f32.mrb[6].mxu1 }
 0x7aa   : > { %v2297_v8 = vadd.f32 %v2296_v6, %v2154_v19  ;;  %v5551_v30 = vpop.f32.mrb[7].mxu1  ;;  %2308 = vrot.lane.b32.xlu0 %v2301_v41, %s6166_s9 }
 0x7ac   : > { %v2302_v40 = vmul.f32 %v2297_v8, %v6340_v29 }
 0x7ae   : > { %2310 = vrot.lane.b32.xlu1 %v2302_v40, %s6166_s9  ;;  %2346 = vrot.lane.b32.xlu0 %v7094_v36, %s6156_s21 }
 0x7b2   : > { %2306 = vrot.lane.b32.xlu1 %v2300_v63, %s6166_s9  ;;  %2344 = vrot.lane.b32.xlu0 %v7100_v10, %s6156_s21 }
 0x7b6   : > { %2348 = vrot.lane.b32.xlu1 %v7110_v50, %s6156_s21  ;;  %2386 = vrot.lane.b32.xlu0 %v7094_v36, %s6157_s22 }
 0x7ba   : > { %2388 = vrot.lane.b32.xlu1 %v7110_v50, %s6157_s22  ;;  %2384 = vrot.lane.b32.xlu0 %v7100_v10, %s6157_s22 }
 0x7be   : > { %2428 = vrot.lane.b32.xlu1 %v7110_v50, %s6158_s23  ;;  %2426 = vrot.lane.b32.xlu0 %v7094_v36, %s6158_s23 }
 0x7c2   : > { %2468 = vrot.lane.b32.xlu1 %v7110_v50, %s6159_s24  ;;  %2424 = vrot.lane.b32.xlu0 %v7100_v10, %s6158_s23 }
 0x7c6   : > { %2508 = vrot.lane.b32.xlu1 %v7110_v50, %s6160_s25  ;;  %2466 = vrot.lane.b32.xlu0 %v7094_v36, %s6159_s24 }
 0x7ca   : > { %2548 = vrot.lane.b32.xlu1 %v7110_v50, %s6161_s26  ;;  %2464 = vrot.lane.b32.xlu0 %v7100_v10, %s6159_s24 }
 0x7ce   : > { %2588 = vrot.lane.b32.xlu1 %v7110_v50, %s6162_s27  ;;  %2506 = vrot.lane.b32.xlu0 %v7094_v36, %s6160_s25 }
 0x7d2   : > { %2628 = vrot.lane.b32.xlu1 %v7110_v50, %s6164_s28  ;;  %2504 = vrot.lane.b32.xlu0 %v7100_v10, %s6160_s25 }
 0x7d6   : > { %2546 = vrot.lane.b32.xlu0 %v7094_v36, %s6161_s26 }
 0x7da   : > { %2544 = vrot.lane.b32.xlu0 %v7100_v10, %s6161_s26 }
 0x7de   : > { %2586 = vrot.lane.b32.xlu0 %v7094_v36, %s6162_s27 }
 0x7e2   : > { %2584 = vrot.lane.b32.xlu0 %v7100_v10, %s6162_s27 }
 0x7e6   : > { %2626 = vrot.lane.b32.xlu0 %v7094_v36, %s6164_s28 }
 0x81c   : > { %v2309_v59 = vpop.permute.xlu0 %2308 }
 0x820   : > { %v2311_v12 = vpop.permute.xlu1 %2310  ;;  %v7333_v62 = vpop.permute.xlu0 %2346 }
 0x821   : > { %v2313_v9 = vsel %vm600_vm14, %v2309_v59, %v2311_v12 }
 0x822   : > { %2319 = vst.msk [vmem:[#allocation2 + $0x28] sm:$0xff] %vm609_vm15, %v2313_v9 }
 0x824   : > { %v2307_v23 = vpop.permute.xlu1 %2306  ;;  %v7349_v16 = vpop.permute.xlu0 %2344 }
 0x825   : > { %v7261_v49 = vsel %vm600_vm14, %v2307_v23, %v2309_v59  ;;  %2317 = vst.msk [vmem:[#allocation2 + $0x18] sm:$0xff] %vm606_vm13, %v2307_v23  ;;  %v2356_v40 = vsel %vm237_vm5, %v7349_v16, %v7333_v62 }
 0x826   : > { %2318 = vst [vmem:[#allocation2 + $0x20] sm:$0xff] %v7261_v49  ;;  %2352 = vrot.lane.b32.xlu0 %v7261_v49, %s6156_s21  ;;  %v7269_v61 = vpack.c.bf16 %v7261_v49, %v7094_v36 }
 0x828   : > { %v7271_v34 = vpop.permute.xlu1 %2348  ;;  %5784 = vmatprep.subr.bf16.mxu0 %v7269_v61  ;;  %v7360_v55 = vpop.permute.xlu0 %2386 }
 0x829   : > { %2368 = vst.msk [vmem:[#allocation3 + $0x40] sm:$0xff] %vm223_vm2, %v7271_v34  ;;  %v7276_v43 = vld [vmem:[#allocation2 + $0x28] sm:$0xff]  ;;  %v2357_v8 = vsel %vm237_vm5, %v7333_v62, %v7271_v34 }
 0x82a   : > { %2392 = vrot.lane.b32.xlu0 %v7261_v49, %s6157_s22  ;;  %2331 = vst.msk [vmem:[#allocation3 + $0x28] sm:$0xff] %vm223_vm2, %v7276_v43 }
 0x82c   : > { %v7282_v48 = vpop.permute.xlu1 %2388  ;;  %v7284_v42 = vld [vmem:[#allocation2 + $0x18] sm:$0xff]  ;;  %v7366_v46 = vpop.permute.xlu0 %2384 }
 0x82d   : > { %2408 = vst.msk [vmem:[#allocation3 + $0x70] sm:$0xff] %vm223_vm2, %v7282_v48  ;;  %2350 = vrot.lane.b32.xlu1 %v7284_v42, %s6156_s21  ;;  %v7292_v47 = vpack.c.bf16 %v7284_v42, %v7100_v10  ;;  %v2397_v23 = vsel %vm258_vm6, %v7360_v55, %v7282_v48 }
 0x82e   : > { %2432 = vrot.lane.b32.xlu0 %v7261_v49, %s6158_s23 }
 0x82f   : > { %5786 = vmatpush1.bf16.msra.mxu0 %v7292_v47 }
 0x830   : > { %v7297_v57 = vpop.permute.xlu1 %2428  ;;  %v7374_v24 = vpop.permute.xlu0 %2426 }
 0x831   : > { %2448 = vst.msk [vmem:[#allocation3 + $0xa0] sm:$0xff] %vm223_vm2, %v7297_v57  ;;  %2390 = vrot.lane.b32.xlu1 %v7284_v42, %s6157_s22  ;;  %v2659_v37 = vld [vmem:[#allocation3 + $0x28] sm:$0xff]  ;;  %v2437_v48 = vsel %vm279_vm4, %v7374_v24, %v7297_v57 }
 0x832   : > { %v5820_v53 = vpack.c.bf16 %v2659_v37, %v7132_v58  ;;  %2900 = vst.msk [vmem:[#allocation3 + $0x28] sm:$0xff] %vm223_vm2, %v7276_v43  ;;  %2472 = vrot.lane.b32.xlu0 %v7261_v49, %s6159_s24  ;;  %v2396_v37 = vsel %vm258_vm6, %v7366_v46, %v7360_v55 }
 0x834   : > { %v7308_v5 = vpop.permute.xlu1 %2468  ;;  %5821 = vmatpush1.bf16.msra.mxu1 %v5820_v53  ;;  %v7382_v44 = vpop.permute.xlu0 %2424 }
 0x835   : > { %2488 = vst.msk [vmem:[#allocation3 + $0xd0] sm:$0xff] %vm223_vm2, %v7308_v5  ;;  %2430 = vrot.lane.b32.xlu1 %v7284_v42, %s6158_s23  ;;  %5822 = vmatprep.subr.bf16.mxu1 %v6155_v4  ;;  %v2436_v55 = vsel %vm279_vm4, %v7382_v44, %v7374_v24 }
 0x836   : > { %2512 = vrot.lane.b32.xlu0 %v7261_v49, %s6160_s25 }
 0x838   : > { %v7317_v58 = vpop.permute.xlu1 %2508  ;;  %v7390_v54 = vpop.permute.xlu0 %2466 }
 0x839   : > { %2528 = vst.msk [vmem:[#allocation3 + $0x100] sm:$0xff] %vm223_vm2, %v7317_v58  ;;  %2470 = vrot.lane.b32.xlu1 %v7284_v42, %s6159_s24 }
 0x83a   : > { %2552 = vrot.lane.b32.xlu0 %v7261_v49, %s6161_s26 }
 0x83c   : > { %v7325_v7 = vpop.permute.xlu1 %2548  ;;  %v7398_v56 = vpop.permute.xlu0 %2464 }
 0x83d   : > { %2568 = vst.msk [vmem:[#allocation3 + $0x130] sm:$0xff] %vm223_vm2, %v7325_v7  ;;  %2510 = vrot.lane.b32.xlu1 %v7284_v42, %s6160_s25  ;;  %v2476_v44 = vsel %vm300_vm7, %v7398_v56, %v7390_v54 }
 0x83e   : > { %2592 = vrot.lane.b32.xlu0 %v7261_v49, %s6162_s27 }
 0x840   : > { %v7335_v38 = vpop.permute.xlu1 %2588  ;;  %v7411_v51 = vpop.permute.xlu0 %2506 }
 0x841   : > { %2608 = vst.msk [vmem:[#allocation3 + $0x160] sm:$0xff] %vm223_vm2, %v7335_v38  ;;  %2550 = vrot.lane.b32.xlu1 %v7284_v42, %s6161_s26 }
 0x842   : > { %2632 = vrot.lane.b32.xlu0 %v7261_v49, %s6164_s28 }
 0x844   : > { %v7343_v11 = vpop.permute.xlu1 %2628  ;;  %v7417_v25 = vpop.permute.xlu0 %2504 }
 0x845   : > { %2648 = vst.msk [vmem:[#allocation3 + $0x190] sm:$0xff] %vm223_vm2, %v7343_v11  ;;  %2590 = vrot.lane.b32.xlu1 %v7284_v42, %s6162_s27  ;;  %v2516_v56 = vsel %vm321_vm8, %v7417_v25, %v7411_v51 }
 0x846   : > { %2624 = vrot.lane.b32.xlu0 %v7100_v10, %s6164_s28 }
 0x848   : > { %v7421_v14 = vpop.permute.xlu0 %2546 }
 0x849   : > { %2354 = vrot.lane.b32.xlu1 %v7276_v43, %s6156_s21 }
 0x84a   : > { %2717 = vrot.lane.b32.xlu0 %v7197_v22, %s6167_s10 }
 0x84c   : > { %v7427_v26 = vpop.permute.xlu0 %2544 }
 0x84d   : > { %2394 = vrot.lane.b32.xlu1 %v7276_v43, %s6157_s22 }
 0x84e   : > { %2712 = vperm.xlu0 %6143, %v5454_v13  }
 0x851   : > { %2434 = vrot.lane.b32.xlu1 %v7276_v43, %s6158_s23 }
 0x852   : > { %2924 = vrot.lane.b32.xlu0 %v7094_v36, %s6156_s21 }
 0x855   : > { %2474 = vrot.lane.b32.xlu1 %v7276_v43, %s6159_s24 }
 0x856   : > { %2922 = vrot.lane.b32.xlu0 %v7100_v10, %s6156_s21 }
 0x859   : > { %2514 = vrot.lane.b32.xlu1 %v7276_v43, %s6160_s25 }
 0x85a   : > { %2986 = vrot.lane.b32.xlu0 %v7110_v50, %s6157_s22 }
 0x85d   : > { %2554 = vrot.lane.b32.xlu1 %v7276_v43, %s6161_s26 }
 0x85e   : > { %2988 = vrot.lane.b32.xlu0 %v7284_v42, %s6157_s22 }
 0x861   : > { %2594 = vrot.lane.b32.xlu1 %v7276_v43, %s6162_s27 }
 0x862   : > { %3046 = vrot.lane.b32.xlu0 %v7110_v50, %s6158_s23 }
 0x865   : > { %2634 = vrot.lane.b32.xlu1 %v7276_v43, %s6164_s28 }
 0x866   : > { %3042 = vrot.lane.b32.xlu0 %v7100_v10, %s6158_s23 }
 0x869   : > { %2630 = vrot.lane.b32.xlu1 %v7284_v42, %s6164_s28 }
 0x86a   : > { %2932 = vrot.lane.b32.xlu0 %v7276_v43, %s6156_s21 }
 0x86d   : > { %2719 = vrot.lane.b32.xlu1 %v7403_v3, %s6167_s10 }
 0x86e   : > { %2992 = vrot.lane.b32.xlu0 %v7276_v43, %s6157_s22 }
 0x871   : > { %2926 = vrot.lane.b32.xlu1 %v7110_v50, %s6156_s21  ;;  %v7431_v50 = vpop.permute.xlu0 %2586 }
 0x875   : > { %2928 = vrot.lane.b32.xlu1 %v7284_v42, %s6156_s21  ;;  %v7435_v52 = vpop.permute.xlu0 %2584 }
 0x879   : > { %2984 = vrot.lane.b32.xlu1 %v7094_v36, %s6157_s22  ;;  %v7437_v17 = vpop.permute.xlu0 %2626 }
 0x87d   : > { %2982 = vrot.lane.b32.xlu1 %v7100_v10, %s6157_s22 }
 0x881   : > { %3044 = vrot.lane.b32.xlu1 %v7094_v36, %s6158_s23 }
 0x885   : > { %2930 = vrot.lane.b32.xlu1 %v7261_v49, %s6156_s21 }
 0x889   : > { %2990 = vrot.lane.b32.xlu1 %v7261_v49, %s6157_s22 }
 0x898   : > { %v2353_v31 = vpop.permute.xlu0 %2352 }
 0x89c   : > { %v2393_v27 = vpop.permute.xlu0 %2392 }
 0x89f   : > { %v2351_v10 = vpop.permute.xlu1 %2350 }
 0x8a0   : > { %v2433_v21 = vpop.permute.xlu0 %2432  ;;  %v2358_v41 = vsel %vm237_vm5, %v2351_v10, %v2353_v31  ;;  %v2662_v10 = vld [vmem:[#allocation3 + $0x40] sm:$0xff] }
 0x8a1   : > { %v5789_v12 = vpack.c.bf16 %v2358_v41, %v2356_v40  ;;  %v2477_v40 = vsel %vm300_vm7, %v7390_v54, %v7308_v5  ;;  %v2674_v5 = vld [vmem:[#allocation3 + $0xa0] sm:$0xff] }
 0x8a3   : > { %v2391_v45 = vpop.permute.xlu1 %2390 }
 0x8a4   : > { %v2473_v36 = vpop.permute.xlu0 %2472  ;;  %v2398_v59 = vsel %vm258_vm6, %v2391_v45, %v2393_v27 }
 0x8a5   : > { %v5793_v62 = vpack.c.bf16 %v2398_v59, %v2396_v37 }
 0x8a7   : > { %v2431_v60 = vpop.permute.xlu1 %2430 }
 0x8a8   : > { %v7439_v39 = vpop.permute.xlu0 %2512  ;;  %v2438_v16 = vsel %vm279_vm4, %v2431_v60, %v2433_v21 }
 0x8a9   : > { %v5797_v60 = vpack.c.bf16 %v2438_v16, %v2436_v55  ;;  %v2597_v55 = vsel %vm363_vm10, %v7431_v50, %v7335_v38  ;;  %v2692_v38 = vld [vmem:[#allocation3 + $0x130] sm:$0xff] }
 0x8ab   : > { %v2471_v22 = vpop.permute.xlu1 %2470 }
 0x8ac   : > { %v7441_v32 = vpop.permute.xlu0 %2552 }
 0x8af   : > { %v2511_v15 = vpop.permute.xlu1 %2510 }
 0x8b0   : > { %v7447_v35 = vpop.permute.xlu0 %2592  ;;  %v2518_v59 = vsel %vm321_vm8, %v2511_v15, %v7439_v39 }
 0x8b3   : > { %v7443_v19 = vpop.permute.xlu1 %2550 }
 0x8b4   : > { %v7458_v18 = vpop.permute.xlu0 %2632 }
 0x8b7   : > { %v7445_v33 = vpop.permute.xlu1 %2590 }
 0x8b8   : > { %v7470_v13 = vpop.permute.xlu0 %2624 }
 0x8bb   : > { %v2355_v6 = vpop.permute.xlu1 %2354 }
 0x8bc   : > { %v2359_v30 = vsel %vm237_vm5, %v2353_v31, %v2355_v6  ;;  %2371 = vst.msk [vmem:[#allocation3 + $0x58] sm:$0xff] %vm223_vm2, %v2355_v6  ;;  %v2478_v6 = vsel %vm300_vm7, %v2471_v22, %v2473_v36 }
 0x8bd   : > { %v5787_v63 = vpack.c.bf16 %v2359_v30, %v2357_v8  ;;  %v2668_v30 = vld [vmem:[#allocation3 + $0x70] sm:$0xff] }
 0x8bf   : > { %v2395_v9 = vpop.permute.xlu1 %2394  ;;  %5788 = vmatprep.subr.bf16.mxu0 %v5787_v63 }
 0x8c0   : > { %v2399_v34 = vsel %vm258_vm6, %v2393_v27, %v2395_v9  ;;  %2411 = vst.msk [vmem:[#allocation3 + $0x88] sm:$0xff] %vm223_vm2, %v2395_v9  ;;  %5790 = vmatpush1.bf16.msra.mxu0 %v5789_v12  ;;  %v5801_v12 = vpack.c.bf16 %v2478_v6, %v2476_v44 }
 0x8c1   : > { %v5791_v53 = vpack.c.bf16 %v2399_v34, %v2397_v23 }
 0x8c3   : > { %v2435_v31 = vpop.permute.xlu1 %2434  ;;  %v2665_v45 = vld [vmem:[#allocation3 + $0x58] sm:$0xff]  ;;  %5792 = vmatprep.subr.bf16.mxu0 %v5791_v53  ;;  %v5805_v53 = vpack.c.bf16 %v2518_v59, %v2516_v56  ;;  %v3389_v56 = vld [vmem:[#allocation3 + $0x10] sm:$0xff] }
 0x8c4   : > { %v2439_v27 = vsel %vm279_vm4, %v2433_v21, %v2435_v31  ;;  %2451 = vst.msk [vmem:[#allocation3 + $0xb8] sm:$0xff] %vm223_vm2, %v2435_v31  ;;  %v5823_v41 = vpack.c.bf16 %v2665_v45, %v2662_v10  ;;  %5794 = vmatpush1.bf16.msra.mxu0 %v5793_v62  ;;  %v7482_v21 = vpop.permute.xlu0 %2717  ;;  %v2557_v31 = vsel %vm342_vm9, %v7421_v14, %v7325_v7 }
 0x8c5   : > { %v5795_v46 = vpack.c.bf16 %v2439_v27, %v2437_v48  ;;  %v2598_v7 = vsel %vm363_vm10, %v7445_v33, %v7447_v35  ;;  %v2596_v33 = vsel %vm363_vm10, %v7435_v52, %v7431_v50 }
 0x8c6   : > { %5824 = vmatpush1.bf16.msra.mxu1 %v5823_v41  ;;  %v5813_v6 = vpack.c.bf16 %v2598_v7, %v2596_v33  ;;  %v7613_v7 = vld [vmem:[#allocation2] sm:$0xff] }
 0x8c7   : > { %v2475_v8 = vpop.permute.xlu1 %2474  ;;  %5825 = vmatprep.subr.bf16.mxu1 %v6155_v4  ;;  %v2671_v57 = vld [vmem:[#allocation3 + $0x88] sm:$0xff]  ;;  %5796 = vmatprep.subr.bf16.mxu0 %v5795_v46 }
 0x8c8   : > { %v2479_v63 = vsel %vm300_vm7, %v2473_v36, %v2475_v8  ;;  %2491 = vst.msk [vmem:[#allocation3 + $0xe8] sm:$0xff] %vm223_vm2, %v2475_v8  ;;  %v5826_v24 = vpack.c.bf16 %v2671_v57, %v2668_v30  ;;  %5798 = vmatpush1.bf16.msra.mxu0 %v5797_v60  ;;  %v2517_v36 = vsel %vm321_vm8, %v7411_v51, %v7317_v58 }
 0x8c9   : > { %v5799_v22 = vpack.c.bf16 %v2479_v63, %v2477_v40  ;;  %v2558_v58 = vsel %vm342_vm9, %v7443_v19, %v7441_v32  ;;  %v2556_v19 = vsel %vm342_vm9, %v7427_v26, %v7421_v14 }
 0x8ca   : > { %5827 = vmatpush1.bf16.msra.mxu1 %v5826_v24  ;;  %v5809_v48 = vpack.c.bf16 %v2558_v58, %v2556_v19  ;;  %v2698_v24 = vld [vmem:[#allocation3 + $0x160] sm:$0xff] }
 0x8cb   : > { %v2515_v9 = vpop.permute.xlu1 %2514  ;;  %5828 = vmatprep.subr.bf16.mxu1 %v6155_v4  ;;  %v2677_v23 = vld [vmem:[#allocation3 + $0xb8] sm:$0xff]  ;;  %5800 = vmatprep.subr.bf16.mxu0 %v5799_v22 }
 0x8cc   : > { %v2519_v34 = vsel %vm321_vm8, %v7439_v39, %v2515_v9  ;;  %2531 = vst.msk [vmem:[#allocation3 + $0x118] sm:$0xff] %vm223_vm2, %v2515_v9  ;;  %v5829_v54 = vpack.c.bf16 %v2677_v23, %v2674_v5  ;;  %5802 = vmatpush1.bf16.msra.mxu0 %v5801_v12  ;;  %v2680_v39 = vld [vmem:[#allocation3 + $0xd0] sm:$0xff] }
 0x8cd   : > { %v7504_v15 = vpop.permute.xlu0 %2712  ;;  %v5803_v37 = vpack.c.bf16 %v2519_v34, %v2517_v36  ;;  %v2704_v23 = vld [vmem:[#allocation3 + $0x190] sm:$0xff] }
 0x8ce   : > { %5830 = vmatpush1.bf16.msra.mxu1 %v5829_v54 }
 0x8cf   : > { %v2555_v62 = vpop.permute.xlu1 %2554  ;;  %5831 = vmatprep.subr.bf16.mxu1 %v6155_v4  ;;  %v2683_v16 = vld [vmem:[#allocation3 + $0xe8] sm:$0xff]  ;;  %5804 = vmatprep.subr.bf16.mxu0 %v5803_v37 }
 0x8d0   : > { %v2559_v51 = vsel %vm342_vm9, %v7441_v32, %v2555_v62  ;;  %2571 = vst.msk [vmem:[#allocation3 + $0x148] sm:$0xff] %vm223_vm2, %v2555_v62  ;;  %v5832_v25 = vpack.c.bf16 %v2683_v16, %v2680_v39  ;;  %5806 = vmatpush1.bf16.msra.mxu0 %v5805_v53  ;;  %v2686_v32 = vld [vmem:[#allocation3 + $0x100] sm:$0xff] }
 0x8d1   : > { %v7519_v10 = vpop.permute.xlu0 %2924  ;;  %v5807_v45 = vpack.c.bf16 %v2559_v51, %v2557_v31 }
 0x8d2   : > { %5833 = vmatpush1.bf16.msra.mxu1 %v5832_v25 }
 0x8d3   : > { %v2595_v27 = vpop.permute.xlu1 %2594  ;;  %5834 = vmatprep.subr.bf16.mxu1 %v6155_v4  ;;  %v2689_v41 = vld [vmem:[#allocation3 + $0x118] sm:$0xff]  ;;  %5808 = vmatprep.subr.bf16.mxu0 %v5807_v45 }
 0x8d4   : > { %v2599_v14 = vsel %vm363_vm10, %v7447_v35, %v2595_v27  ;;  %2611 = vst.msk [vmem:[#allocation3 + $0x178] sm:$0xff] %vm223_vm2, %v2595_v27  ;;  %v5835_v26 = vpack.c.bf16 %v2689_v41, %v2686_v32  ;;  %5810 = vmatpush1.bf16.msra.mxu0 %v5809_v48  ;;  %v2637_v35 = vsel %vm384_vm11, %v7437_v17, %v7343_v11  ;;  %v7593_v48 = vld [vmem:[#allocation2 + $0x10] sm:$0xff] }
 0x8d5   : > { %v7534_v46 = vpop.permute.xlu0 %2922  ;;  %v5811_v60 = vpack.c.bf16 %v2599_v14, %v2597_v55  ;;  %v2636_v11 = vsel %vm384_vm11, %v7470_v13, %v7437_v17 }
 0x8d6   : > { %5836 = vmatpush1.bf16.msra.mxu1 %v5835_v26 }
 0x8d7   : > { %v2635_v8 = vpop.permute.xlu1 %2634  ;;  %5837 = vmatprep.subr.bf16.mxu1 %v6155_v4  ;;  %v2695_v30 = vld [vmem:[#allocation3 + $0x148] sm:$0xff]  ;;  %5812 = vmatprep.subr.bf16.mxu0 %v5811_v60 }
 0x8d8   : > { %v2639_v57 = vsel %vm384_vm11, %v7458_v18, %v2635_v8  ;;  %2651 = vst.msk [vmem:[#allocation3 + $0x1a8] sm:$0xff] %vm223_vm2, %v2635_v8  ;;  %v5838_v50 = vpack.c.bf16 %v2695_v30, %v2692_v38  ;;  %5814 = vmatpush1.bf16.msra.mxu0 %v5813_v6 }
 0x8d9   : > { %v7543_v52 = vpop.permute.xlu0 %2986  ;;  %v5815_v40 = vpack.c.bf16 %v2639_v57, %v2637_v35 }
 0x8da   : > { %5839 = vmatpush1.bf16.msra.mxu1 %v5838_v50  ;;  %3017 = vst.msk [vmem:[#allocation3 + $0xa0] sm:$0xff] %vm223_vm2, %v7543_v52 }
 0x8db   : > { %v2631_v63 = vpop.permute.xlu1 %2630  ;;  %5840 = vmatprep.subr.bf16.mxu1 %v6155_v4  ;;  %v2701_v44 = vld [vmem:[#allocation3 + $0x178] sm:$0xff]  ;;  %5816 = vmatprep.subr.bf16.mxu0 %v5815_v40  ;;  %v2940_v40 = vsel %vm237_vm5, %v7534_v46, %v7519_v10 }
 0x8dc   : > { %v2638_v22 = vsel %vm384_vm11, %v2631_v63, %v7458_v18  ;;  %v5841_v12 = vpack.c.bf16 %v2701_v44, %v2698_v24  ;;  %v3392_v18 = vld [vmem:[#allocation3 + $0x28] sm:$0xff] }
 0x8dd   : > { %v7553_v59 = vpop.permute.xlu0 %2988  ;;  %v5817_v9 = vpack.c.bf16 %v2638_v22, %v2636_v11 }
 0x8de   : > { %5842 = vmatpush1.bf16.msra.mxu1 %v5841_v12 }
 0x8df   : > { %v2720_v5 = vpop.permute.xlu1 %2719  ;;  %5843 = vmatprep.subr.bf16.mxu1 %v6155_v4  ;;  %v2707_v36 = vld [vmem:[#allocation3 + $0x1a8] sm:$0xff]  ;;  %5818 = vmatpush1.bf16.msra.mxu0 %v5817_v9 }
 0x8e0   : > { %v5844_v34 = vpack.c.bf16 %v2707_v36, %v2704_v23  ;;  %5456 = vmatprep.mubr.msk.f32.mxu1 %vm8815_vm12, %v2720_v5  ;;  %5455 = vmatprep.mubr.msk.f32.mxu0 %vm8816_vm3, %v2720_v5  ;;  %v2721_v17 = vsel %vm8817_vm0, %v7482_v21, %v2720_v5  ;;  %v5899_v21 = vpack.c.bf16 %v3392_v18, %v3389_v56  ;;  %v3267_v5 = vld [vmem:[#allocation2 + $0x18] sm:$0xff]  ;;  %v3328_v18 = vld [vmem:[#allocation2 + $0x20] sm:$0xff]  ;;  %vm8818_vm3 = vcmask 719872  }
 0x8e1   : > { %5847 = vmatprep.subr.bf16.mxu0 %v7269_v61  ;;  %v7561_v13 = vpop.permute.xlu0 %3046  ;;  %vm8819_vm12 = vmmov %vm8818_vm3  ;;  %vm8820_vm0 = vmmov 0  }
 0x8e2   : > { %5845 = vmatpush1.bf16.msra.mxu1 %v5844_v34  ;;  %3077 = vst.msk [vmem:[#allocation3 + $0xe8] sm:$0xff] %vm223_vm2, %v7561_v13  ;;  %2790 = vmatmul.mubr.f32.vlgmr.msra.gmra.mrb[8].mxu0 %v2721_v17 }
 0x8e3   : > { %v7565_v54 = vpop.permute.xlu1 %2926  ;;  %5898 = vmatprep.subr.bf16.mxu1 %v6155_v4  ;;  %5849 = vmatpush1.bf16.msra.mxu0 %v7292_v47 }
 0x8e4   : > { %2957 = vst.msk [vmem:[#allocation3 + $0x58] sm:$0xff] %vm223_vm2, %v7565_v54  ;;  %v2941_v8 = vsel %vm237_vm5, %v7519_v10, %v7565_v54 }
 0x8e5   : > { %2861 = vmatmul.mubr.f32.vlgmr.msra.gmra.mrb[8].mxu1 %v2721_v17  ;;  %v7571_v61 = vpop.permute.xlu0 %3042 }
 0x8e6   : > { %5900 = vmatpush1.bf16.msra.mxu1 %v5899_v21  ;;  %v3329_v21 = vld [vmem:[#allocation2 + $0x28] sm:$0xff] }
 0x8e7   : > { %5901 = vmatprep.subr.bf16.mxu1 %v6155_v4 }
 0x8e9   : > { %v7574_v37 = vpop.permute.xlu0 %2932 }
 0x8ea   : > { %2960 = vst.msk [vmem:[#allocation3 + $0x70] sm:$0xff] %vm223_vm2, %v7574_v37 }
 0x8eb   : > { %v3398_v22 = vld [vmem:[#allocation3 + $0x58] sm:$0xff] }
 0x8ed   : > { %v7578_v53 = vpop.permute.xlu0 %2992 }
 0x8ee   : > { %3020 = vst.msk [vmem:[#allocation3 + $0xb8] sm:$0xff] %vm223_vm2, %v7578_v53 }
 0x9b5   : > { %v2791_v47 = vpop.f32.mrb[8].mxu0 }
 0x9b6   : > { %v2793_v58 = vpop.f32.mrb[9].mxu0  ;;  %v2792_v19 = vadd.f32 %v2791_v47, %v7504_v15 }
 0x9b7   : > { %v2794_v62 = vadd.f32 %v2793_v58, %v7504_v15  ;;  %v5458_v58 = vld [vmem:[%s8805_s1 + $0x30] sm:$0xff] }
 0x9b8   : > { %v2862_v39 = vpop.f32.mrb[8].mxu1  ;;  %v2866_v45 = vmul.f32 %v2792_v19, %v6335_v20 }
 0x9b9   : > { %v2863_v16 = vadd.f32 %v2862_v39, %v7504_v15  ;;  %v2864_v31 = vpop.f32.mrb[9].mxu1  ;;  %v2867_v51 = vmul.f32 %v2794_v62, %v6338_v28  ;;  %v7605_v15 = vld [vmem:[#allocation2 + $0x8] sm:$0xff]  ;;  %v5459_v62 = vld [vmem:[%s8805_s1 + $0x38] sm:$0xff] }
 0x9bb   : > { %v2868_v25 = vmul.f32 %v2863_v16, %v6340_v29  ;;  %2874 = vrot.lane.b32.xlu0 %v2867_v51, %s6166_s9  ;;  %v5460_v16 = vld [vmem:[%s8806_s2 + $0x28] sm:$0xff] }
 0x9bd   : > { %2876 = vrot.lane.b32.xlu1 %v2868_v25, %s6166_s9 }
 0x9bf   : > { %3052 = vrot.lane.b32.xlu0 %v7276_v43, %s6158_s23 }
 0x9c1   : > { %2872 = vrot.lane.b32.xlu1 %v2866_v45, %s6166_s9 }
 0x9c3   : > { %3106 = vrot.lane.b32.xlu0 %v7593_v48, %s6159_s24 }
 0x9c5   : > { %3050 = vrot.lane.b32.xlu1 %v7261_v49, %s6158_s23 }
 0x9c7   : > { %3112 = vrot.lane.b32.xlu0 %v7276_v43, %s6159_s24 }
 0x9c9   : > { %3048 = vrot.lane.b32.xlu1 %v7284_v42, %s6158_s23 }
 0x9cb   : > { %3108 = vrot.lane.b32.xlu0 %v7284_v42, %s6159_s24 }
 0x9cd   : > { %3104 = vrot.lane.b32.xlu1 %v7605_v15, %s6159_s24 }
 0x9cf   : > { %3166 = vrot.lane.b32.xlu0 %v7593_v48, %s6160_s25 }
 0x9d1   : > { %3110 = vrot.lane.b32.xlu1 %v7261_v49, %s6159_s24 }
 0x9d3   : > { %3162 = vrot.lane.b32.xlu0 %v7613_v7, %s6160_s25 }
 0x9d5   : > { %3102 = vrot.lane.b32.xlu1 %v7613_v7, %s6159_s24 }
 0x9d7   : > { %3172 = vrot.lane.b32.xlu0 %v7276_v43, %s6160_s25 }
 0x9d9   : > { %3164 = vrot.lane.b32.xlu1 %v7605_v15, %s6160_s25 }
 0x9db   : > { %3226 = vrot.lane.b32.xlu0 %v7593_v48, %s6161_s26 }
 0x9dd   : > { %3170 = vrot.lane.b32.xlu1 %v7261_v49, %s6160_s25 }
 0x9df   : > { %3232 = vrot.lane.b32.xlu0 %v7276_v43, %s6161_s26 }
 0x9e1   : > { %3168 = vrot.lane.b32.xlu1 %v7284_v42, %s6160_s25 }
 0x9e3   : > { %3228 = vrot.lane.b32.xlu0 %v7284_v42, %s6161_s26  ;;  %v7647_v42 = vpop.permute.xlu1 %2928 }
 0x9e5   : > { %3224 = vrot.lane.b32.xlu1 %v7605_v15, %s6161_s26 }
 0x9e7   : > { %3286 = vrot.lane.b32.xlu0 %v7593_v48, %s6162_s27  ;;  %v7649_v27 = vpop.permute.xlu1 %2984 }
 0x9e9   : > { %3230 = vrot.lane.b32.xlu1 %v7261_v49, %s6161_s26 }
 0x9eb   : > { %3282 = vrot.lane.b32.xlu0 %v7613_v7, %s6162_s27  ;;  %v7651_v32 = vpop.permute.xlu1 %2982 }
 0x9ed   : > { %3222 = vrot.lane.b32.xlu1 %v7613_v7, %s6161_s26 }
 0x9ef   : > { %v7653_v41 = vpop.permute.xlu1 %3044 }
 0x9f1   : > { %3284 = vrot.lane.b32.xlu1 %v7605_v15, %s6162_s27 }
 0x9f3   : > { %v7655_v55 = vpop.permute.xlu1 %2930 }
 0x9f5   : > { %3290 = vrot.lane.b32.xlu1 %v7261_v49, %s6162_s27 }
 0x9f7   : > { %v7657_v14 = vpop.permute.xlu1 %2990 }
 0xa2d   : > { %v2875_v26 = vpop.permute.xlu0 %2874 }
 0xa2f   : > { %v2877_v33 = vpop.permute.xlu1 %2876 }
 0xa30   : > { %v2879_v60 = vsel %vm600_vm14, %v2875_v26, %v2877_v33 }
 0xa31   : > { %2885 = vst.msk [vmem:[#allocation2 + $0x40] sm:$0xff] %vm609_vm15, %v2879_v60  ;;  %v7661_v6 = vpop.permute.xlu0 %3052 }
 0xa32   : > { %3080 = vst.msk [vmem:[#allocation3 + $0x100] sm:$0xff] %vm223_vm2, %v7661_v6 }
 0xa33   : > { %v2873_v49 = vpop.permute.xlu1 %2872 }
 0xa34   : > { %2883 = vst.msk [vmem:[#allocation2 + $0x30] sm:$0xff] %vm606_vm13, %v2873_v49  ;;  %v7670_v38 = vsel %vm600_vm14, %v2873_v49, %v2875_v26 }
 0xa35   : > { %v7672_v30 = vpop.permute.xlu0 %3106  ;;  %v5850_v35 = vpack.c.bf16 %v2941_v8, %v7670_v38 }
 0xa36   : > { %3137 = vst.msk [vmem:[#allocation3 + $0x130] sm:$0xff] %vm223_vm2, %v7672_v30 }
 0xa37   : > { %5851 = vmatprep.subr.bf16.mxu0 %v5850_v35  ;;  %v7739_v17 = vpop.permute.xlu1 %3050 }
 0xa38   : > { %v2894_v57 = vld [vmem:[#allocation2 + $0x40] sm:$0xff] }
 0xa39   : > { %v7677_v50 = vpop.permute.xlu0 %3112  ;;  %2903 = vst.msk [vmem:[#allocation3 + $0x40] sm:$0xff] %vm223_vm2, %v2894_v57 }
 0xa3a   : > { %3140 = vst.msk [vmem:[#allocation3 + $0x148] sm:$0xff] %vm223_vm2, %v7677_v50 }
 0xa3b   : > { %v2970_v63 = vld [vmem:[#allocation2 + $0x30] sm:$0xff]  ;;  %v7744_v54 = vpop.permute.xlu1 %3048 }
 0xa3c   : > { %2994 = vrot.lane.b32.xlu1 %v2970_v63, %s6157_s22  ;;  %2934 = vrot.lane.b32.xlu0 %v2970_v63, %s6156_s21  ;;  %v5852_v24 = vpack.c.bf16 %v2940_v40, %v2970_v63 }
 0xa3d   : > { %v7687_v44 = vpop.permute.xlu0 %3108 }
 0xa3e   : > { %5853 = vmatpush1.bf16.msra.mxu0 %v5852_v24 }
 0xa3f   : > { %v7752_v56 = vpop.permute.xlu1 %3104 }
 0xa40   : > { %3114 = vrot.lane.b32.xlu1 %v2970_v63, %s6159_s24  ;;  %3054 = vrot.lane.b32.xlu0 %v2970_v63, %s6158_s23  ;;  %v3395_v11 = vld [vmem:[#allocation3 + $0x40] sm:$0xff] }
 0xa41   : > { %v7691_v12 = vpop.permute.xlu0 %3166  ;;  %v5902_v9 = vpack.c.bf16 %v3398_v22, %v3395_v11  ;;  %v2943_v22 = vsel %vm237_vm5, %v7655_v55, %v7574_v37  ;;  %v3002_v37 = vsel %vm258_vm6, %v7553_v59, %v7657_v14  ;;  %v3060_v59 = vsel %vm279_vm4, %v7571_v61, %v7653_v41  ;;  %v3407_v61 = vld [vmem:[#allocation3 + $0xa0] sm:$0xff] }
 0xa42   : > { %3197 = vst.msk [vmem:[#allocation3 + $0x178] sm:$0xff] %vm223_vm2, %v7691_v12 }
 0xa43   : > { %5903 = vmatpush1.bf16.msra.mxu1 %v5902_v9  ;;  %v7757_v47 = vpop.permute.xlu1 %3110  ;;  %v3003_v9 = vsel %vm258_vm6, %v7657_v14, %v7578_v53 }
 0xa44   : > { %3234 = vrot.lane.b32.xlu1 %v2970_v63, %s6161_s26  ;;  %3174 = vrot.lane.b32.xlu0 %v2970_v63, %s6160_s25 }
 0xa45   : > { %v7697_v10 = vpop.permute.xlu0 %3162  ;;  %5904 = vmatprep.subr.bf16.mxu1 %v6155_v4 }
 0xa47   : > { %v7770_v39 = vpop.permute.xlu1 %3102 }
 0xa48   : > { %2938 = vrot.lane.b32.xlu0 %v2894_v57, %s6156_s21  ;;  %2936 = vrot.lane.b32.xlu1 %v7670_v38, %s6156_s21 }
 0xa49   : > { %v7703_v46 = vpop.permute.xlu0 %3172 }
 0xa4a   : > { %3200 = vst.msk [vmem:[#allocation3 + $0x190] sm:$0xff] %vm223_vm2, %v7703_v46 }
 0xa4b   : > { %v7777_v31 = vpop.permute.xlu1 %3164 }
 0xa4c   : > { %3292 = vrot.lane.b32.xlu0 %v7276_v43, %s6162_s27  ;;  %3288 = vrot.lane.b32.xlu1 %v3267_v5, %s6162_s27 }
 0xa4d   : > { %v7710_v23 = vpop.permute.xlu0 %3226 }
 0xa4e   : > { %3257 = vst.msk [vmem:[#allocation3 + $0x1c0] sm:$0xff] %vm223_vm2, %v7710_v23 }
 0xa4f   : > { %v7781_v51 = vpop.permute.xlu1 %3170 }
 0xa50   : > { %2998 = vrot.lane.b32.xlu0 %v2894_v57, %s6157_s22  ;;  %2996 = vrot.lane.b32.xlu1 %v7670_v38, %s6157_s22 }
 0xa51   : > { %v7717_v36 = vpop.permute.xlu0 %3232 }
 0xa52   : > { %3260 = vst.msk [vmem:[#allocation3 + $0x1d8] sm:$0xff] %vm223_vm2, %v7717_v36 }
 0xa53   : > { %v7783_v25 = vpop.permute.xlu1 %3168 }
 0xa54   : > { %3058 = vrot.lane.b32.xlu0 %v2894_v57, %s6158_s23  ;;  %3056 = vrot.lane.b32.xlu1 %v7670_v38, %s6158_s23 }
 0xa55   : > { %v7724_v43 = vpop.permute.xlu0 %3228 }
 0xa57   : > { %v7785_v19 = vpop.permute.xlu1 %3224 }
 0xa58   : > { %3294 = vrot.lane.b32.xlu0 %v2970_v63, %s6162_s27  ;;  %3344 = vrot.lane.b32.xlu1 %v7605_v15, %s6164_s28 }
 0xa59   : > { %v7729_v34 = vpop.permute.xlu0 %3286 }
 0xa5a   : > { %3317 = vst.msk [vmem:[#allocation3 + $0x208] sm:$0xff] %vm223_vm2, %v7729_v34 }
 0xa5b   : > { %v7787_v45 = vpop.permute.xlu1 %3230 }
 0xa5c   : > { %3118 = vrot.lane.b32.xlu0 %v2894_v57, %s6159_s24  ;;  %3116 = vrot.lane.b32.xlu1 %v7670_v38, %s6159_s24 }
 0xa5d   : > { %v7793_v60 = vpop.permute.xlu0 %3282 }
 0xa5f   : > { %v7789_v26 = vpop.permute.xlu1 %3222 }
 0xa60   : > { %3178 = vrot.lane.b32.xlu0 %v2894_v57, %s6160_s25  ;;  %3176 = vrot.lane.b32.xlu1 %v7670_v38, %s6160_s25 }
 0xa63   : > { %v7791_v33 = vpop.permute.xlu1 %3284 }
 0xa64   : > { %3346 = vrot.lane.b32.xlu0 %v7593_v48, %s6164_s28  ;;  %3350 = vrot.lane.b32.xlu1 %v3328_v18, %s6164_s28 }
 0xa67   : > { %v7795_v49 = vpop.permute.xlu1 %3290 }
 0xa68   : > { %3238 = vrot.lane.b32.xlu0 %v2894_v57, %s6161_s26  ;;  %3236 = vrot.lane.b32.xlu1 %v7670_v38, %s6161_s26 }
 0xa6c   : > { %3298 = vrot.lane.b32.xlu0 %v2894_v57, %s6162_s27  ;;  %3296 = vrot.lane.b32.xlu1 %v7670_v38, %s6162_s27 }
 0xa70   : > { %3352 = vrot.lane.b32.xlu0 %v3329_v21, %s6164_s28  ;;  %3342 = vrot.lane.b32.xlu1 %v7613_v7, %s6164_s28 }
 0xa74   : > { %3348 = vrot.lane.b32.xlu0 %v3267_v5, %s6164_s28  ;;  %3356 = vrot.lane.b32.xlu1 %v7670_v38, %s6164_s28 }
 0xa78   : > { %3358 = vrot.lane.b32.xlu0 %v2894_v57, %s6164_s28  ;;  %3354 = vrot.lane.b32.xlu1 %v2970_v63, %s6164_s28  ;;  %v2942_v63 = vsel %vm237_vm5, %v7647_v42, %v7655_v55  ;;  %v3001_v42 = vsel %vm258_vm6, %v7649_v27, %v7543_v52 }
 0xa79   : > { %v5858_v53 = vpack.c.bf16 %v3003_v9, %v3001_v42  ;;  %v3410_v9 = vld [vmem:[#allocation3 + $0xb8] sm:$0xff] }
 0xa7c   : > { %3480 = vrot.lane.b32.xlu0 %v5458_v58, %s6168_s30  ;;  %3482 = vrot.lane.b32.xlu1 %v5459_v62, %s6168_s30 }
 0xa80   : > { %3478 = vrot.lane.b32.xlu0 %v7403_v3, %s6168_s30  ;;  %3472 = vperm.xlu1 %6144, %v5460_v16   ;;  %v3000_v16 = vsel %vm258_vm6, %v7651_v32, %v7649_v27 }
 0xa81   : > { %v5860_v52 = vpack.c.bf16 %v3002_v37, %v3000_v16 }
 0xaae   : > { %v2935_v8 = vpop.permute.xlu0 %2934  ;;  %v2995_v38 = vpop.permute.xlu1 %2994 }
 0xab2   : > { %v3055_v3 = vpop.permute.xlu0 %3054  ;;  %v7797_v35 = vpop.permute.xlu1 %3114 }
 0xab6   : > { %v7799_v57 = vpop.permute.xlu0 %3174  ;;  %v7801_v40 = vpop.permute.xlu1 %3234 }
 0xaba   : > { %v2939_v24 = vpop.permute.xlu0 %2938  ;;  %v2937_v11 = vpop.permute.xlu1 %2936 }
 0xabb   : > { %2963 = vst.msk [vmem:[#allocation3 + $0x88] sm:$0xff] %vm223_vm2, %v2939_v24  ;;  %v2944_v5 = vsel %vm237_vm5, %v2935_v8, %v2937_v11  ;;  %v2945_v18 = vsel %vm237_vm5, %v2937_v11, %v2939_v24  ;;  %v3061_v11 = vsel %vm279_vm4, %v7653_v41, %v7561_v13  ;;  %v5908_v13 = vpack.c.bf16 %v3410_v9, %v3407_v61  ;;  %v3428_v9 = vld [vmem:[#allocation3 + $0x148] sm:$0xff] }
 0xabc   : > { %v5854_v21 = vpack.c.bf16 %v2945_v18, %v2943_v22  ;;  %v5856_v58 = vpack.c.bf16 %v2944_v5, %v2942_v63  ;;  %v3401_v63 = vld [vmem:[#allocation3 + $0x70] sm:$0xff]  ;;  %v3062_v41 = vsel %vm279_vm4, %v7744_v54, %v7739_v17  ;;  %v3183_v61 = vsel %vm321_vm8, %v7781_v51, %v7703_v46 }
 0xabe   : > { %v7821_v55 = vpop.permute.xlu0 %3292  ;;  %v7823_v62 = vpop.permute.xlu1 %3288  ;;  %5855 = vmatprep.subr.bf16.mxu0 %v5854_v21  ;;  %v3063_v21 = vsel %vm279_vm4, %v7739_v17, %v7661_v6  ;;  %v3120_v17 = vsel %vm300_vm7, %v7770_v39, %v7752_v56 }
 0xabf   : > { %3320 = vst.msk [vmem:[#allocation3 + $0x220] sm:$0xff] %vm223_vm2, %v7821_v55  ;;  %5857 = vmatpush1.bf16.msra.mxu0 %v5856_v58 }
 0xac0   : > { %5859 = vmatprep.subr.bf16.mxu0 %v5858_v53 }
 0xac2   : > { %v2999_v14 = vpop.permute.xlu0 %2998  ;;  %v2997_v8 = vpop.permute.xlu1 %2996  ;;  %v3404_v24 = vld [vmem:[#allocation3 + $0x88] sm:$0xff] }
 0xac3   : > { %3023 = vst.msk [vmem:[#allocation3 + $0xd0] sm:$0xff] %vm223_vm2, %v2999_v14  ;;  %v3004_v22 = vsel %vm258_vm6, %v2995_v38, %v2997_v8  ;;  %v3005_v27 = vsel %vm258_vm6, %v2997_v8, %v2999_v14  ;;  %v5905_v32 = vpack.c.bf16 %v3404_v24, %v3401_v63  ;;  %5861 = vmatpush1.bf16.msra.mxu0 %v5860_v52 }
 0xac4   : > { %v5862_v5 = vpack.c.bf16 %v3061_v11, %v3005_v27  ;;  %v5864_v18 = vpack.c.bf16 %v3060_v59, %v3004_v22  ;;  %v3123_v38 = vsel %vm300_vm7, %v7757_v47, %v7677_v50  ;;  %v3121_v52 = vsel %vm300_vm7, %v7752_v56, %v7672_v30  ;;  %v3416_v59 = vld [vmem:[#allocation3 + $0xe8] sm:$0xff]  ;;  %v3419_v11 = vld [vmem:[#allocation3 + $0x100] sm:$0xff] }
 0xac5   : > { %5906 = vmatpush1.bf16.msra.mxu1 %v5905_v32  ;;  %v5870_v14 = vpack.c.bf16 %v3123_v38, %v3121_v52  ;;  %v3122_v30 = vsel %vm300_vm7, %v7687_v44, %v7757_v47  ;;  %v3181_v56 = vsel %vm321_vm8, %v7777_v31, %v7691_v12  ;;  %v3180_v27 = vsel %vm321_vm8, %v7697_v10, %v7777_v31 }
 0xac6   : > { %v3059_v58 = vpop.permute.xlu0 %3058  ;;  %v3057_v42 = vpop.permute.xlu1 %3056  ;;  %5907 = vmatprep.subr.bf16.mxu1 %v6155_v4  ;;  %5863 = vmatprep.subr.bf16.mxu0 %v5862_v5  ;;  %v5872_v63 = vpack.c.bf16 %v3122_v30, %v3120_v17  ;;  %v3241_v38 = vsel %vm342_vm9, %v7785_v19, %v7710_v23  ;;  %v3242_v23 = vsel %vm342_vm9, %v7724_v43, %v7787_v45  ;;  %v3437_v17 = vld [vmem:[#allocation3 + $0x190] sm:$0xff] }
 0xac7   : > { %3083 = vst.msk [vmem:[#allocation3 + $0x118] sm:$0xff] %vm223_vm2, %v3059_v58  ;;  %v3064_v37 = vsel %vm279_vm4, %v3055_v3, %v3057_v42  ;;  %v3065_v6 = vsel %vm279_vm4, %v3057_v42, %v3059_v58  ;;  %5865 = vmatpush1.bf16.msra.mxu0 %v5864_v18  ;;  %v3425_v18 = vld [vmem:[#allocation3 + $0x130] sm:$0xff]  ;;  %v3243_v58 = vsel %vm342_vm9, %v7787_v45, %v7717_v36 }
 0xac8   : > { %v5866_v53 = vpack.c.bf16 %v3065_v6, %v3063_v21  ;;  %v5868_v16 = vpack.c.bf16 %v3064_v37, %v3062_v41  ;;  %v5917_v31 = vpack.c.bf16 %v3428_v9, %v3425_v18  ;;  %v3434_v37 = vld [vmem:[#allocation3 + $0x178] sm:$0xff]  ;;  %v5882_v6 = vpack.c.bf16 %v3243_v58, %v3241_v38  ;;  %v3455_v18 = vld [vmem:[#allocation3 + $0x220] sm:$0xff] }
 0xac9   : > { %5909 = vmatpush1.bf16.msra.mxu1 %v5908_v13 }
 0xaca   : > { %v7858_v54 = vpop.permute.xlu0 %3294  ;;  %v7860_v50 = vpop.permute.xlu1 %3344  ;;  %5910 = vmatprep.subr.bf16.mxu1 %v6155_v4  ;;  %v3413_v3 = vld [vmem:[#allocation3 + $0xd0] sm:$0xff]  ;;  %5867 = vmatprep.subr.bf16.mxu0 %v5866_v53 }
 0xacb   : > { %v5911_v8 = vpack.c.bf16 %v3416_v59, %v3413_v3  ;;  %5869 = vmatpush1.bf16.msra.mxu0 %v5868_v16  ;;  %v3300_v59 = vsel %vm363_vm10, %v7793_v60, %v7791_v33  ;;  %v3302_v60 = vsel %vm363_vm10, %v7823_v62, %v7795_v49 }
 0xacc   : > { %5871 = vmatprep.subr.bf16.mxu0 %v5870_v14 }
 0xacd   : > { %5912 = vmatpush1.bf16.msra.mxu1 %v5911_v8  ;;  %v3446_v8 = vld [vmem:[#allocation3 + $0x1d8] sm:$0xff] }
 0xace   : > { %v3119_v39 = vpop.permute.xlu0 %3118  ;;  %v3117_v24 = vpop.permute.xlu1 %3116  ;;  %5913 = vmatprep.subr.bf16.mxu1 %v6155_v4  ;;  %v3422_v22 = vld [vmem:[#allocation3 + $0x118] sm:$0xff] }
 0xacf   : > { %3143 = vst.msk [vmem:[#allocation3 + $0x160] sm:$0xff] %vm223_vm2, %v3119_v39  ;;  %v3124_v44 = vsel %vm300_vm7, %v7797_v35, %v3117_v24  ;;  %v3125_v47 = vsel %vm300_vm7, %v3117_v24, %v3119_v39  ;;  %v5914_v32 = vpack.c.bf16 %v3422_v22, %v3419_v11  ;;  %5873 = vmatpush1.bf16.msra.mxu0 %v5872_v63  ;;  %v3443_v63 = vld [vmem:[#allocation3 + $0x1c0] sm:$0xff] }
 0xad0   : > { %v5874_v12 = vpack.c.bf16 %v3181_v56, %v3125_v47  ;;  %v5876_v5 = vpack.c.bf16 %v3180_v27, %v3124_v44  ;;  %v3182_v35 = vsel %vm321_vm8, %v7783_v25, %v7781_v51  ;;  %v3240_v51 = vsel %vm342_vm9, %v7789_v26, %v7785_v19 }
 0xad1   : > { %5915 = vmatpush1.bf16.msra.mxu1 %v5914_v32  ;;  %v5884_v19 = vpack.c.bf16 %v3242_v23, %v3240_v51  ;;  %v3301_v26 = vsel %vm363_vm10, %v7791_v33, %v7729_v34  ;;  %v5926_v24 = vpack.c.bf16 %v3446_v8, %v3443_v63  ;;  %v3303_v33 = vsel %vm363_vm10, %v7795_v49, %v7821_v55  ;;  %v3452_v32 = vld [vmem:[#allocation3 + $0x208] sm:$0xff] }
 0xad2   : > { %v3179_v21 = vpop.permute.xlu0 %3178  ;;  %v3177_v10 = vpop.permute.xlu1 %3176  ;;  %5916 = vmatprep.subr.bf16.mxu1 %v6155_v4  ;;  %5875 = vmatprep.subr.bf16.mxu0 %v5874_v12 }
 0xad3   : > { %3203 = vst.msk [vmem:[#allocation3 + $0x1a8] sm:$0xff] %vm223_vm2, %v3179_v21  ;;  %v3184_v42 = vsel %vm321_vm8, %v7799_v57, %v3177_v10  ;;  %v3185_v46 = vsel %vm321_vm8, %v3177_v10, %v3179_v21  ;;  %5877 = vmatpush1.bf16.msra.mxu0 %v5876_v5 }
 0xad4   : > { %v5878_v13 = vpack.c.bf16 %v3185_v46, %v3183_v61  ;;  %v5880_v41 = vpack.c.bf16 %v3184_v42, %v3182_v35 }
 0xad5   : > { %5918 = vmatpush1.bf16.msra.mxu1 %v5917_v31 }
 0xad6   : > { %v3347_v36 = vpop.permute.xlu0 %3346  ;;  %v7897_v25 = vpop.permute.xlu1 %3350  ;;  %5919 = vmatprep.subr.bf16.mxu1 %v6155_v4  ;;  %v3431_v57 = vld [vmem:[#allocation3 + $0x160] sm:$0xff]  ;;  %5879 = vmatprep.subr.bf16.mxu0 %v5878_v13 }
 0xad7   : > { %3377 = vst.msk [vmem:[#allocation3 + $0x250] sm:$0xff] %vm223_vm2, %v3347_v36  ;;  %v5920_v53 = vpack.c.bf16 %v3434_v37, %v3431_v57  ;;  %5881 = vmatpush1.bf16.msra.mxu0 %v5880_v41  ;;  %v3361_v49 = vsel %vm384_vm11, %v7860_v50, %v3347_v36 }
 0xad8   : > { %5883 = vmatprep.subr.bf16.mxu0 %v5882_v6 }
 0xad9   : > { %5921 = vmatpush1.bf16.msra.mxu1 %v5920_v53 }
 0xada   : > { %v3239_v16 = vpop.permute.xlu0 %3238  ;;  %v3237_v52 = vpop.permute.xlu1 %3236  ;;  %5922 = vmatprep.subr.bf16.mxu1 %v6155_v4  ;;  %v3440_v3 = vld [vmem:[#allocation3 + $0x1a8] sm:$0xff] }
 0xadb   : > { %3263 = vst.msk [vmem:[#allocation3 + $0x1f0] sm:$0xff] %vm223_vm2, %v3239_v16  ;;  %v3244_v43 = vsel %vm342_vm9, %v7801_v40, %v3237_v52  ;;  %v3245_v45 = vsel %vm342_vm9, %v3237_v52, %v3239_v16  ;;  %v5923_v14 = vpack.c.bf16 %v3440_v3, %v3437_v17  ;;  %5885 = vmatpush1.bf16.msra.mxu0 %v5884_v19 }
 0xadc   : > { %v5886_v34 = vpack.c.bf16 %v3301_v26, %v3245_v45  ;;  %v5888_v30 = vpack.c.bf16 %v3300_v59, %v3244_v43 }
 0xadd   : > { %5924 = vmatpush1.bf16.msra.mxu1 %v5923_v14 }
 0xade   : > { %v3299_v56 = vpop.permute.xlu0 %3298  ;;  %v3297_v39 = vpop.permute.xlu1 %3296  ;;  %5925 = vmatprep.subr.bf16.mxu1 %v6155_v4  ;;  %5887 = vmatprep.subr.bf16.mxu0 %v5886_v34  ;;  %v3461_v46 = vld [vmem:[#allocation3 + $0x250] sm:$0xff] }
 0xadf   : > { %3323 = vst.msk [vmem:[#allocation3 + $0x238] sm:$0xff] %vm223_vm2, %v3299_v56  ;;  %v3304_v40 = vsel %vm363_vm10, %v7858_v54, %v3297_v39  ;;  %v3305_v11 = vsel %vm363_vm10, %v3297_v39, %v3299_v56  ;;  %5889 = vmatpush1.bf16.msra.mxu0 %v5888_v30 }
 0xae0   : > { %v5890_v22 = vpack.c.bf16 %v3305_v11, %v3303_v33  ;;  %v5892_v27 = vpack.c.bf16 %v3304_v40, %v3302_v60 }
 0xae1   : > { %5927 = vmatpush1.bf16.msra.mxu1 %v5926_v24 }
 0xae2   : > { %v3353_v44 = vpop.permute.xlu0 %3352  ;;  %v3343_v47 = vpop.permute.xlu1 %3342  ;;  %5928 = vmatprep.subr.bf16.mxu1 %v6155_v4  ;;  %v3449_v55 = vld [vmem:[#allocation3 + $0x1f0] sm:$0xff]  ;;  %5891 = vmatprep.subr.bf16.mxu0 %v5890_v22  ;;  %v5464_v22 = vld [vmem:[%s8806_s2 + $0x30] sm:$0xff] }
 0xae3   : > { %v3363_v62 = vsel %vm384_vm11, %v7897_v25, %v3353_v44  ;;  %3380 = vst.msk [vmem:[#allocation3 + $0x268] sm:$0xff] %vm223_vm2, %v3353_v44  ;;  %v5929_v54 = vpack.c.bf16 %v3452_v32, %v3449_v55  ;;  %5893 = vmatpush1.bf16.msra.mxu0 %v5892_v27  ;;  %v3360_v21 = vsel %vm384_vm11, %v3343_v47, %v7860_v50 }
 0xae4   : > { %v5894_v9 = vpack.c.bf16 %v3363_v62, %v3361_v49 }
 0xae5   : > { %5930 = vmatpush1.bf16.msra.mxu1 %v5929_v54 }
 0xae6   : > { %v3349_v12 = vpop.permute.xlu0 %3348  ;;  %v3357_v5 = vpop.permute.xlu1 %3356  ;;  %5931 = vmatprep.subr.bf16.mxu1 %v6155_v4  ;;  %v3458_v61 = vld [vmem:[#allocation3 + $0x238] sm:$0xff]  ;;  %5895 = vmatprep.subr.bf16.mxu0 %v5894_v9 }
 0xae7   : > { %v3362_v10 = vsel %vm384_vm11, %v3349_v12, %v7897_v25  ;;  %v5932_v31 = vpack.c.bf16 %v3458_v61, %v3455_v18 }
 0xae8   : > { %v5896_v35 = vpack.c.bf16 %v3362_v10, %v3360_v21 }
 0xae9   : > { %5933 = vmatpush1.bf16.msra.mxu1 %v5932_v31 }
 0xaea   : > { %v3359_v58 = vpop.permute.xlu0 %3358  ;;  %v3355_v42 = vpop.permute.xlu1 %3354  ;;  %5934 = vmatprep.subr.bf16.mxu1 %v6155_v4  ;;  %v3464_v13 = vld [vmem:[#allocation3 + $0x268] sm:$0xff]  ;;  %5897 = vmatpush1.bf16.msra.mxu0 %v5896_v35 }
 0xaeb   : > { %v3365_v41 = vsel %vm384_vm11, %v3357_v5, %v3359_v58  ;;  %3383 = vst.msk [vmem:[#allocation3 + $0x280] sm:$0xff] %vm223_vm2, %v3359_v58  ;;  %v5935_v38 = vpack.c.bf16 %v3464_v13, %v3461_v46  ;;  %v3364_v50 = vsel %vm384_vm11, %v3355_v42, %v3357_v5 }
 0xaec   : > { %3541 = vmatprep.subr.mxu0 %v3365_v41 }
 0xaed   : > { %5936 = vmatpush1.bf16.msra.mxu1 %v5935_v38 }
 0xaee   : > { %v3481_v51 = vpop.permute.xlu0 %3480  ;;  %v3483_v36 = vpop.permute.xlu1 %3482  ;;  %3612 = vmatprep.subr.mxu1 %v6154_v0  ;;  %3542 = vmatpush1.msra.mxu0 %v3364_v50 }
 0xaef   : > { %v3485_v25 = vsel %vm1777_vm1, %v3481_v51, %v3483_v36 }
 0xaf0   : > { %5461 = vmatprep.mubr.msk.f32.mxu0 %vm8818_vm3, %v3485_v25  ;;  %5462 = vmatprep.mubr.msk.f32.mxu1 %vm8819_vm12, %v3485_v25  ;;  %vm8821_vm3 = vcmask 588800  }
 0xaf1   : > { %vm8822_vm12 = vmmov %vm8821_vm3 }
 0xaf2   : > { %v3479_v57 = vpop.permute.xlu0 %3478  ;;  %v3467_v37 = vld [vmem:[#allocation3 + $0x280] sm:$0xff] }
 0xaf3   : > { %v3484_v6 = vsel %vm1777_vm1, %v3479_v57, %v3481_v51  ;;  %3613 = vmatpush1.msra.mxu1 %v3467_v37 }
 0xaf4   : > { %3625 = vmatmul.mubr.f32.vlgmr.msra.gmra.mrb[10].mxu1 %v3484_v6  ;;  %3554 = vmatmul.mubr.f32.vlgmr.msra.gmra.mrb[10].mxu0 %v3484_v6 }
 0xaf5   : > { %5953 = vmatprep.subr.bf16.mxu1 %v6155_v4  ;;  %5570 = vmatprep.mubr.msk.f32.mxu1 %vm8820_vm0, %v6154_v0  ;;  %vm8823_vm0 = vcmask 130048  }
 0xaf6   : > { %3928 = vmatprep.mubr.f32.mxu0 %v6154_v0 }
 0xaff   : > { %v3473_v53 = vpop.permute.xlu1 %3472 }
 0xbc7   : > { %v3626_v23 = vpop.f32.mrb[10].mxu1  ;;  %v3555_v19 = vpop.f32.mrb[10].mxu0 }
 0xbc8   : > { %v3627_v26 = vadd.f32 %v3626_v23, %v3473_v53  ;;  %v3628_v16 = vpop.f32.mrb[11].mxu1  ;;  %v3556_v52 = vadd.f32 %v3555_v19, %v3473_v53  ;;  %v3557_v17 = vpop.f32.mrb[11].mxu0 }
 0xbc9   : > { %v3558_v3 = vadd.f32 %v3557_v17, %v3473_v53 }
 0xbca   : > { %v3630_v59 = vmul.f32 %v3556_v52, %v6335_v20  ;;  %v3632_v45 = vmul.f32 %v3627_v26, %v6340_v29 }
 0xbcb   : > { %v3631_v43 = vmul.f32 %v3558_v3, %v6338_v28 }
 0xbcc   : > { %v3636_v14 = vmul.f32 0.2, %v3630_v59  ;;  %v3638_v34 = vmul.f32 0.2, %v3632_v45 }
 0xbcd   : > { %v3637_v8 = vmul.f32 0.2, %v3631_v43 }
 0xbce   : > { %3642 = vrot.lane.b32.xlu0 %v3636_v14, %s6166_s9 }
 0xbcf   : > { %3644 = vrot.lane.b32.xlu1 %v3637_v8, %s6166_s9 }
 0xbd2   : > { %3646 = vrot.lane.b32.xlu0 %v3638_v34, %s6166_s9 }
 0xc40   : > { %v3643_v30 = vpop.permute.xlu0 %3642 }
 0xc41   : > { %v3653_v63 = vadd.f32 %v3643_v30, %v7613_v7  ;;  %v3645_v56 = vpop.permute.xlu1 %3644 }
 0xc42   : > { %v3648_v39 = vsel %vm600_vm14, %v3643_v30, %v3645_v56 }
 0xc43   : > { %3656 = vst.msk [vmem:[#allocation2] sm:$0xff] %vm606_vm13, %v3653_v63  ;;  %v7960_v24 = vadd.f32 %v3648_v39, %v7605_v15 }
 0xc44   : > { %v3647_v33 = vpop.permute.xlu0 %3646 }
 0xc45   : > { %3657 = vst [vmem:[#allocation2 + $0x8] sm:$0xff] %v7960_v24  ;;  %v3649_v60 = vsel %vm600_vm14, %v3645_v56, %v3647_v33 }
 0xc46   : > { %v3655_v40 = vadd.f32 %v3649_v60, %v7593_v48 }
 0xc48   : > { %3658 = vst.msk [vmem:[#allocation2 + $0x10] sm:$0xff] %vm609_vm15, %v3655_v40 }
 0xc4a   : > { %v7966_v11 = vld [vmem:[#allocation2] sm:$0xff] }
 0xc4b   : > { %3691 = vrot.lane.b32.xlu0 %v7966_v11, %s6157_s22  ;;  %3671 = vrot.lane.b32.xlu1 %v7966_v11, %s6156_s21  ;;  %4600 = vst [vmem:[#allocation3] sm:$0xff] %v7966_v11 }
 0xc4f   : > { %3731 = vrot.lane.b32.xlu0 %v7966_v11, %s6159_s24  ;;  %3711 = vrot.lane.b32.xlu1 %v7966_v11, %s6158_s23  ;;  %v7977_v15 = vld [vmem:[#allocation2 + $0x10] sm:$0xff] }
 0xc50   : > { %3664 = vst.msk [vmem:[#allocation3 + $0x10] sm:$0xff] %vm223_vm2, %v7977_v15 }
 0xc53   : > { %3771 = vrot.lane.b32.xlu0 %v7966_v11, %s6161_s26  ;;  %3751 = vrot.lane.b32.xlu1 %v7966_v11, %s6160_s25 }
 0xc57   : > { %3673 = vrot.lane.b32.xlu1 %v7960_v24, %s6156_s21  ;;  %3675 = vrot.lane.b32.xlu0 %v7977_v15, %s6156_s21  ;;  %v3829_v48 = vld [vmem:[#allocation3 + $0x10] sm:$0xff] }
 0xc58   : > { %4033 = vst.msk [vmem:[#allocation3 + $0x10] sm:$0xff] %vm223_vm2, %v7977_v15 }
 0xc5b   : > { %3695 = vrot.lane.b32.xlu1 %v7977_v15, %s6157_s22  ;;  %3693 = vrot.lane.b32.xlu0 %v7960_v24, %s6157_s22 }
 0xc5f   : > { %3715 = vrot.lane.b32.xlu1 %v7977_v15, %s6158_s23  ;;  %3713 = vrot.lane.b32.xlu0 %v7960_v24, %s6158_s23  ;;  %v7999_v7 = vld [vmem:[#allocation3 + $0x10] sm:$0xff] }
 0xc60   : > { %4602 = vst.msk [vmem:[#allocation3 + $0x10] sm:$0xff] %vm223_vm2, %v7977_v15 }
 0xc63   : > { %3735 = vrot.lane.b32.xlu1 %v7977_v15, %s6159_s24  ;;  %3733 = vrot.lane.b32.xlu0 %v7960_v24, %s6159_s24 }
 0xc67   : > { %3755 = vrot.lane.b32.xlu1 %v7977_v15, %s6160_s25  ;;  %3753 = vrot.lane.b32.xlu0 %v7960_v24, %s6160_s25 }
 0xc6b   : > { %3775 = vrot.lane.b32.xlu1 %v7977_v15, %s6161_s26  ;;  %3773 = vrot.lane.b32.xlu0 %v7960_v24, %s6161_s26 }
 0xc6f   : > { %3795 = vrot.lane.b32.xlu1 %v7977_v15, %s6162_s27  ;;  %3793 = vrot.lane.b32.xlu0 %v7960_v24, %s6162_s27 }
 0xc73   : > { %3791 = vrot.lane.b32.xlu1 %v7966_v11, %s6162_s27  ;;  %3813 = vrot.lane.b32.xlu0 %v7960_v24, %s6164_s28 }
 0xc77   : > { %3815 = vrot.lane.b32.xlu1 %v7977_v15, %s6164_s28  ;;  %3811 = vrot.lane.b32.xlu0 %v7966_v11, %s6164_s28 }
 0xc7b   : > { %3858 = vperm.xlu1 %6144, %v5464_v22  }
 0xcbd   : > { %v3672_v27 = vpop.permute.xlu1 %3671  ;;  %v3692_v44 = vpop.permute.xlu0 %3691 }
 0xcc1   : > { %v3712_v47 = vpop.permute.xlu1 %3711  ;;  %v3732_v55 = vpop.permute.xlu0 %3731 }
 0xcc5   : > { %v3752_v32 = vpop.permute.xlu1 %3751  ;;  %v8030_v49 = vpop.permute.xlu0 %3771 }
 0xcc9   : > { %v3674_v62 = vpop.permute.xlu1 %3673  ;;  %v3676_v54 = vpop.permute.xlu0 %3675 }
 0xcca   : > { %v3677_v9 = vsel %vm237_vm5, %v3672_v27, %v3674_v62  ;;  %v3678_v12 = vsel %vm237_vm5, %v3674_v62, %v3676_v54  ;;  %3684 = vst.msk [vmem:[#allocation3 + $0x28] sm:$0xff] %vm223_vm2, %v3676_v54  ;;  %v8064_v62 = vld [vmem:[%s8805_s1 + $0x40] sm:$0xff] }
 0xccb   : > { %v5937_v5 = vpack.c.bf16 %v3678_v12, %v7960_v24  ;;  %v5939_v18 = vpack.c.bf16 %v3677_v9, %v7966_v11 }
 0xccd   : > { %v3696_v61 = vpop.permute.xlu1 %3695  ;;  %v3694_v21 = vpop.permute.xlu0 %3693  ;;  %5938 = vmatprep.subr.bf16.mxu0 %v5937_v5 }
 0xcce   : > { %3704 = vst.msk [vmem:[#allocation3 + $0x40] sm:$0xff] %vm223_vm2, %v3696_v61  ;;  %5940 = vmatpush1.bf16.msra.mxu0 %v5939_v18  ;;  %v3697_v10 = vsel %vm258_vm6, %v3692_v44, %v3694_v21  ;;  %v3698_v42 = vsel %vm258_vm6, %v3694_v21, %v3696_v61 }
 0xcd1   : > { %v3716_v31 = vpop.permute.xlu1 %3715  ;;  %v3714_v35 = vpop.permute.xlu0 %3713  ;;  %v3832_v58 = vld [vmem:[#allocation3 + $0x28] sm:$0xff] }
 0xcd2   : > { %3724 = vst.msk [vmem:[#allocation3 + $0x58] sm:$0xff] %vm223_vm2, %v3716_v31  ;;  %v3717_v46 = vsel %vm279_vm4, %v3712_v47, %v3714_v35  ;;  %v3718_v13 = vsel %vm279_vm4, %v3714_v35, %v3716_v31  ;;  %v5954_v41 = vpack.c.bf16 %v3832_v58, %v3829_v48 }
 0xcd3   : > { %v5941_v38 = vpack.c.bf16 %v3718_v13, %v3698_v42  ;;  %v5943_v50 = vpack.c.bf16 %v3717_v46, %v3697_v10 }
 0xcd4   : > { %5955 = vmatpush3.bf16.msra.mxu1 %v5954_v41 }
 0xcd5   : > { %v3736_v51 = vpop.permute.xlu1 %3735  ;;  %v3734_v36 = vpop.permute.xlu0 %3733  ;;  %5956 = vmatprep.subr.bf16.mxu1 %v6155_v4  ;;  %5942 = vmatprep.subr.bf16.mxu0 %v5941_v38  ;;  %v3835_v6 = vld [vmem:[#allocation3 + $0x40] sm:$0xff] }
 0xcd6   : > { %3744 = vst.msk [vmem:[#allocation3 + $0x70] sm:$0xff] %vm223_vm2, %v3736_v51  ;;  %5944 = vmatpush1.bf16.msra.mxu0 %v5943_v50  ;;  %v3737_v25 = vsel %vm300_vm7, %v3732_v55, %v3734_v36  ;;  %v3738_v23 = vsel %vm300_vm7, %v3734_v36, %v3736_v51 }
 0xcd9   : > { %v3756_v57 = vpop.permute.xlu1 %3755  ;;  %v3754_v37 = vpop.permute.xlu0 %3753  ;;  %v3838_v53 = vld [vmem:[#allocation3 + $0x58] sm:$0xff] }
 0xcda   : > { %3764 = vst.msk [vmem:[#allocation3 + $0x88] sm:$0xff] %vm223_vm2, %v3756_v57  ;;  %v3757_v19 = vsel %vm321_vm8, %v3752_v32, %v3754_v37  ;;  %v3758_v26 = vsel %vm321_vm8, %v3754_v37, %v3756_v57  ;;  %v5957_v16 = vpack.c.bf16 %v3838_v53, %v3835_v6 }
 0xcdb   : > { %v5945_v52 = vpack.c.bf16 %v3758_v26, %v3738_v23  ;;  %v5947_v17 = vpack.c.bf16 %v3757_v19, %v3737_v25 }
 0xcdc   : > { %5958 = vmatpush3.bf16.msra.mxu1 %v5957_v16 }
 0xcdd   : > { %v3776_v3 = vpop.permute.xlu1 %3775  ;;  %v3774_v59 = vpop.permute.xlu0 %3773  ;;  %5959 = vmatprep.subr.bf16.mxu1 %v6155_v4  ;;  %5946 = vmatprep.subr.bf16.mxu0 %v5945_v52  ;;  %v3841_v14 = vld [vmem:[#allocation3 + $0x70] sm:$0xff] }
 0xcde   : > { %3784 = vst.msk [vmem:[#allocation3 + $0xa0] sm:$0xff] %vm223_vm2, %v3776_v3  ;;  %5948 = vmatpush1.bf16.msra.mxu0 %v5947_v17  ;;  %v3778_v34 = vsel %vm342_vm9, %v3774_v59, %v3776_v3  ;;  %v3777_v60 = vsel %vm342_vm9, %v8030_v49, %v3774_v59 }
 0xce1   : > { %v3796_v43 = vpop.permute.xlu1 %3795  ;;  %v3794_v45 = vpop.permute.xlu0 %3793  ;;  %v3844_v8 = vld [vmem:[#allocation3 + $0x88] sm:$0xff] }
 0xce2   : > { %3804 = vst.msk [vmem:[#allocation3 + $0xb8] sm:$0xff] %vm223_vm2, %v3796_v43  ;;  %v3798_v30 = vsel %vm363_vm10, %v3794_v45, %v3796_v43  ;;  %v5960_v63 = vpack.c.bf16 %v3844_v8, %v3841_v14  ;;  %v5469_v43 = vld [vmem:[%s8806_s2 + $0x38] sm:$0xff] }
 0xce3   : > { %v5949_v56 = vpack.c.bf16 %v3798_v30, %v3778_v34 }
 0xce4   : > { %5961 = vmatpush3.bf16.msra.mxu1 %v5960_v63 }
 0xce5   : > { %v3792_v39 = vpop.permute.xlu1 %3791  ;;  %v3814_v33 = vpop.permute.xlu0 %3813  ;;  %5962 = vmatprep.subr.bf16.mxu1 %v6155_v4  ;;  %5950 = vmatprep.subr.bf16.mxu0 %v5949_v56  ;;  %v3847_v44 = vld [vmem:[#allocation3 + $0xa0] sm:$0xff] }
 0xce6   : > { %v3797_v40 = vsel %vm363_vm10, %v3792_v39, %v3794_v45  ;;  %v8270_v56 = vld [vmem:[%s8805_s1 + $0x48] sm:$0xff] }
 0xce7   : > { %v5951_v48 = vpack.c.bf16 %v3797_v40, %v3777_v60 }
 0xce9   : > { %v3816_v22 = vpop.permute.xlu1 %3815  ;;  %v3812_v27 = vpop.permute.xlu0 %3811  ;;  %v3850_v47 = vld [vmem:[#allocation3 + $0xb8] sm:$0xff]  ;;  %5952 = vmatpush1.bf16.msra.mxu0 %v5951_v48 }
 0xcea   : > { %v3818_v55 = vsel %vm384_vm11, %v3814_v33, %v3816_v22  ;;  %3824 = vst.msk [vmem:[#allocation3 + $0xd0] sm:$0xff] %vm223_vm2, %v3816_v22  ;;  %v5963_v32 = vpack.c.bf16 %v3850_v47, %v3847_v44  ;;  %v3817_v49 = vsel %vm384_vm11, %v3812_v27, %v3814_v33 }
 0xceb   : > { %3880 = vmatprep.subr.mxu0 %v3818_v55 }
 0xcec   : > { %5964 = vmatpush3.bf16.msra.mxu1 %v5963_v32 }
 0xced   : > { %5568 = vmatprep.subr.mxu1 %v6154_v0  ;;  %3881 = vmatpush1.msra.mxu0 %v3817_v49 }
 0xcee   : > { %5465 = vmatmul.mubr.msk.f32.vlgmr.msra.gmra.mrb[12].mxu0 %vm8821_vm3, %v8064_v62  ;;  %vm8824_vm3 = vmmov %vm8823_vm0 }
 0xcf1   : > { %v3853_v54 = vld [vmem:[#allocation3 + $0xd0] sm:$0xff] }
 0xcf2   : > { %5569 = vmatpush3.msra.mxu1 %v3853_v54 }
 0xcf3   : > { %5571 = vmatmul.mubr.msk.f32.vlgmr.msra.gmra.mrb[12].mxu1 %vm8822_vm12, %v8064_v62  ;;  %6001 = vmatprep.subr.bf16.mxu1 %v6155_v4  ;;  %vm8825_vm12 = vcmask 457728  }
 0xcfa   : > { %v3859_v12 = vpop.permute.xlu1 %3858 }
 0xdc1   : > { %v3930_v9 = vpop.f32.mrb[12].mxu0 }
 0xdc2   : > { %v3932_v5 = vpop.f32.mrb[13].mxu0  ;;  %v3931_v58 = vadd.f32 %v3930_v9, %v3859_v12 }
 0xdc3   : > { %v3933_v18 = vadd.f32 %v3932_v5, %v3859_v12 }
 0xdc4   : > { %v4005_v42 = vmul.f32 %v3931_v58, %v6335_v20 }
 0xdc5   : > { %v4006_v61 = vmul.f32 %v3933_v18, %v6338_v28 }
 0xdc6   : > { %v4001_v21 = vpop.f32.mrb[12].mxu1 }
 0xdc7   : > { %v4002_v10 = vadd.f32 %v4001_v21, %v3859_v12  ;;  %v5572_v31 = vpop.f32.mrb[13].mxu1  ;;  %4013 = vrot.lane.b32.xlu1 %v4006_v61, %s6166_s9 }
 0xdc9   : > { %v4007_v35 = vmul.f32 %v4002_v10, %v6340_v29 }
 0xdcb   : > { %4015 = vrot.lane.b32.xlu0 %v4007_v35, %s6166_s9  ;;  %4051 = vrot.lane.b32.xlu1 %v7960_v24, %s6156_s21 }
 0xdcf   : > { %4011 = vrot.lane.b32.xlu0 %v4005_v42, %s6166_s9  ;;  %4049 = vrot.lane.b32.xlu1 %v7966_v11, %s6156_s21 }
 0xdd3   : > { %4053 = vrot.lane.b32.xlu0 %v7977_v15, %s6156_s21  ;;  %4091 = vrot.lane.b32.xlu1 %v7960_v24, %s6157_s22 }
 0xdd7   : > { %4093 = vrot.lane.b32.xlu0 %v7977_v15, %s6157_s22  ;;  %4089 = vrot.lane.b32.xlu1 %v7966_v11, %s6157_s22 }
 0xddb   : > { %4133 = vrot.lane.b32.xlu0 %v7977_v15, %s6158_s23  ;;  %4131 = vrot.lane.b32.xlu1 %v7960_v24, %s6158_s23 }
 0xddf   : > { %4173 = vrot.lane.b32.xlu0 %v7977_v15, %s6159_s24  ;;  %4129 = vrot.lane.b32.xlu1 %v7966_v11, %s6158_s23 }
 0xde3   : > { %4213 = vrot.lane.b32.xlu0 %v7977_v15, %s6160_s25  ;;  %4171 = vrot.lane.b32.xlu1 %v7960_v24, %s6159_s24 }
 0xde7   : > { %4253 = vrot.lane.b32.xlu0 %v7977_v15, %s6161_s26  ;;  %4169 = vrot.lane.b32.xlu1 %v7966_v11, %s6159_s24 }
 0xdeb   : > { %4293 = vrot.lane.b32.xlu0 %v7977_v15, %s6162_s27  ;;  %4211 = vrot.lane.b32.xlu1 %v7960_v24, %s6160_s25 }
 0xdef   : > { %4333 = vrot.lane.b32.xlu0 %v7977_v15, %s6164_s28  ;;  %4209 = vrot.lane.b32.xlu1 %v7966_v11, %s6160_s25 }
 0xdf3   : > { %4251 = vrot.lane.b32.xlu1 %v7960_v24, %s6161_s26 }
 0xdf7   : > { %4249 = vrot.lane.b32.xlu1 %v7966_v11, %s6161_s26 }
 0xdfb   : > { %4291 = vrot.lane.b32.xlu1 %v7960_v24, %s6162_s27 }
 0xdff   : > { %4289 = vrot.lane.b32.xlu1 %v7966_v11, %s6162_s27 }
 0xe03   : > { %4331 = vrot.lane.b32.xlu1 %v7960_v24, %s6164_s28 }
 0xe39   : > { %v4014_v13 = vpop.permute.xlu1 %4013 }
 0xe3d   : > { %v4016_v46 = vpop.permute.xlu0 %4015  ;;  %v8200_v52 = vpop.permute.xlu1 %4051 }
 0xe3e   : > { %v4018_v41 = vsel %vm600_vm14, %v4014_v13, %v4016_v46 }
 0xe3f   : > { %4024 = vst.msk [vmem:[#allocation2 + $0x28] sm:$0xff] %vm609_vm15, %v4018_v41 }
 0xe41   : > { %v4012_v38 = vpop.permute.xlu0 %4011  ;;  %v8216_v59 = vpop.permute.xlu1 %4049 }
 0xe42   : > { %v8128_v50 = vsel %vm600_vm14, %v4012_v38, %v4014_v13  ;;  %4022 = vst.msk [vmem:[#allocation2 + $0x18] sm:$0xff] %vm606_vm13, %v4012_v38  ;;  %v4061_v35 = vsel %vm237_vm5, %v8216_v59, %v8200_v52 }
 0xe43   : > { %4023 = vst [vmem:[#allocation2 + $0x20] sm:$0xff] %v8128_v50  ;;  %4057 = vrot.lane.b32.xlu1 %v8128_v50, %s6156_s21  ;;  %v8136_v51 = vpack.c.bf16 %v8128_v50, %v7960_v24 }
 0xe45   : > { %v8138_v36 = vpop.permute.xlu0 %4053  ;;  %5966 = vmatprep.subr.bf16.mxu0 %v8136_v51  ;;  %v8227_v45 = vpop.permute.xlu1 %4091 }
 0xe46   : > { %4073 = vst.msk [vmem:[#allocation3 + $0x40] sm:$0xff] %vm223_vm2, %v8138_v36  ;;  %v8143_v25 = vld [vmem:[#allocation2 + $0x28] sm:$0xff]  ;;  %v4062_v10 = vsel %vm237_vm5, %v8200_v52, %v8138_v36 }
 0xe47   : > { %4097 = vrot.lane.b32.xlu1 %v8128_v50, %s6157_s22  ;;  %4036 = vst.msk [vmem:[#allocation3 + $0x28] sm:$0xff] %vm223_vm2, %v8143_v25 }
 0xe49   : > { %v8149_v57 = vpop.permute.xlu0 %4093  ;;  %v8151_v37 = vld [vmem:[#allocation2 + $0x18] sm:$0xff]  ;;  %v8233_v14 = vpop.permute.xlu1 %4089 }
 0xe4a   : > { %4113 = vst.msk [vmem:[#allocation3 + $0x70] sm:$0xff] %vm223_vm2, %v8149_v57  ;;  %4055 = vrot.lane.b32.xlu0 %v8151_v37, %s6156_s21  ;;  %v8159_v6 = vpack.c.bf16 %v8151_v37, %v7966_v11  ;;  %v4102_v38 = vsel %vm258_vm6, %v8227_v45, %v8149_v57 }
 0xe4b   : > { %4137 = vrot.lane.b32.xlu1 %v8128_v50, %s6158_s23 }
 0xe4c   : > { %5968 = vmatpush1.bf16.msra.mxu0 %v8159_v6 }
 0xe4d   : > { %v8164_v53 = vpop.permute.xlu0 %4133  ;;  %v8241_v8 = vpop.permute.xlu1 %4131 }
 0xe4e   : > { %4153 = vst.msk [vmem:[#allocation3 + $0xa0] sm:$0xff] %vm223_vm2, %v8164_v53  ;;  %4095 = vrot.lane.b32.xlu0 %v8151_v37, %s6157_s22  ;;  %v4364_v23 = vld [vmem:[#allocation3 + $0x28] sm:$0xff]  ;;  %v4142_v57 = vsel %vm279_vm4, %v8241_v8, %v8164_v53 }
 0xe4f   : > { %v6002_v19 = vpack.c.bf16 %v4364_v23, %v7999_v7  ;;  %4605 = vst.msk [vmem:[#allocation3 + $0x28] sm:$0xff] %vm223_vm2, %v8143_v25  ;;  %4177 = vrot.lane.b32.xlu1 %v8128_v50, %s6159_s24  ;;  %v4101_v23 = vsel %vm258_vm6, %v8233_v14, %v8227_v45 }
 0xe51   : > { %v8175_v26 = vpop.permute.xlu0 %4173  ;;  %6003 = vmatpush1.bf16.msra.mxu1 %v6002_v19  ;;  %v8249_v34 = vpop.permute.xlu1 %4129 }
 0xe52   : > { %4193 = vst.msk [vmem:[#allocation3 + $0xd0] sm:$0xff] %vm223_vm2, %v8175_v26  ;;  %4135 = vrot.lane.b32.xlu0 %v8151_v37, %s6158_s23  ;;  %6004 = vmatprep.subr.bf16.mxu1 %v6155_v4  ;;  %v4141_v45 = vsel %vm279_vm4, %v8249_v34, %v8241_v8 }
 0xe53   : > { %4217 = vrot.lane.b32.xlu1 %v8128_v50, %s6160_s25 }
 0xe55   : > { %v8184_v7 = vpop.permute.xlu0 %4213  ;;  %v8257_v30 = vpop.permute.xlu1 %4171 }
 0xe56   : > { %4233 = vst.msk [vmem:[#allocation3 + $0x100] sm:$0xff] %vm223_vm2, %v8184_v7  ;;  %4175 = vrot.lane.b32.xlu0 %v8151_v37, %s6159_s24 }
 0xe57   : > { %4257 = vrot.lane.b32.xlu1 %v8128_v50, %s6161_s26 }
 0xe59   : > { %v8192_v16 = vpop.permute.xlu0 %4253  ;;  %v8265_v63 = vpop.permute.xlu1 %4169 }
 0xe5a   : > { %4273 = vst.msk [vmem:[#allocation3 + $0x130] sm:$0xff] %vm223_vm2, %v8192_v16  ;;  %4215 = vrot.lane.b32.xlu0 %v8151_v37, %s6160_s25  ;;  %v4181_v34 = vsel %vm300_vm7, %v8265_v63, %v8257_v30 }
 0xe5b   : > { %4297 = vrot.lane.b32.xlu1 %v8128_v50, %s6162_s27 }
 0xe5d   : > { %v8202_v17 = vpop.permute.xlu0 %4293  ;;  %v8278_v39 = vpop.permute.xlu1 %4211 }
 0xe5e   : > { %4313 = vst.msk [vmem:[#allocation3 + $0x160] sm:$0xff] %vm223_vm2, %v8202_v17  ;;  %4255 = vrot.lane.b32.xlu0 %v8151_v37, %s6161_s26 }
 0xe5f   : > { %4337 = vrot.lane.b32.xlu1 %v8128_v50, %s6164_s28 }
 0xe61   : > { %v8210_v3 = vpop.permute.xlu0 %4333  ;;  %v8284_v33 = vpop.permute.xlu1 %4209 }
 0xe62   : > { %4353 = vst.msk [vmem:[#allocation3 + $0x190] sm:$0xff] %vm223_vm2, %v8210_v3  ;;  %4295 = vrot.lane.b32.xlu0 %v8151_v37, %s6162_s27  ;;  %v4221_v63 = vsel %vm321_vm8, %v8284_v33, %v8278_v39 }
 0xe63   : > { %4329 = vrot.lane.b32.xlu1 %v7966_v11, %s6164_s28 }
 0xe65   : > { %v8288_v60 = vpop.permute.xlu1 %4251 }
 0xe66   : > { %4059 = vrot.lane.b32.xlu0 %v8143_v25, %s6156_s21 }
 0xe67   : > { %4422 = vrot.lane.b32.xlu1 %v8064_v62, %s6167_s10 }
 0xe69   : > { %v8294_v40 = vpop.permute.xlu1 %4249 }
 0xe6a   : > { %4099 = vrot.lane.b32.xlu0 %v8143_v25, %s6157_s22 }
 0xe6b   : > { %4417 = vperm.xlu1 %6144, %v5469_v43  }
 0xe6e   : > { %4139 = vrot.lane.b32.xlu0 %v8143_v25, %s6158_s23 }
 0xe6f   : > { %4629 = vrot.lane.b32.xlu1 %v7960_v24, %s6156_s21 }
 0xe72   : > { %4179 = vrot.lane.b32.xlu0 %v8143_v25, %s6159_s24 }
 0xe73   : > { %4627 = vrot.lane.b32.xlu1 %v7966_v11, %s6156_s21 }
 0xe76   : > { %4219 = vrot.lane.b32.xlu0 %v8143_v25, %s6160_s25 }
 0xe77   : > { %4691 = vrot.lane.b32.xlu1 %v7977_v15, %s6157_s22 }
 0xe7a   : > { %4259 = vrot.lane.b32.xlu0 %v8143_v25, %s6161_s26 }
 0xe7b   : > { %4693 = vrot.lane.b32.xlu1 %v8151_v37, %s6157_s22 }
 0xe7e   : > { %4299 = vrot.lane.b32.xlu0 %v8143_v25, %s6162_s27 }
 0xe7f   : > { %4751 = vrot.lane.b32.xlu1 %v7977_v15, %s6158_s23 }
 0xe82   : > { %4339 = vrot.lane.b32.xlu0 %v8143_v25, %s6164_s28 }
 0xe83   : > { %4747 = vrot.lane.b32.xlu1 %v7966_v11, %s6158_s23 }
 0xe86   : > { %4335 = vrot.lane.b32.xlu0 %v8151_v37, %s6164_s28 }
 0xe87   : > { %4637 = vrot.lane.b32.xlu1 %v8143_v25, %s6156_s21 }
 0xe8a   : > { %4424 = vrot.lane.b32.xlu0 %v8270_v56, %s6167_s10 }
 0xe8b   : > { %4697 = vrot.lane.b32.xlu1 %v8143_v25, %s6157_s22 }
 0xe8e   : > { %4631 = vrot.lane.b32.xlu0 %v7977_v15, %s6156_s21  ;;  %v8298_v15 = vpop.permute.xlu1 %4291 }
 0xe92   : > { %4633 = vrot.lane.b32.xlu0 %v8151_v37, %s6156_s21  ;;  %v8302_v48 = vpop.permute.xlu1 %4289 }
 0xe96   : > { %4689 = vrot.lane.b32.xlu0 %v7960_v24, %s6157_s22  ;;  %v8304_v22 = vpop.permute.xlu1 %4331 }
 0xe9a   : > { %4687 = vrot.lane.b32.xlu0 %v7966_v11, %s6157_s22 }
 0xe9e   : > { %4749 = vrot.lane.b32.xlu0 %v7960_v24, %s6158_s23 }
 0xea2   : > { %4635 = vrot.lane.b32.xlu0 %v8128_v50, %s6156_s21 }
 0xea6   : > { %4695 = vrot.lane.b32.xlu0 %v8128_v50, %s6157_s22 }
 0xeb5   : > { %v4058_v27 = vpop.permute.xlu1 %4057 }
 0xeb9   : > { %v4098_v44 = vpop.permute.xlu1 %4097 }
 0xebc   : > { %v4056_v11 = vpop.permute.xlu0 %4055 }
 0xebd   : > { %v4138_v47 = vpop.permute.xlu1 %4137  ;;  %v4063_v61 = vsel %vm237_vm5, %v4056_v11, %v4058_v27  ;;  %v4367_v11 = vld [vmem:[#allocation3 + $0x40] sm:$0xff] }
 0xebe   : > { %v5971_v46 = vpack.c.bf16 %v4063_v61, %v4061_v35  ;;  %v4182_v35 = vsel %vm300_vm7, %v8257_v30, %v8175_v26  ;;  %v4379_v26 = vld [vmem:[#allocation3 + $0xa0] sm:$0xff] }
 0xec0   : > { %v4096_v55 = vpop.permute.xlu0 %4095 }
 0xec1   : > { %v4178_v24 = vpop.permute.xlu1 %4177  ;;  %v4103_v13 = vsel %vm258_vm6, %v4096_v55, %v4098_v44 }
 0xec2   : > { %v5975_v52 = vpack.c.bf16 %v4103_v13, %v4101_v23 }
 0xec4   : > { %v4136_v32 = vpop.permute.xlu0 %4135 }
 0xec5   : > { %v8306_v49 = vpop.permute.xlu1 %4217  ;;  %v4143_v59 = vsel %vm279_vm4, %v4136_v32, %v4138_v47 }
 0xec6   : > { %v5979_v32 = vpack.c.bf16 %v4143_v59, %v4141_v45  ;;  %v4302_v45 = vsel %vm363_vm10, %v8298_v15, %v8202_v17 }
 0xec8   : > { %v4176_v62 = vpop.permute.xlu0 %4175 }
 0xec9   : > { %v8308_v9 = vpop.permute.xlu1 %4257 }
 0xecc   : > { %v4216_v54 = vpop.permute.xlu0 %4215 }
 0xecd   : > { %v8314_v18 = vpop.permute.xlu1 %4297  ;;  %v4223_v13 = vsel %vm321_vm8, %v4216_v54, %v8306_v49 }
 0xed0   : > { %v8310_v12 = vpop.permute.xlu0 %4255 }
 0xed1   : > { %v8325_v58 = vpop.permute.xlu1 %4337 }
 0xed4   : > { %v8312_v5 = vpop.permute.xlu0 %4295 }
 0xed5   : > { %v8337_v43 = vpop.permute.xlu1 %4329 }
 0xed8   : > { %v4060_v21 = vpop.permute.xlu0 %4059 }
 0xed9   : > { %v4064_v31 = vsel %vm237_vm5, %v4058_v27, %v4060_v21  ;;  %4076 = vst.msk [vmem:[#allocation3 + $0x58] sm:$0xff] %vm223_vm2, %v4060_v21  ;;  %v4183_v21 = vsel %vm300_vm7, %v4176_v62, %v4178_v24 }
 0xeda   : > { %v5969_v42 = vpack.c.bf16 %v4064_v31, %v4062_v10  ;;  %v4373_v31 = vld [vmem:[#allocation3 + $0x70] sm:$0xff] }
 0xedc   : > { %v4100_v41 = vpop.permute.xlu0 %4099  ;;  %5970 = vmatprep.subr.bf16.mxu0 %v5969_v42 }
 0xedd   : > { %v4104_v36 = vsel %vm258_vm6, %v4098_v44, %v4100_v41  ;;  %4116 = vst.msk [vmem:[#allocation3 + $0x88] sm:$0xff] %vm223_vm2, %v4100_v41  ;;  %5972 = vmatpush1.bf16.msra.mxu0 %v5971_v46  ;;  %v5983_v46 = vpack.c.bf16 %v4183_v21, %v4181_v34  ;;  %v4403_v34 = vld [vmem:[#allocation3 + $0x160] sm:$0xff] }
 0xede   : > { %v5973_v19 = vpack.c.bf16 %v4104_v36, %v4102_v38 }
 0xee0   : > { %v4140_v27 = vpop.permute.xlu0 %4139  ;;  %v4370_v55 = vld [vmem:[#allocation3 + $0x58] sm:$0xff]  ;;  %5974 = vmatprep.subr.bf16.mxu0 %v5973_v19  ;;  %v5987_v19 = vpack.c.bf16 %v4223_v13, %v4221_v63 }
 0xee1   : > { %v4144_v44 = vsel %vm279_vm4, %v4138_v47, %v4140_v27  ;;  %4156 = vst.msk [vmem:[#allocation3 + $0xb8] sm:$0xff] %vm223_vm2, %v4140_v27  ;;  %v6005_v61 = vpack.c.bf16 %v4370_v55, %v4367_v11  ;;  %5976 = vmatpush1.bf16.msra.mxu0 %v5975_v52  ;;  %v8349_v47 = vpop.permute.xlu1 %4422  ;;  %v4262_v27 = vsel %vm342_vm9, %v8288_v60, %v8192_v16 }
 0xee2   : > { %v5977_v14 = vpack.c.bf16 %v4144_v44, %v4142_v57  ;;  %v4303_v16 = vsel %vm363_vm10, %v8312_v5, %v8314_v18  ;;  %v4301_v5 = vsel %vm363_vm10, %v8302_v48, %v8298_v15 }
 0xee3   : > { %6006 = vmatpush1.bf16.msra.mxu1 %v6005_v61 }
 0xee4   : > { %v4180_v10 = vpop.permute.xlu0 %4179  ;;  %6007 = vmatprep.subr.bf16.mxu1 %v6155_v4  ;;  %v4376_v53 = vld [vmem:[#allocation3 + $0x88] sm:$0xff]  ;;  %5978 = vmatprep.subr.bf16.mxu0 %v5977_v14 }
 0xee5   : > { %v4184_v42 = vsel %vm300_vm7, %v4178_v24, %v4180_v10  ;;  %4196 = vst.msk [vmem:[#allocation3 + $0xe8] sm:$0xff] %vm223_vm2, %v4180_v10  ;;  %v6008_v8 = vpack.c.bf16 %v4376_v53, %v4373_v31  ;;  %5980 = vmatpush1.bf16.msra.mxu0 %v5979_v32  ;;  %v4222_v24 = vsel %vm321_vm8, %v8278_v39, %v8184_v7 }
 0xee6   : > { %v5981_v62 = vpack.c.bf16 %v4184_v42, %v4182_v35  ;;  %v4263_v7 = vsel %vm342_vm9, %v8310_v12, %v8308_v9  ;;  %v4261_v12 = vsel %vm342_vm9, %v8294_v40, %v8288_v60  ;;  %v5995_v10 = vpack.c.bf16 %v4303_v16, %v4301_v5 }
 0xee7   : > { %6009 = vmatpush1.bf16.msra.mxu1 %v6008_v8  ;;  %v5991_v57 = vpack.c.bf16 %v4263_v7, %v4261_v12  ;;  %v4342_v53 = vsel %vm384_vm11, %v8304_v22, %v8210_v3  ;;  %v4341_v3 = vsel %vm384_vm11, %v8337_v43, %v8304_v22  ;;  %v5097_v43 = vld [vmem:[#allocation3 + $0x28] sm:$0xff] }
 0xee8   : > { %v4220_v41 = vpop.permute.xlu0 %4219  ;;  %6010 = vmatprep.subr.bf16.mxu1 %v6155_v4  ;;  %v4382_v38 = vld [vmem:[#allocation3 + $0xb8] sm:$0xff]  ;;  %5982 = vmatprep.subr.bf16.mxu0 %v5981_v62 }
 0xee9   : > { %v4224_v36 = vsel %vm321_vm8, %v8306_v49, %v4220_v41  ;;  %4236 = vst.msk [vmem:[#allocation3 + $0x118] sm:$0xff] %vm223_vm2, %v4220_v41  ;;  %v6011_v30 = vpack.c.bf16 %v4382_v38, %v4379_v26  ;;  %5984 = vmatpush1.bf16.msra.mxu0 %v5983_v46  ;;  %v4385_v49 = vld [vmem:[#allocation3 + $0xd0] sm:$0xff] }
 0xeea   : > { %v8371_v54 = vpop.permute.xlu1 %4417  ;;  %v5985_v23 = vpack.c.bf16 %v4224_v36, %v4222_v24  ;;  %v4409_v24 = vld [vmem:[#allocation3 + $0x190] sm:$0xff] }
 0xeeb   : > { %6012 = vmatpush1.bf16.msra.mxu1 %v6011_v30 }
 0xeec   : > { %v4260_v52 = vpop.permute.xlu0 %4259  ;;  %6013 = vmatprep.subr.bf16.mxu1 %v6155_v4  ;;  %v4388_v59 = vld [vmem:[#allocation3 + $0xe8] sm:$0xff]  ;;  %5986 = vmatprep.subr.bf16.mxu0 %v5985_v23  ;;  %v5094_v23 = vld [vmem:[#allocation3 + $0x10] sm:$0xff] }
 0xeed   : > { %v4264_v39 = vsel %vm342_vm9, %v8308_v9, %v4260_v52  ;;  %4276 = vst.msk [vmem:[#allocation3 + $0x148] sm:$0xff] %vm223_vm2, %v4260_v52  ;;  %v6014_v33 = vpack.c.bf16 %v4388_v59, %v4385_v49  ;;  %5988 = vmatpush1.bf16.msra.mxu0 %v5987_v19  ;;  %v4391_v9 = vld [vmem:[#allocation3 + $0x100] sm:$0xff] }
 0xeee   : > { %v8386_v11 = vpop.permute.xlu1 %4629  ;;  %v5989_v55 = vpack.c.bf16 %v4264_v39, %v4262_v27 }
 0xeef   : > { %6015 = vmatpush1.bf16.msra.mxu1 %v6014_v33 }
 0xef0   : > { %v4300_v44 = vpop.permute.xlu0 %4299  ;;  %6016 = vmatprep.subr.bf16.mxu1 %v6155_v4  ;;  %v4394_v61 = vld [vmem:[#allocation3 + $0x118] sm:$0xff]  ;;  %5990 = vmatprep.subr.bf16.mxu0 %v5989_v55 }
 0xef1   : > { %v4304_v60 = vsel %vm363_vm10, %v8314_v18, %v4300_v44  ;;  %4316 = vst.msk [vmem:[#allocation3 + $0x178] sm:$0xff] %vm223_vm2, %v4300_v44  ;;  %v6017_v40 = vpack.c.bf16 %v4394_v61, %v4391_v9  ;;  %5992 = vmatpush1.bf16.msra.mxu0 %v5991_v57  ;;  %v4397_v18 = vld [vmem:[#allocation3 + $0x130] sm:$0xff] }
 0xef2   : > { %v4628_v14 = vpop.permute.xlu1 %4627  ;;  %v5993_v32 = vpack.c.bf16 %v4304_v60, %v4302_v45 }
 0xef3   : > { %6018 = vmatpush1.bf16.msra.mxu1 %v6017_v40  ;;  %v8403_v21 = vsel %vm237_vm5, %v4628_v14, %v8386_v11 }
 0xef4   : > { %v4340_v17 = vpop.permute.xlu0 %4339  ;;  %6019 = vmatprep.subr.bf16.mxu1 %v6155_v4  ;;  %v4400_v31 = vld [vmem:[#allocation3 + $0x148] sm:$0xff]  ;;  %5994 = vmatprep.subr.bf16.mxu0 %v5993_v32 }
 0xef5   : > { %v4344_v15 = vsel %vm384_vm11, %v8325_v58, %v4340_v17  ;;  %4356 = vst.msk [vmem:[#allocation3 + $0x1a8] sm:$0xff] %vm223_vm2, %v4340_v17  ;;  %v6020_v48 = vpack.c.bf16 %v4400_v31, %v4397_v18  ;;  %5996 = vmatpush1.bf16.msra.mxu0 %v5995_v10 }
 0xef6   : > { %v4692_v35 = vpop.permute.xlu1 %4691  ;;  %v5997_v42 = vpack.c.bf16 %v4344_v15, %v4342_v53 }
 0xef7   : > { %6021 = vmatpush1.bf16.msra.mxu1 %v6020_v48  ;;  %4722 = vst.msk [vmem:[#allocation3 + $0xa0] sm:$0xff] %vm223_vm2, %v4692_v35  ;;  %v8475_v48 = vld [vmem:[#allocation2 + $0x10] sm:$0xff] }
 0xef8   : > { %v4336_v8 = vpop.permute.xlu0 %4335  ;;  %6022 = vmatprep.subr.bf16.mxu1 %v6155_v4  ;;  %v4406_v62 = vld [vmem:[#allocation3 + $0x178] sm:$0xff]  ;;  %5998 = vmatprep.subr.bf16.mxu0 %v5997_v42 }
 0xef9   : > { %v4343_v46 = vsel %vm384_vm11, %v4336_v8, %v8325_v58  ;;  %v6023_v13 = vpack.c.bf16 %v4406_v62, %v4403_v34 }
 0xefa   : > { %v4694_v41 = vpop.permute.xlu1 %4693  ;;  %v5999_v26 = vpack.c.bf16 %v4343_v46, %v4341_v3 }
 0xefb   : > { %6024 = vmatpush1.bf16.msra.mxu1 %v6023_v13 }
 0xefc   : > { %v4425_v38 = vpop.permute.xlu0 %4424  ;;  %6025 = vmatprep.subr.bf16.mxu1 %v6155_v4  ;;  %v4412_v36 = vld [vmem:[#allocation3 + $0x1a8] sm:$0xff]  ;;  %6000 = vmatpush1.bf16.msra.mxu0 %v5999_v26 }
 0xefd   : > { %v6026_v30 = vpack.c.bf16 %v4412_v36, %v4409_v24  ;;  %5471 = vmatprep.mubr.msk.f32.mxu1 %vm8823_vm0, %v4425_v38  ;;  %5470 = vmatprep.mubr.msk.f32.mxu0 %vm8824_vm3, %v4425_v38  ;;  %v4426_v22 = vsel %vm8825_vm12, %v8349_v47, %v4425_v38  ;;  %v6081_v47 = vpack.c.bf16 %v5097_v43, %v5094_v23 }
 0xefe   : > { %6029 = vmatprep.subr.bf16.mxu0 %v8136_v51  ;;  %v4752_v58 = vpop.permute.xlu1 %4751 }
 0xeff   : > { %6027 = vmatpush1.bf16.msra.mxu1 %v6026_v30  ;;  %4782 = vst.msk [vmem:[#allocation3 + $0xe8] sm:$0xff] %vm223_vm2, %v4752_v58  ;;  %4495 = vmatmul.mubr.f32.vlgmr.msra.gmra.mrb[14].mxu0 %v4426_v22 }
 0xf00   : > { %v4632_v63 = vpop.permute.xlu0 %4631  ;;  %6080 = vmatprep.subr.bf16.mxu1 %v6155_v4  ;;  %6031 = vmatpush1.bf16.msra.mxu0 %v8159_v6 }
 0xf01   : > { %v8430_v19 = vsel %vm237_vm5, %v8386_v11, %v4632_v63  ;;  %4662 = vst.msk [vmem:[#allocation3 + $0x58] sm:$0xff] %vm223_vm2, %v4632_v63 }
 0xf02   : > { %4566 = vmatmul.mubr.f32.vlgmr.msra.gmra.mrb[14].mxu1 %v4426_v22  ;;  %v4748_v51 = vpop.permute.xlu1 %4747 }
 0xf03   : > { %6082 = vmatpush1.bf16.msra.mxu1 %v6081_v47 }
 0xf04   : > { %v4634_v7 = vpop.permute.xlu0 %4633  ;;  %6083 = vmatprep.subr.bf16.mxu1 %v6155_v4 }
 0xf06   : > { %v4638_v52 = vpop.permute.xlu1 %4637 }
 0xf07   : > { %4665 = vst.msk [vmem:[#allocation3 + $0x70] sm:$0xff] %vm223_vm2, %v4638_v52 }
 0xf08   : > { %v4690_v49 = vpop.permute.xlu0 %4689 }
 0xf09   : > { %v8436_v59 = vsel %vm258_vm6, %v4690_v49, %v4692_v35  ;;  %v8495_v35 = vld [vmem:[#allocation2] sm:$0xff] }
 0xf0a   : > { %v4698_v6 = vpop.permute.xlu1 %4697 }
 0xf0b   : > { %4725 = vst.msk [vmem:[#allocation3 + $0xb8] sm:$0xff] %vm223_vm2, %v4698_v6 }
 0xf0c   : > { %v4688_v27 = vpop.permute.xlu0 %4687 }
 0xf0d   : > { %v8440_v39 = vsel %vm258_vm6, %v4688_v27, %v4690_v49 }
 0xf10   : > { %v4750_v33 = vpop.permute.xlu0 %4749 }
 0xf11   : > { %v8443_v12 = vsel %vm279_vm4, %v4748_v51, %v4750_v33  ;;  %v8446_v11 = vsel %vm279_vm4, %v4750_v33, %v4752_v58 }
 0xf14   : > { %v4636_v55 = vpop.permute.xlu0 %4635 }
 0xf15   : > { %v8449_v57 = vsel %vm237_vm5, %v4634_v7, %v4636_v55  ;;  %v8452_v16 = vsel %vm237_vm5, %v4636_v55, %v4638_v52 }
 0xf18   : > { %v4696_v44 = vpop.permute.xlu0 %4695 }
 0xf19   : > { %v8455_v9 = vsel %vm258_vm6, %v4694_v41, %v4696_v44  ;;  %v8458_v61 = vsel %vm258_vm6, %v4696_v44, %v4698_v6 }
 0xf1a   : > { %v6040_v45 = vpack.c.bf16 %v8458_v61, %v8436_v59  ;;  %v6042_v60 = vpack.c.bf16 %v8455_v9, %v8440_v39 }
 0xfd2   : > { %v4496_v40 = vpop.f32.mrb[14].mxu0 }
 0xfd3   : > { %v4498_v5 = vpop.f32.mrb[15].mxu0  ;;  %v4497_v53 = vadd.f32 %v4496_v40, %v8371_v54 }
 0xfd4   : > { %v4499_v14 = vadd.f32 %v4498_v5, %v8371_v54  ;;  %v4972_v5 = vld [vmem:[#allocation2 + $0x18] sm:$0xff] }
 0xfd5   : > { %v4567_v32 = vpop.f32.mrb[14].mxu1  ;;  %v4571_v15 = vmul.f32 %v4497_v53, %v6335_v20 }
 0xfd6   : > { %v4568_v10 = vadd.f32 %v4567_v32, %v8371_v54  ;;  %v4569_v17 = vpop.f32.mrb[15].mxu1  ;;  %v4572_v18 = vmul.f32 %v4499_v14, %v6338_v28  ;;  %v8487_v54 = vld [vmem:[#allocation2 + $0x8] sm:$0xff] }
 0xfd8   : > { %v4573_v31 = vmul.f32 %v4568_v10, %v6340_v29  ;;  %4579 = vrot.lane.b32.xlu1 %v4572_v18, %s6166_s9 }
 0xfda   : > { %4581 = vrot.lane.b32.xlu0 %v4573_v31, %s6166_s9 }
 0xfdc   : > { %4757 = vrot.lane.b32.xlu1 %v8143_v25, %s6158_s23 }
 0xfde   : > { %4577 = vrot.lane.b32.xlu0 %v4571_v15, %s6166_s9 }
 0xfe0   : > { %4811 = vrot.lane.b32.xlu1 %v8475_v48, %s6159_s24 }
 0xfe2   : > { %4755 = vrot.lane.b32.xlu0 %v8128_v50, %s6158_s23 }
 0xfe4   : > { %4817 = vrot.lane.b32.xlu1 %v8143_v25, %s6159_s24 }
 0xfe6   : > { %4753 = vrot.lane.b32.xlu0 %v8151_v37, %s6158_s23 }
 0xfe8   : > { %4813 = vrot.lane.b32.xlu1 %v8151_v37, %s6159_s24 }
 0xfea   : > { %4809 = vrot.lane.b32.xlu0 %v8487_v54, %s6159_s24 }
 0xfec   : > { %4871 = vrot.lane.b32.xlu1 %v8475_v48, %s6160_s25 }
 0xfee   : > { %4815 = vrot.lane.b32.xlu0 %v8128_v50, %s6159_s24 }
 0xff0   : > { %4867 = vrot.lane.b32.xlu1 %v8495_v35, %s6160_s25 }
 0xff2   : > { %4807 = vrot.lane.b32.xlu0 %v8495_v35, %s6159_s24 }
 0xff4   : > { %4877 = vrot.lane.b32.xlu1 %v8143_v25, %s6160_s25 }
 0xff6   : > { %4869 = vrot.lane.b32.xlu0 %v8487_v54, %s6160_s25 }
 0xff8   : > { %4931 = vrot.lane.b32.xlu1 %v8475_v48, %s6161_s26 }
 0xffa   : > { %4875 = vrot.lane.b32.xlu0 %v8128_v50, %s6160_s25 }
 0xffc   : > { %4937 = vrot.lane.b32.xlu1 %v8143_v25, %s6161_s26 }
 0xffe   : > { %4873 = vrot.lane.b32.xlu0 %v8151_v37, %s6160_s25 }
0x1000   : > { %4933 = vrot.lane.b32.xlu1 %v8151_v37, %s6161_s26 }
0x1002   : > { %4929 = vrot.lane.b32.xlu0 %v8487_v54, %s6161_s26 }
0x1004   : > { %4991 = vrot.lane.b32.xlu1 %v8475_v48, %s6162_s27 }
0x1006   : > { %4935 = vrot.lane.b32.xlu0 %v8128_v50, %s6161_s26 }
0x1008   : > { %4987 = vrot.lane.b32.xlu1 %v8495_v35, %s6162_s27 }
0x100a   : > { %4927 = vrot.lane.b32.xlu0 %v8495_v35, %s6161_s26 }
0x100e   : > { %4989 = vrot.lane.b32.xlu0 %v8487_v54, %s6162_s27 }
0x1012   : > { %4995 = vrot.lane.b32.xlu0 %v8128_v50, %s6162_s27 }
0x104a   : > { %v4580_v37 = vpop.permute.xlu1 %4579 }
0x104c   : > { %v4582_v42 = vpop.permute.xlu0 %4581 }
0x104d   : > { %v4584_v8 = vsel %vm600_vm14, %v4580_v37, %v4582_v42 }
0x104e   : > { %4590 = vst.msk [vmem:[#allocation2 + $0x40] sm:$0xff] %vm609_vm15, %v4584_v8  ;;  %v4758_v34 = vpop.permute.xlu1 %4757 }
0x104f   : > { %4785 = vst.msk [vmem:[#allocation3 + $0x100] sm:$0xff] %vm223_vm2, %v4758_v34 }
0x1050   : > { %v4578_v62 = vpop.permute.xlu0 %4577 }
0x1051   : > { %4588 = vst.msk [vmem:[#allocation2 + $0x30] sm:$0xff] %vm606_vm13, %v4578_v62  ;;  %v8534_v3 = vsel %vm600_vm14, %v4578_v62, %v4580_v37 }
0x1052   : > { %v4812_v46 = vpop.permute.xlu1 %4811  ;;  %v6032_v13 = vpack.c.bf16 %v8430_v19, %v8534_v3  ;;  %v5103_v19 = vld [vmem:[#allocation3 + $0x58] sm:$0xff] }
0x1053   : > { %4842 = vst.msk [vmem:[#allocation3 + $0x130] sm:$0xff] %vm223_vm2, %v4812_v46 }
0x1054   : > { %v4756_v50 = vpop.permute.xlu0 %4755  ;;  %6033 = vmatprep.subr.bf16.mxu0 %v6032_v13 }
0x1055   : > { %v8540_v41 = vsel %vm279_vm4, %v4756_v50, %v4758_v34  ;;  %v8542_v26 = vld [vmem:[#allocation2 + $0x40] sm:$0xff] }
0x1056   : > { %v4818_v38 = vpop.permute.xlu1 %4817  ;;  %4608 = vst.msk [vmem:[#allocation3 + $0x40] sm:$0xff] %vm223_vm2, %v8542_v26 }
0x1057   : > { %4845 = vst.msk [vmem:[#allocation3 + $0x148] sm:$0xff] %vm223_vm2, %v4818_v38 }
0x1058   : > { %v4754_v24 = vpop.permute.xlu0 %4753  ;;  %v8547_v36 = vld [vmem:[#allocation2 + $0x30] sm:$0xff] }
0x1059   : > { %v8550_v30 = vsel %vm279_vm4, %v4754_v24, %v4756_v50  ;;  %4699 = vrot.lane.b32.xlu0 %v8547_v36, %s6157_s22  ;;  %4639 = vrot.lane.b32.xlu1 %v8547_v36, %s6156_s21  ;;  %v6034_v22 = vpack.c.bf16 %v8403_v21, %v8547_v36 }
0x105a   : > { %v4814_v43 = vpop.permute.xlu1 %4813 }
0x105b   : > { %6035 = vmatpush1.bf16.msra.mxu0 %v6034_v22 }
0x105c   : > { %v4810_v58 = vpop.permute.xlu0 %4809 }
0x105d   : > { %v8559_v63 = vsel %vm300_vm7, %v4810_v58, %v4812_v46  ;;  %4819 = vrot.lane.b32.xlu0 %v8547_v36, %s6159_s24  ;;  %4759 = vrot.lane.b32.xlu1 %v8547_v36, %s6158_s23  ;;  %v5100_v23 = vld [vmem:[#allocation3 + $0x40] sm:$0xff] }
0x105e   : > { %v4872_v47 = vpop.permute.xlu1 %4871  ;;  %v6084_v51 = vpack.c.bf16 %v5103_v19, %v5100_v23 }
0x105f   : > { %4902 = vst.msk [vmem:[#allocation3 + $0x178] sm:$0xff] %vm223_vm2, %v4872_v47 }
0x1060   : > { %v4816_v7 = vpop.permute.xlu0 %4815  ;;  %6085 = vmatpush1.bf16.msra.mxu1 %v6084_v51  ;;  %v5473_v51 = vld [vmem:[%s8805_s1 + $0x50] sm:$0xff] }
0x1061   : > { %v8567_v21 = vsel %vm300_vm7, %v4816_v7, %v4818_v38  ;;  %v8570_v52 = vsel %vm300_vm7, %v4814_v43, %v4816_v7  ;;  %4939 = vrot.lane.b32.xlu0 %v8547_v36, %s6161_s26  ;;  %4879 = vrot.lane.b32.xlu1 %v8547_v36, %s6160_s25  ;;  %v5474_v7 = vld [vmem:[%s8805_s1 + $0x58] sm:$0xff] }
0x1062   : > { %v4868_v49 = vpop.permute.xlu1 %4867  ;;  %6086 = vmatprep.subr.bf16.mxu1 %v6155_v4  ;;  %v6052_v6 = vpack.c.bf16 %v8567_v21, %v8559_v63  ;;  %v5133_v63 = vld [vmem:[#allocation3 + $0x148] sm:$0xff] }
0x1064   : > { %v4808_v27 = vpop.permute.xlu0 %4807 }
0x1065   : > { %v8580_v33 = vsel %vm300_vm7, %v4808_v27, %v4810_v58  ;;  %4643 = vrot.lane.b32.xlu1 %v8542_v26, %s6156_s21  ;;  %4641 = vrot.lane.b32.xlu0 %v8534_v3, %s6156_s21  ;;  %v5033_v58 = vld [vmem:[#allocation2 + $0x20] sm:$0xff] }
0x1066   : > { %v4878_v55 = vpop.permute.xlu1 %4877  ;;  %v6054_v44 = vpack.c.bf16 %v8570_v52, %v8580_v33 }
0x1067   : > { %4905 = vst.msk [vmem:[#allocation3 + $0x190] sm:$0xff] %vm223_vm2, %v4878_v55 }
0x1068   : > { %v4870_v40 = vpop.permute.xlu0 %4869 }
0x1069   : > { %v8590_v14 = vsel %vm321_vm8, %v4870_v40, %v4872_v47  ;;  %v8593_v32 = vsel %vm321_vm8, %v4868_v49, %v4870_v40  ;;  %4997 = vrot.lane.b32.xlu1 %v8143_v25, %s6162_s27  ;;  %4993 = vrot.lane.b32.xlu0 %v4972_v5, %s6162_s27  ;;  %v5034_v47 = vld [vmem:[#allocation2 + $0x28] sm:$0xff] }
0x106a   : > { %v4932_v10 = vpop.permute.xlu1 %4931 }
0x106b   : > { %4962 = vst.msk [vmem:[#allocation3 + $0x1c0] sm:$0xff] %vm223_vm2, %v4932_v10 }
0x106c   : > { %v4876_v17 = vpop.permute.xlu0 %4875 }
0x106d   : > { %v8600_v18 = vsel %vm321_vm8, %v4876_v17, %v4878_v55  ;;  %4703 = vrot.lane.b32.xlu1 %v8542_v26, %s6157_s22  ;;  %4701 = vrot.lane.b32.xlu0 %v8534_v3, %s6157_s22 }
0x106e   : > { %v4938_v31 = vpop.permute.xlu1 %4937 }
0x106f   : > { %4965 = vst.msk [vmem:[#allocation3 + $0x1d8] sm:$0xff] %vm223_vm2, %v4938_v31 }
0x1070   : > { %v4874_v53 = vpop.permute.xlu0 %4873 }
0x1071   : > { %v8608_v25 = vsel %vm321_vm8, %v4874_v53, %v4876_v17  ;;  %4763 = vrot.lane.b32.xlu1 %v8542_v26, %s6158_s23  ;;  %4761 = vrot.lane.b32.xlu0 %v8534_v3, %s6158_s23 }
0x1072   : > { %v4934_v15 = vpop.permute.xlu1 %4933 }
0x1074   : > { %v4930_v37 = vpop.permute.xlu0 %4929 }
0x1075   : > { %v8615_v42 = vsel %vm342_vm9, %v4930_v37, %v4932_v10  ;;  %4999 = vrot.lane.b32.xlu1 %v8547_v36, %s6162_s27  ;;  %5049 = vrot.lane.b32.xlu0 %v8487_v54, %s6164_s28 }
0x1076   : > { %v4992_v8 = vpop.permute.xlu1 %4991 }
0x1077   : > { %5022 = vst.msk [vmem:[#allocation3 + $0x208] sm:$0xff] %vm223_vm2, %v4992_v8 }
0x1078   : > { %v4936_v34 = vpop.permute.xlu0 %4935 }
0x1079   : > { %v8623_v62 = vsel %vm342_vm9, %v4936_v34, %v4938_v31  ;;  %v8626_v46 = vsel %vm342_vm9, %v4934_v15, %v4936_v34  ;;  %4823 = vrot.lane.b32.xlu1 %v8542_v26, %s6159_s24  ;;  %4821 = vrot.lane.b32.xlu0 %v8534_v3, %s6159_s24 }
0x107a   : > { %v6064_v13 = vpack.c.bf16 %v8623_v62, %v8615_v42  ;;  %v4988_v43 = vpop.permute.xlu1 %4987  ;;  %v5151_v42 = vld [vmem:[#allocation3 + $0x1d8] sm:$0xff] }
0x107c   : > { %v4928_v50 = vpop.permute.xlu0 %4927 }
0x107d   : > { %v8635_v38 = vsel %vm342_vm9, %v4928_v50, %v4930_v37  ;;  %4883 = vrot.lane.b32.xlu1 %v8542_v26, %s6160_s25  ;;  %4881 = vrot.lane.b32.xlu0 %v8534_v3, %s6160_s25 }
0x107e   : > { %v6066_v24 = vpack.c.bf16 %v8626_v46, %v8635_v38 }
0x1080   : > { %v4990_v22 = vpop.permute.xlu0 %4989 }
0x1081   : > { %v8644_v23 = vsel %vm363_vm10, %v4990_v22, %v4992_v8  ;;  %v8647_v19 = vsel %vm363_vm10, %v4988_v43, %v4990_v22  ;;  %5051 = vrot.lane.b32.xlu1 %v8475_v48, %s6164_s28  ;;  %5055 = vrot.lane.b32.xlu0 %v5033_v58, %s6164_s28  ;;  %v5106_v43 = vld [vmem:[#allocation3 + $0x70] sm:$0xff] }
0x1085   : > { %4943 = vrot.lane.b32.xlu1 %v8542_v26, %s6161_s26  ;;  %4941 = vrot.lane.b32.xlu0 %v8534_v3, %s6161_s26 }
0x1089   : > { %5003 = vrot.lane.b32.xlu1 %v8542_v26, %s6162_s27  ;;  %5001 = vrot.lane.b32.xlu0 %v8534_v3, %s6162_s27 }
0x108d   : > { %5057 = vrot.lane.b32.xlu1 %v5034_v47, %s6164_s28  ;;  %5047 = vrot.lane.b32.xlu0 %v8495_v35, %s6164_s28 }
0x1091   : > { %5053 = vrot.lane.b32.xlu1 %v4972_v5, %s6164_s28  ;;  %5061 = vrot.lane.b32.xlu0 %v8534_v3, %s6164_s28  ;;  %v5475_v3 = vld [vmem:[%s8806_s2 + $0x40] sm:$0xff] }
0x1095   : > { %5063 = vrot.lane.b32.xlu1 %v8542_v26, %s6164_s28  ;;  %5059 = vrot.lane.b32.xlu0 %v8547_v36, %s6164_s28  ;;  %v4996_v26 = vpop.permute.xlu0 %4995 }
0x1099   : > { %5185 = vrot.lane.b32.xlu1 %v5473_v51, %s6168_s30  ;;  %5187 = vrot.lane.b32.xlu0 %v5474_v7, %s6168_s30  ;;  %v5115_v7 = vld [vmem:[#allocation3 + $0xb8] sm:$0xff] }
0x109d   : > { %5183 = vrot.lane.b32.xlu1 %v8270_v56, %s6168_s30  ;;  %5177 = vperm.xlu0 %6143, %v5475_v3  }
0x10cb   : > { %v4640_v36 = vpop.permute.xlu1 %4639  ;;  %v4700_v49 = vpop.permute.xlu0 %4699 }
0x10cf   : > { %v4760_v27 = vpop.permute.xlu1 %4759  ;;  %v4820_v55 = vpop.permute.xlu0 %4819 }
0x10d3   : > { %v8683_v40 = vpop.permute.xlu1 %4879  ;;  %v8685_v5 = vpop.permute.xlu0 %4939 }
0x10d7   : > { %v4644_v10 = vpop.permute.xlu1 %4643  ;;  %v4642_v17 = vpop.permute.xlu0 %4641 }
0x10d8   : > { %4668 = vst.msk [vmem:[#allocation3 + $0x88] sm:$0xff] %vm223_vm2, %v4644_v10  ;;  %v4649_v31 = vsel %vm237_vm5, %v4640_v36, %v4642_v17  ;;  %v4650_v53 = vsel %vm237_vm5, %v4642_v17, %v4644_v10  ;;  %v5121_v17 = vld [vmem:[#allocation3 + $0xe8] sm:$0xff] }
0x10d9   : > { %v6036_v56 = vpack.c.bf16 %v4650_v53, %v8452_v16  ;;  %v6038_v15 = vpack.c.bf16 %v4649_v31, %v8449_v57 }
0x10db   : > { %v4998_v37 = vpop.permute.xlu1 %4997  ;;  %v4994_v8 = vpop.permute.xlu0 %4993  ;;  %6037 = vmatprep.subr.bf16.mxu0 %v6036_v56 }
0x10dc   : > { %v8693_v34 = vsel %vm363_vm10, %v4996_v26, %v4998_v37  ;;  %5025 = vst.msk [vmem:[#allocation3 + $0x220] sm:$0xff] %vm223_vm2, %v4998_v37  ;;  %v8697_v50 = vsel %vm363_vm10, %v4994_v8, %v4996_v26  ;;  %6039 = vmatpush1.bf16.msra.mxu0 %v6038_v15  ;;  %v5112_v26 = vld [vmem:[#allocation3 + $0xa0] sm:$0xff] }
0x10dd   : > { %6041 = vmatprep.subr.bf16.mxu0 %v6040_v45  ;;  %v6090_v39 = vpack.c.bf16 %v5115_v7, %v5112_v26 }
0x10df   : > { %v4704_v22 = vpop.permute.xlu1 %4703  ;;  %v4702_v16 = vpop.permute.xlu0 %4701  ;;  %v5109_v57 = vld [vmem:[#allocation3 + $0x88] sm:$0xff] }
0x10e0   : > { %4728 = vst.msk [vmem:[#allocation3 + $0xd0] sm:$0xff] %vm223_vm2, %v4704_v22  ;;  %v4709_v58 = vsel %vm258_vm6, %v4700_v49, %v4702_v16  ;;  %v4710_v47 = vsel %vm258_vm6, %v4702_v16, %v4704_v22  ;;  %v6087_v51 = vpack.c.bf16 %v5109_v57, %v5106_v43  ;;  %6043 = vmatpush1.bf16.msra.mxu0 %v6042_v60  ;;  %v5130_v16 = vld [vmem:[#allocation3 + $0x130] sm:$0xff] }
0x10e1   : > { %v6044_v3 = vpack.c.bf16 %v8446_v11, %v4710_v47  ;;  %v6046_v59 = vpack.c.bf16 %v8443_v12, %v4709_v58  ;;  %v6099_v33 = vpack.c.bf16 %v5133_v63, %v5130_v16  ;;  %v5139_v58 = vld [vmem:[#allocation3 + $0x178] sm:$0xff] }
0x10e2   : > { %6088 = vmatpush1.bf16.msra.mxu1 %v6087_v51  ;;  %v5142_v51 = vld [vmem:[#allocation3 + $0x190] sm:$0xff] }
0x10e3   : > { %v4764_v61 = vpop.permute.xlu1 %4763  ;;  %v4762_v45 = vpop.permute.xlu0 %4761  ;;  %6089 = vmatprep.subr.bf16.mxu1 %v6155_v4  ;;  %6045 = vmatprep.subr.bf16.mxu0 %v6044_v3 }
0x10e4   : > { %4788 = vst.msk [vmem:[#allocation3 + $0x118] sm:$0xff] %vm223_vm2, %v4764_v61  ;;  %v4769_v36 = vsel %vm279_vm4, %v4760_v27, %v4762_v45  ;;  %v4770_v49 = vsel %vm279_vm4, %v4762_v45, %v4764_v61  ;;  %6047 = vmatpush1.bf16.msra.mxu0 %v6046_v59  ;;  %vm8826_vm4 = vcmask 719872  }
0x10e5   : > { %v6048_v9 = vpack.c.bf16 %v4770_v49, %v8540_v41  ;;  %v6050_v11 = vpack.c.bf16 %v4769_v36, %v8550_v30  ;;  %v5124_v30 = vld [vmem:[#allocation3 + $0x100] sm:$0xff]  ;;  %vm8827_vm5 = vmmov %vm8826_vm4 }
0x10e6   : > { %6091 = vmatpush1.bf16.msra.mxu1 %v6090_v39  ;;  %v5148_v36 = vld [vmem:[#allocation3 + $0x1c0] sm:$0xff] }
0x10e7   : > { %v8716_v12 = vpop.permute.xlu1 %4999  ;;  %v8718_v60 = vpop.permute.xlu0 %5049  ;;  %6092 = vmatprep.subr.bf16.mxu1 %v6155_v4  ;;  %v5118_v10 = vld [vmem:[#allocation3 + $0xd0] sm:$0xff]  ;;  %6049 = vmatprep.subr.bf16.mxu0 %v6048_v9  ;;  %v6108_v38 = vpack.c.bf16 %v5151_v42, %v5148_v36  ;;  %v5157_v9 = vld [vmem:[#allocation3 + $0x208] sm:$0xff] }
0x10e8   : > { %v6093_v31 = vpack.c.bf16 %v5121_v17, %v5118_v10  ;;  %6051 = vmatpush1.bf16.msra.mxu0 %v6050_v11 }
0x10e9   : > { %6053 = vmatprep.subr.bf16.mxu0 %v6052_v6 }
0x10ea   : > { %6094 = vmatpush1.bf16.msra.mxu1 %v6093_v31  ;;  %v5160_v31 = vld [vmem:[#allocation3 + $0x220] sm:$0xff] }
0x10eb   : > { %v4824_v41 = vpop.permute.xlu1 %4823  ;;  %v4822_v27 = vpop.permute.xlu0 %4821  ;;  %6095 = vmatprep.subr.bf16.mxu1 %v6155_v4  ;;  %v5127_v53 = vld [vmem:[#allocation3 + $0x118] sm:$0xff] }
0x10ec   : > { %4848 = vst.msk [vmem:[#allocation3 + $0x160] sm:$0xff] %vm223_vm2, %v4824_v41  ;;  %v4829_v56 = vsel %vm300_vm7, %v4820_v55, %v4822_v27  ;;  %v4830_v15 = vsel %vm300_vm7, %v4822_v27, %v4824_v41  ;;  %v6096_v37 = vpack.c.bf16 %v5127_v53, %v5124_v30  ;;  %6055 = vmatpush1.bf16.msra.mxu0 %v6054_v44 }
0x10ed   : > { %v6056_v21 = vpack.c.bf16 %v8590_v14, %v4830_v15  ;;  %v6058_v6 = vpack.c.bf16 %v8593_v32, %v4829_v56 }
0x10ee   : > { %6097 = vmatpush1.bf16.msra.mxu1 %v6096_v37 }
0x10ef   : > { %v4884_v8 = vpop.permute.xlu1 %4883  ;;  %v4882_v22 = vpop.permute.xlu0 %4881  ;;  %6098 = vmatprep.subr.bf16.mxu1 %v6155_v4  ;;  %6057 = vmatprep.subr.bf16.mxu0 %v6056_v21 }
0x10f0   : > { %4908 = vst.msk [vmem:[#allocation3 + $0x1a8] sm:$0xff] %vm223_vm2, %v4884_v8  ;;  %v4889_v55 = vsel %vm321_vm8, %v8683_v40, %v4882_v22  ;;  %v4890_v52 = vsel %vm321_vm8, %v4882_v22, %v4884_v8  ;;  %6059 = vmatpush1.bf16.msra.mxu0 %v6058_v6 }
0x10f1   : > { %v6060_v44 = vpack.c.bf16 %v4890_v52, %v8600_v18  ;;  %v6062_v14 = vpack.c.bf16 %v4889_v55, %v8608_v25 }
0x10f2   : > { %6100 = vmatpush1.bf16.msra.mxu1 %v6099_v33 }
0x10f3   : > { %v5052_v32 = vpop.permute.xlu1 %5051  ;;  %v5056_v43 = vpop.permute.xlu0 %5055  ;;  %6101 = vmatprep.subr.bf16.mxu1 %v6155_v4  ;;  %v5136_v57 = vld [vmem:[#allocation3 + $0x160] sm:$0xff]  ;;  %6061 = vmatprep.subr.bf16.mxu0 %v6060_v44 }
0x10f4   : > { %v5066_v47 = vsel %vm384_vm11, %v8718_v60, %v5052_v32  ;;  %5082 = vst.msk [vmem:[#allocation3 + $0x250] sm:$0xff] %vm223_vm2, %v5052_v32  ;;  %v6102_v40 = vpack.c.bf16 %v5139_v58, %v5136_v57  ;;  %6063 = vmatpush1.bf16.msra.mxu0 %v6062_v14 }
0x10f5   : > { %6065 = vmatprep.subr.bf16.mxu0 %v6064_v13 }
0x10f6   : > { %6103 = vmatpush1.bf16.msra.mxu1 %v6102_v40 }
0x10f7   : > { %v4944_v18 = vpop.permute.xlu1 %4943  ;;  %v4942_v25 = vpop.permute.xlu0 %4941  ;;  %6104 = vmatprep.subr.bf16.mxu1 %v6155_v4  ;;  %v5145_v7 = vld [vmem:[#allocation3 + $0x1a8] sm:$0xff] }
0x10f8   : > { %4968 = vst.msk [vmem:[#allocation3 + $0x1f0] sm:$0xff] %vm223_vm2, %v4944_v18  ;;  %v4949_v3 = vsel %vm342_vm9, %v8685_v5, %v4942_v25  ;;  %v4950_v59 = vsel %vm342_vm9, %v4942_v25, %v4944_v18  ;;  %v6105_v61 = vpack.c.bf16 %v5145_v7, %v5142_v51  ;;  %6067 = vmatpush1.bf16.msra.mxu0 %v6066_v24 }
0x10f9   : > { %v6068_v62 = vpack.c.bf16 %v8644_v23, %v4950_v59  ;;  %v6070_v13 = vpack.c.bf16 %v8647_v19, %v4949_v3 }
0x10fa   : > { %6106 = vmatpush1.bf16.msra.mxu1 %v6105_v61 }
0x10fb   : > { %v5004_v45 = vpop.permute.xlu1 %5003  ;;  %v5002_v26 = vpop.permute.xlu0 %5001  ;;  %6107 = vmatprep.subr.bf16.mxu1 %v6155_v4  ;;  %6069 = vmatprep.subr.bf16.mxu0 %v6068_v62 }
0x10fc   : > { %5028 = vst.msk [vmem:[#allocation3 + $0x238] sm:$0xff] %vm223_vm2, %v5004_v45  ;;  %v5009_v5 = vsel %vm363_vm10, %v8716_v12, %v5002_v26  ;;  %v5010_v46 = vsel %vm363_vm10, %v5002_v26, %v5004_v45  ;;  %6071 = vmatpush1.bf16.msra.mxu0 %v6070_v13 }
0x10fd   : > { %v6072_v24 = vpack.c.bf16 %v5010_v46, %v8693_v34  ;;  %v6074_v23 = vpack.c.bf16 %v5009_v5, %v8697_v50 }
0x10fe   : > { %6109 = vmatpush1.bf16.msra.mxu1 %v6108_v38 }
0x10ff   : > { %v5058_v19 = vpop.permute.xlu1 %5057  ;;  %v5048_v49 = vpop.permute.xlu0 %5047  ;;  %6110 = vmatprep.subr.bf16.mxu1 %v6155_v4  ;;  %v5154_v39 = vld [vmem:[#allocation3 + $0x1f0] sm:$0xff]  ;;  %6073 = vmatprep.subr.bf16.mxu0 %v6072_v24 }
0x1100   : > { %v5068_v11 = vsel %vm384_vm11, %v5056_v43, %v5058_v19  ;;  %5085 = vst.msk [vmem:[#allocation3 + $0x268] sm:$0xff] %vm223_vm2, %v5058_v19  ;;  %v5065_v12 = vsel %vm384_vm11, %v5048_v49, %v8718_v60  ;;  %v6111_v10 = vpack.c.bf16 %v5157_v9, %v5154_v39  ;;  %6075 = vmatpush1.bf16.msra.mxu0 %v6074_v23  ;;  %v5166_v60 = vld [vmem:[#allocation3 + $0x250] sm:$0xff] }
0x1101   : > { %v6076_v34 = vpack.c.bf16 %v5068_v11, %v5066_v47 }
0x1102   : > { %6112 = vmatpush1.bf16.msra.mxu1 %v6111_v10 }
0x1103   : > { %v5054_v50 = vpop.permute.xlu1 %5053  ;;  %v5062_v17 = vpop.permute.xlu0 %5061  ;;  %6113 = vmatprep.subr.bf16.mxu1 %v6155_v4  ;;  %v5163_v41 = vld [vmem:[#allocation3 + $0x238] sm:$0xff]  ;;  %6077 = vmatprep.subr.bf16.mxu0 %v6076_v34 }
0x1104   : > { %v5067_v27 = vsel %vm384_vm11, %v5054_v50, %v5056_v43  ;;  %v6114_v30 = vpack.c.bf16 %v5163_v41, %v5160_v31 }
0x1105   : > { %v6078_v53 = vpack.c.bf16 %v5067_v27, %v5065_v12 }
0x1106   : > { %6115 = vmatpush1.bf16.msra.mxu1 %v6114_v30 }
0x1107   : > { %v5064_v56 = vpop.permute.xlu1 %5063  ;;  %v5060_v15 = vpop.permute.xlu0 %5059  ;;  %6116 = vmatprep.subr.bf16.mxu1 %v6155_v4  ;;  %v5169_v37 = vld [vmem:[#allocation3 + $0x268] sm:$0xff]  ;;  %6079 = vmatpush1.bf16.msra.mxu0 %v6078_v53 }
0x1108   : > { %v5070_v63 = vsel %vm384_vm11, %v5062_v17, %v5064_v56  ;;  %5088 = vst.msk [vmem:[#allocation3 + $0x280] sm:$0xff] %vm223_vm2, %v5064_v56  ;;  %v5069_v21 = vsel %vm384_vm11, %v5060_v15, %v5062_v17  ;;  %v6117_v6 = vpack.c.bf16 %v5169_v37, %v5166_v60 }
0x1109   : > { %5246 = vmatprep.subr.mxu0 %v5070_v63 }
0x110a   : > { %6118 = vmatpush1.bf16.msra.mxu1 %v6117_v6 }
0x110b   : > { %v5186_v8 = vpop.permute.xlu1 %5185  ;;  %v5188_v22 = vpop.permute.xlu0 %5187  ;;  %5317 = vmatprep.subr.mxu1 %v6154_v0  ;;  %5247 = vmatpush1.msra.mxu0 %v5069_v21 }
0x110c   : > { %v5190_v16 = vsel %vm1777_vm1, %v5186_v8, %v5188_v22 }
0x110d   : > { %5476 = vmatprep.mubr.msk.f32.mxu0 %vm8826_vm4, %v5190_v16  ;;  %5477 = vmatprep.mubr.msk.f32.mxu1 %vm8827_vm5, %v5190_v16 }
0x110f   : > { %v5184_v4 = vpop.permute.xlu1 %5183  ;;  %v5172_v55 = vld [vmem:[#allocation3 + $0x280] sm:$0xff] }
0x1110   : > { %v5189_v52 = vsel %vm1777_vm1, %v5184_v4, %v5186_v8  ;;  %5318 = vmatpush1.msra.mxu1 %v5172_v55  ;;  %vm8828_vm1 = vcmask 551936  }
0x1111   : > { %5330 = vmatmul.mubr.f32.vlgmr.msra.gmra.mrb[16].mxu1 %v5189_v52  ;;  %5259 = vmatmul.mubr.f32.vlgmr.msra.gmra.mrb[16].mxu0 %v5189_v52 }
0x111c   : > { %v5178_v33 = vpop.permute.xlu0 %5177 }
0x11e4   : > { %v5331_v44 = vpop.f32.mrb[16].mxu1  ;;  %v5260_v14 = vpop.f32.mrb[16].mxu0 }
0x11e5   : > { %v5332_v32 = vadd.f32 %v5331_v44, %v5178_v33  ;;  %v5333_v43 = vpop.f32.mrb[17].mxu1  ;;  %v5261_v0 = vadd.f32 %v5260_v14, %v5178_v33  ;;  %v5262_v57 = vpop.f32.mrb[17].mxu0 }
0x11e6   : > { %v5263_v58 = vadd.f32 %v5262_v57, %v5178_v33 }
0x11e7   : > { %v5335_v47 = vmul.f32 %v5261_v0, %v6335_v20  ;;  %v5337_v18 = vmul.f32 %v5332_v32, %v6340_v29 }
0x11e8   : > { %v5336_v40 = vmul.f32 %v5263_v58, %v6338_v28 }
0x11e9   : > { %v5341_v25 = vmul.f32 0.2, %v5335_v47  ;;  %v5343_v7 = vmul.f32 0.2, %v5337_v18 }
0x11ea   : > { %v5342_v51 = vmul.f32 0.2, %v5336_v40 }
0x11eb   : > { %5347 = vrot.lane.b32.xlu1 %v5341_v25, %s6166_s9 }
0x11ec   : > { %5349 = vrot.lane.b32.xlu0 %v5342_v51, %s6166_s9 }
0x11ef   : > { %5351 = vrot.lane.b32.xlu1 %v5343_v7, %s6166_s9  ;;  %s197_s9 = scalar_lea.vmem %s8808_s4, %s6119_s17 }
0x125d   : > { %v5348_v3 = vpop.permute.xlu1 %5347 }
0x125e   : > { %v5358_v59 = vadd.f32 %v5348_v3, %v8495_v35  ;;  %v5350_v61 = vpop.permute.xlu0 %5349 }
0x125f   : > { %v5353_v20 = vsel %vm600_vm14, %v5348_v3, %v5350_v61 }
0x1260   : > { %5361 = vst.msk [vmem:[#allocation2] sm:$0xff] %vm606_vm13, %v5358_v59  ;;  %v5359_v28 = vadd.f32 %v5353_v20, %v8487_v54 }
0x1261   : > { %v5352_v29 = vpop.permute.xlu1 %5351 }
0x1262   : > { %5362 = vst [vmem:[#allocation2 + $0x8] sm:$0xff] %v5359_v28  ;;  %v5354_v42 = vsel %vm600_vm14, %v5350_v61, %v5352_v29 }
0x1263   : > { %v5360_v62 = vadd.f32 %v5354_v42, %v8475_v48 }
0x1265   : > { %5363 = vst.msk [vmem:[#allocation2 + $0x10] sm:$0xff] %vm609_vm15, %v5360_v62 }
0x1267   : > { %v5364_v13 = vld [vmem:[#allocation2] sm:$0xf] }
0x1268   : > { %v5367_v26 = vmul.f32 0.2, %v5364_v13 }
0x1269   : > { %v5365_v45 = vld [vmem:[#allocation2 + $0x8] sm:$0xf] }
0x126a   : > { %v5368_v35 = vmul.f32 0.2, %v5365_v45 }
0x126c   : > { %v5372_v36 = vcombine.low %v5367_v26, %v5368_v35  ;;  %v5366_v5 = vld [vmem:[#allocation2 + $0x10] sm:$0xf] }
0x126d   : > { %v5369_v54 = vmul.f32 0.2, %v5366_v5 }
0x126e   : > { %v5374_v46 = vadd.f32 %v5372_v36, %v6220_v2 }
0x126f   : > { %v5375_v38 = vadd.f32 %v5369_v54, %v6218_v1 }
0x1270   : > { %5376 = vst [vmem:[%s197_s9] sm:$0xff] %v5374_v46 }
0x1271   : > { %5377 = vst.msk [vmem:[%s197_s9 + $0x8] sm:$0xf] %vm8828_vm1, %v5375_v38 }
0x1272 PF: > { %s14_s15 = sadd.s32 1, %s6152_s15  }
0x1273   : > { %p11_p4 = scmp.ge.s32.totalorder %s14_s15, 4  }
0x1275   :  { %13 = sbr.rel (!%p11_p4) target bundleno = 1 (0x1), region = 76 }

</bundles_post_ra>
